<compile_context>
chip_gen: v7x
topology: tpu7x:2x2x1
jax: 0.10.0
libtpu: 0.0.40
codegen_flags: <defaults>
</compile_context>

<pallas_src>
import math

import jax
import jax.numpy as jnp
from jax import lax
from jax.experimental import pallas as pl
from jax.experimental.pallas import tpu as pltpu

# ---- small config, structurally consistent with ViT-B/32 ----
PATCH = 32
IMG = 64                     # 2x2 = 4 patches -> seq = 5 with class token
IN_CH = 3
HIDDEN = 64
NUM_HEADS = 4
HEAD_DIM = HIDDEN // NUM_HEADS
MLP_DIM = 128
NUM_LAYERS = 2
NUM_CLASSES = 10
LN_EPS = 1e-6                # torchvision ViT uses LayerNorm(eps=1e-6)
POS_EMB_FLAG = True          # module default

N_PATCH = (IMG // PATCH) ** 2            # 4
SEQ = N_PATCH + 1                        # 5 real tokens (cls + patches)
SP = 8                                   # padded tokens per image (one sublane tile)
PF = IN_CH * PATCH * PATCH               # 3072 flattened patch features (lane-dense)
HEAD_OUT = 128                           # lane-padded classifier width
ATTN_SCALE = 1.0 / math.sqrt(HEAD_DIM)


# --------------------------- fused Pallas kernel -----------------------------

def _layernorm(x):
    # affine (gamma, beta) is folded into the following matmul in the wrapper
    mean = jnp.mean(x, axis=-1, keepdims=True)
    cen = x - mean
    var = jnp.mean(cen * cen, axis=-1, keepdims=True)
    return cen * lax.rsqrt(var + LN_EPS)


def _gelu(x):
    # TODO(synk): torch nn.GELU() default is the exact erf form; tanh approximation
    # is used here (no guaranteed erf lowering in Mosaic).
    return 0.5 * x * (1.0 + jnp.tanh(0.7978845608028654 * (x + 0.044715 * x * x * x)))


def _vit_kernel(patch_ref, scat_ref, emb_ref, mask_ref, convw_ref,
                qw_ref, kw_ref, vw_ref, qkvb_ref, outw_ref, outb_ref,
                fc1w_ref, fc1b_ref, fc2w_ref, fc2b_ref,
                headw_ref, headb_ref, o_ref):
    bb = o_ref.shape[0]                      # images per grid step
    H = NUM_HEADS

    def qkv_bias(l, which, hh):              # packed (L*3*H, 1, Dh) bias slab
        return qkvb_ref[(l * 3 + which) * H + hh]

    # Patch embedding: (BB*N_PATCH, PF) @ (PF, D), then scattered into the
    # (BB*SP, D) token slab with a 0/1 "shift by BB rows" matmul, plus the folded
    # (cls token | conv bias | positional embedding) additive slab.
    pe = jnp.dot(patch_ref[...], convw_ref[...], preferred_element_type=jnp.float32)
    z = jnp.dot(scat_ref[...], pe, preferred_element_type=jnp.float32) + emb_ref[...]

    # Static unroll is fine at depth 2.
    # TODO(synk): switch to lax.fori_loop with dynamic ref[l] indexing if NUM_LAYERS grows.
    for l in range(NUM_LAYERS):
        # ----- attention sub-block (pre-LN affine + score scale folded into weights) -----
        hb = _layernorm(z).astype(jnp.bfloat16)
        a = outb_ref[l]                                            # (1, D) out-proj bias
        for hh in range(H):
            q = jnp.dot(hb, qw_ref[l * H + hh],
                        preferred_element_type=jnp.float32) + qkv_bias(l, 0, hh)
            k = jnp.dot(hb, kw_ref[l * H + hh],
                        preferred_element_type=jnp.float32) + qkv_bias(l, 1, hh)
            v = jnp.dot(hb, vw_ref[l * H + hh],
                        preferred_element_type=jnp.float32) + qkv_bias(l, 2, hh)

            # scores on the whole (BB*SP) slab; same-image + key-padding handled by
            # the precomputed additive mask (block-diagonal over images).
            s = lax.dot_general(q.astype(jnp.bfloat16), k.astype(jnp.bfloat16),
                                (((1,), (1,)), ((), ())),
                                preferred_element_type=jnp.float32)
            s = s + mask_ref[...]
            s = s - jnp.max(s, axis=-1, keepdims=True)
            p = jnp.exp(s)
            p = p * pl.reciprocal(jnp.sum(p, axis=-1, keepdims=True), approx=True)

            o_h = jnp.dot(p.astype(jnp.bfloat16), v.astype(jnp.bfloat16),
                          preferred_element_type=jnp.float32)       # (M, Dh)
            # accumulate per-head output projection -> no concat relayout
            a = a + jnp.dot(o_h.astype(jnp.bfloat16), outw_ref[l * H + hh],
                            preferred_element_type=jnp.float32)
        z = z + a                                                   # residual

        # ----- MLP sub-block (pre-LN affine folded into fc1) -----
        hb = _layernorm(z).astype(jnp.bfloat16)
        h1 = _gelu(jnp.dot(hb, fc1w_ref[l],
                           preferred_element_type=jnp.float32) + fc1b_ref[l])
        h2 = jnp.dot(h1.astype(jnp.bfloat16), fc2w_ref[l],
                     preferred_element_type=jnp.float32) + fc2b_ref[l]
        z = z + h2                                                  # residual

    # final encoder LN (affine folded into head) + classifier on the BB cls rows only
    zc = _layernorm(z[0:bb, :])
    o_ref[...] = jnp.dot(zc.astype(jnp.bfloat16), headw_ref[...],
                         preferred_element_type=jnp.float32) + headb_ref[...]


# --------------------------- model forward ----------------------------------

def _choose_block_batch(B):
    # ~256 slab rows per grid step fills the v6e/v7x MXU (128 also fine on v5e);
    # keep >=2 grid steps when possible so v7x's two TensorCores both get work.
    bb = math.gcd(B, 32)
    if B // bb < 2 and bb > 1:
        bb = math.gcd(B, max(bb // 2, 1))
    return bb


def vit_forward(x, params, *, block_batch=None):
    B, C, Himg, Wimg = x.shape
    Hp, Wp = Himg // PATCH, Wimg // PATCH
    assert Hp * Wp == N_PATCH

    bb = _choose_block_batch(B) if block_batch is None else block_batch
    assert B % bb == 0
    G = B // bb                                 # grid steps
    M = SP * bb                                 # slab rows per step (row r -> token r//bb, image r%bb)
    NP = N_PATCH * bb                           # patch rows per step

    # ---- raw patch tile (no zero-padded slab): rows ordered (patch, image-in-block),
    #      channel-major (C, P, P) flatten matching conv_w ----
    p = x.reshape(G, bb, C, Hp, PATCH, Wp, PATCH)
    p = p.transpose(0, 3, 5, 1, 2, 4, 6)        # (G, Hp, Wp, bb, C, P, P)
    patches = p.reshape(G, NP, PF).astype(jnp.bfloat16)

    # ---- folded (cls token | conv bias | positional embedding) slab, tiled per image ----
    pos = (params["pos_emb"][0] if POS_EMB_FLAG
           else jnp.zeros((SEQ, HIDDEN), jnp.float32))
    emb_sp = jnp.zeros((SP, HIDDEN), jnp.float32)
    emb_sp = emb_sp.at[0].set(params["cls_token"].reshape(HIDDEN) + pos[0])
    emb_sp = emb_sp.at[1:SEQ].set(pos[1:SEQ] + params["conv_b"][None, :])
    emb = jnp.repeat(emb_sp, bb, axis=0)                           # (M, D)

    # ---- scatter matrix: slab row r gets patch row r-bb (rows bb..5bb-1) ----
    rows = jnp.arange(M)[:, None]
    scat = (jnp.arange(NP)[None, :] == rows - bb).astype(jnp.float32)   # (M, NP)

    # ---- additive attention mask: same image, key must be a real token ----
    img = jnp.arange(M) % bb
    allowed = (img[:, None] == img[None, :]) & (jnp.arange(M)[None, :] < SEQ * bb)
    mask = jnp.where(allowed, 0.0, -1e30).astype(jnp.float32)           # (M, M)

    # ---- weights: fold LN affine + attention scale, split per head, stack per layer ----
    bf = lambda a: a.astype(jnp.bfloat16)
    D, Hh, Dh, L = HIDDEN, NUM_HEADS, HEAD_DIM, NUM_LAYERS

    qw, kw, vw, qkvb = [], [], [], []
    outw, outb, fc1w, fc1b, fc2w, fc2b = [], [], [], [], [], []
    for lyr in params["layers"]:
        g1, b1 = lyr["ln1_g"], lyr["ln1_b"]
        Wqkv, bqkv = lyr["qkv_w"], lyr["qkv_b"]
        Wq, Wk, Wv = Wqkv[:, :D], Wqkv[:, D:2 * D], Wqkv[:, 2 * D:]
        bq, bk, bv = bqkv[:D], bqkv[D:2 * D], bqkv[2 * D:]
        Wq_f = (g1[:, None] * Wq) * ATTN_SCALE
        bq_f = (bq + b1 @ Wq) * ATTN_SCALE
        Wk_f, bk_f = g1[:, None] * Wk, bk + b1 @ Wk
        Wv_f, bv_f = g1[:, None] * Wv, bv + b1 @ Wv
        qw.append(Wq_f.reshape(D, Hh, Dh).transpose(1, 0, 2))       # (H, D, Dh)
        kw.append(Wk_f.reshape(D, Hh, Dh).transpose(1, 0, 2))
        vw.append(Wv_f.reshape(D, Hh, Dh).transpose(1, 0, 2))
        qkvb.append(jnp.stack([bq_f.reshape(Hh, 1, Dh),
                               bk_f.reshape(Hh, 1, Dh),
                               bv_f.reshape(Hh, 1, Dh)]))            # (3, H, 1, Dh)
        outw.append(lyr["out_w"].reshape(Hh, Dh, D))                 # (H, Dh, D)
        outb.append(lyr["out_b"].reshape(1, D))
        g2, b2 = lyr["ln2_g"], lyr["ln2_b"]
        fc1w.append(g2[:, None] * lyr["fc1_w"])
        fc1b.append((lyr["fc1_b"] + b2 @ lyr["fc1_w"]).reshape(1, MLP_DIM))
        fc2w.append(lyr["fc2_w"])
        fc2b.append(lyr["fc2_b"].reshape(1, D))

    qw = bf(jnp.stack(qw).reshape(L * Hh, D, Dh))
    kw = bf(jnp.stack(kw).reshape(L * Hh, D, Dh))
    vw = bf(jnp.stack(vw).reshape(L * Hh, D, Dh))
    qkvb = jnp.stack(qkvb).reshape(L * 3 * Hh, 1, Dh)                # packed bias slab
    outw = bf(jnp.stack(outw).reshape(L * Hh, Dh, D))
    outb = jnp.stack(outb)                                           # (L, 1, D)
    fc1w = bf(jnp.stack(fc1w))
    fc1b = jnp.stack(fc1b)
    fc2w = bf(jnp.stack(fc2w))
    fc2b = jnp.stack(fc2b)
    convw = bf(params["conv_w"])

    Wh = params["ln_g"][:, None] * params["head_w"]
    bh = params["head_b"] + params["ln_b"] @ params["head_w"]
    headw = jnp.zeros((D, HEAD_OUT), jnp.bfloat16).at[:, :NUM_CLASSES].set(bf(Wh))
    headb = jnp.zeros((1, HEAD_OUT), jnp.float32).at[0, :NUM_CLASSES].set(bh)

    weights = (scat, emb, mask, convw, qw, kw, vw, qkvb, outw, outb,
               fc1w, fc1b, fc2w, fc2b, headw, headb)

    def full(arr):
        return pl.BlockSpec(arr.shape, lambda g, n=arr.ndim: (0,) * n)

    out = pl.pallas_call(
        _vit_kernel,
        grid=(G,),
        in_specs=[pl.BlockSpec((None, NP, PF), lambda g: (g, 0, 0))]
                 + [full(w) for w in weights],
        out_specs=pl.BlockSpec((None, bb, HEAD_OUT), lambda g: (g, 0, 0)),
        out_shape=jax.ShapeDtypeStruct((G, bb, HEAD_OUT), jnp.float32),
        compiler_params=pltpu.CompilerParams(
            dimension_semantics=("parallel",)),
    )(patches, *weights)

    # cls-row logits, un-pad classifier lanes
    return out.reshape(B, HEAD_OUT)[:, :NUM_CLASSES]


# --------------------------- deterministic params ---------------------------

def init_params(key):
    seq = (IMG // PATCH) ** 2 + 1
    keys = jax.random.split(key, 3 + NUM_LAYERS)

    def nrm(k, shape, std=0.02):
        return (std * jax.random.normal(k, shape)).astype(jnp.float32)

    params = {
        "conv_w": nrm(keys[0], (IN_CH * PATCH * PATCH, HIDDEN)),
        "conv_b": jnp.zeros((HIDDEN,), jnp.float32),
        "cls_token": jnp.zeros((1, 1, HIDDEN), jnp.float32),
        "pos_emb": nrm(keys[1], (1, seq, HIDDEN)),
        "ln_g": jnp.ones((HIDDEN,), jnp.float32),
        "ln_b": jnp.zeros((HIDDEN,), jnp.float32),
        "head_w": nrm(keys[2], (HIDDEN, NUM_CLASSES)),
        "head_b": jnp.zeros((NUM_CLASSES,), jnp.float32),
        "layers": [],
    }
    for i in range(NUM_LAYERS):
        lk = jax.random.split(jax.random.fold_in(key, 100 + i), 4)
        params["layers"].append({
            "ln1_g": jnp.ones((HIDDEN,), jnp.float32),
            "ln1_b": jnp.zeros((HIDDEN,), jnp.float32),
            "qkv_w": nrm(lk[0], (HIDDEN, 3 * HIDDEN)),
            "qkv_b": jnp.zeros((3 * HIDDEN,), jnp.float32),
            "out_w": nrm(lk[1], (HIDDEN, HIDDEN)),
            "out_b": jnp.zeros((HIDDEN,), jnp.float32),
            "ln2_g": jnp.ones((HIDDEN,), jnp.float32),
            "ln2_b": jnp.zeros((HIDDEN,), jnp.float32),
            "fc1_w": nrm(lk[2], (HIDDEN, MLP_DIM)),
            "fc1_b": jnp.zeros((MLP_DIM,), jnp.float32),
            "fc2_w": nrm(lk[3], (MLP_DIM, HIDDEN)),
            "fc2_b": jnp.zeros((HIDDEN,), jnp.float32),
        })
    return params


if __name__ == "__main__":
    key = jax.random.PRNGKey(0)
    pkey, xkey = jax.random.split(key)
    params = init_params(pkey)
    x = jax.random.normal(xkey, (2, IN_CH, IMG, IMG), dtype=jnp.float32)

    logits = jax.jit(vit_forward)(x, params)
    jax.block_until_ready(logits)
    assert logits.shape == (2, NUM_CLASSES)
    assert bool(jnp.all(jnp.isfinite(logits)))
    print("KERNEL_OK")
</pallas_src>

<mosaic_0001>
module attributes {stable_mosaic.version = 11 : i64} {
  func.func @_vit_kernel(%arg0: i32, %arg1: memref<1x4x3072xbf16, #tpu.memory_space<vmem>>, %arg2: memref<8x4xf32, #tpu.memory_space<vmem>>, %arg3: memref<8x64xf32, #tpu.memory_space<vmem>>, %arg4: memref<8x8xf32, #tpu.memory_space<vmem>>, %arg5: memref<3072x64xbf16, #tpu.memory_space<vmem>>, %arg6: memref<8x64x16xbf16, #tpu.memory_space<vmem>>, %arg7: memref<8x64x16xbf16, #tpu.memory_space<vmem>>, %arg8: memref<8x64x16xbf16, #tpu.memory_space<vmem>>, %arg9: memref<24x1x16xf32, #tpu.memory_space<vmem>>, %arg10: memref<8x16x64xbf16, #tpu.memory_space<vmem>>, %arg11: memref<2x1x64xf32, #tpu.memory_space<vmem>>, %arg12: memref<2x64x128xbf16, #tpu.memory_space<vmem>>, %arg13: memref<2x1x128xf32, #tpu.memory_space<vmem>>, %arg14: memref<2x128x64xbf16, #tpu.memory_space<vmem>>, %arg15: memref<2x1x64xf32, #tpu.memory_space<vmem>>, %arg16: memref<64x128xbf16, #tpu.memory_space<vmem>>, %arg17: memref<1x128xf32, #tpu.memory_space<vmem>>, %arg18: memref<1x1x128xf32, #tpu.memory_space<vmem>>) attributes {dimension_semantics = [#tpu.dimension_semantics<parallel>], iteration_bounds = array<i64: 2>, scalar_prefetch = 0 : i64, scratch_operands = 0 : i64, tpu.core_type = #tpu.core_type<tc>, window_params = [{transform_indices = @transform_0, window_bounds = array<i64: 1, 4, 3072>}, {pipeline_mode = #tpu.pipeline_mode<synchronous>, transform_indices = @transform_1, window_bounds = array<i64: 8, 4>}, {pipeline_mode = #tpu.pipeline_mode<synchronous>, transform_indices = @transform_2, window_bounds = array<i64: 8, 64>}, {pipeline_mode = #tpu.pipeline_mode<synchronous>, transform_indices = @transform_3, window_bounds = array<i64: 8, 8>}, {pipeline_mode = #tpu.pipeline_mode<synchronous>, transform_indices = @transform_4, window_bounds = array<i64: 3072, 64>}, {pipeline_mode = #tpu.pipeline_mode<synchronous>, transform_indices = @transform_5, window_bounds = array<i64: 8, 64, 16>}, {pipeline_mode = #tpu.pipeline_mode<synchronous>, transform_indices = @transform_6, window_bounds = array<i64: 8, 64, 16>}, {pipeline_mode = #tpu.pipeline_mode<synchronous>, transform_indices = @transform_7, window_bounds = array<i64: 8, 64, 16>}, {pipeline_mode = #tpu.pipeline_mode<synchronous>, transform_indices = @transform_8, window_bounds = array<i64: 24, 1, 16>}, {pipeline_mode = #tpu.pipeline_mode<synchronous>, transform_indices = @transform_9, window_bounds = array<i64: 8, 16, 64>}, {pipeline_mode = #tpu.pipeline_mode<synchronous>, transform_indices = @transform_10, window_bounds = array<i64: 2, 1, 64>}, {pipeline_mode = #tpu.pipeline_mode<synchronous>, transform_indices = @transform_11, window_bounds = array<i64: 2, 64, 128>}, {pipeline_mode = #tpu.pipeline_mode<synchronous>, transform_indices = @transform_12, window_bounds = array<i64: 2, 1, 128>}, {pipeline_mode = #tpu.pipeline_mode<synchronous>, transform_indices = @transform_13, window_bounds = array<i64: 2, 128, 64>}, {pipeline_mode = #tpu.pipeline_mode<synchronous>, transform_indices = @transform_14, window_bounds = array<i64: 2, 1, 64>}, {pipeline_mode = #tpu.pipeline_mode<synchronous>, transform_indices = @transform_15, window_bounds = array<i64: 64, 128>}, {pipeline_mode = #tpu.pipeline_mode<synchronous>, transform_indices = @transform_16, window_bounds = array<i64: 1, 128>}, {transform_indices = @transform_17, window_bounds = array<i64: 1, 1, 128>}]} {
    %c0 = arith.constant 0 : index
    %c0_0 = arith.constant 0 : index
    %c0_1 = arith.constant 0 : index
    %0 = vector.load %arg1[%c0, %c0_0, %c0_1] : memref<1x4x3072xbf16, #tpu.memory_space<vmem>>, vector<1x4x3072xbf16>
    %1 = vector.shape_cast %0 : vector<1x4x3072xbf16> to vector<4x3072xbf16>
    %c0_2 = arith.constant 0 : index
    %c0_3 = arith.constant 0 : index
    %2 = vector.load %arg5[%c0_2, %c0_3] : memref<3072x64xbf16, #tpu.memory_space<vmem>>, vector<3072x64xbf16>
    %cst = arith.constant dense<0.000000e+00> : vector<4x64xf32>
    %3 = tpu.matmul %1, %2, %cst {dimension_numbers = #tpu.dot_dimension_numbers<[1], [0], [0], [1], [0, 0, 1, 1], [], []>} : vector<4x3072xbf16>, vector<3072x64xbf16>, vector<4x64xf32> -> vector<4x64xf32>
    %c0_4 = arith.constant 0 : index
    %c0_5 = arith.constant 0 : index
    %4 = vector.load %arg2[%c0_4, %c0_5] : memref<8x4xf32, #tpu.memory_space<vmem>>, vector<8x4xf32>
    %cst_6 = arith.constant dense<0.000000e+00> : vector<8x64xf32>
    %5 = tpu.matmul %4, %3, %cst_6 {dimension_numbers = #tpu.dot_dimension_numbers<[1], [0], [0], [1], [0, 0, 1, 1], [], []>} : vector<8x4xf32>, vector<4x64xf32>, vector<8x64xf32> -> vector<8x64xf32>
    %c0_7 = arith.constant 0 : index
    %c0_8 = arith.constant 0 : index
    %6 = vector.load %arg3[%c0_7, %c0_8] : memref<8x64xf32, #tpu.memory_space<vmem>>, vector<8x64xf32>
    %7 = arith.addf %5, %6 : vector<8x64xf32>
    %cst_9 = arith.constant dense<0.000000e+00> : vector<8xf32>
    %8 = vector.multi_reduction <add>, %7, %cst_9 [1] : vector<8x64xf32> to vector<8xf32>
    %9 = vector.shape_cast %8 : vector<8xf32> to vector<8x1xf32>
    %cst_10 = arith.constant 6.400000e+01 : f32
    %10 = vector.broadcast %cst_10 : f32 to vector<8x1xf32>
    %11 = arith.divf %9, %10 : vector<8x1xf32>
    %12 = vector.broadcast %11 : vector<8x1xf32> to vector<8x64xf32>
    %13 = arith.subf %7, %12 : vector<8x64xf32>
    %14 = arith.mulf %13, %13 : vector<8x64xf32>
    %cst_11 = arith.constant dense<0.000000e+00> : vector<8xf32>
    %15 = vector.multi_reduction <add>, %14, %cst_11 [1] : vector<8x64xf32> to vector<8xf32>
    %16 = vector.shape_cast %15 : vector<8xf32> to vector<8x1xf32>
    %cst_12 = arith.constant 6.400000e+01 : f32
    %17 = vector.broadcast %cst_12 : f32 to vector<8x1xf32>
    %18 = arith.divf %16, %17 : vector<8x1xf32>
    %cst_13 = arith.constant 9.99999997E-7 : f32
    %19 = vector.broadcast %cst_13 : f32 to vector<8x1xf32>
    %20 = arith.addf %18, %19 : vector<8x1xf32>
    %21 = math.rsqrt %20 : vector<8x1xf32>
    %22 = vector.broadcast %21 : vector<8x1xf32> to vector<8x64xf32>
    %23 = arith.mulf %13, %22 : vector<8x64xf32>
    %24 = arith.truncf %23 : vector<8x64xf32> to vector<8x64xbf16>
    %c0_14 = arith.constant 0 : index
    %c0_15 = arith.constant 0 : index
    %c0_16 = arith.constant 0 : index
    %25 = vector.load %arg11[%c0_14, %c0_15, %c0_16] : memref<2x1x64xf32, #tpu.memory_space<vmem>>, vector<1x1x64xf32>
    %26 = vector.shape_cast %25 : vector<1x1x64xf32> to vector<1x64xf32>
    %c0_17 = arith.constant 0 : index
    %c0_18 = arith.constant 0 : index
    %c0_19 = arith.constant 0 : index
    %27 = vector.load %arg6[%c0_17, %c0_18, %c0_19] : memref<8x64x16xbf16, #tpu.memory_space<vmem>>, vector<1x64x16xbf16>
    %28 = vector.shape_cast %27 : vector<1x64x16xbf16> to vector<64x16xbf16>
    %cst_20 = arith.constant dense<0.000000e+00> : vector<8x16xf32>
    %29 = tpu.matmul %24, %28, %cst_20 {dimension_numbers = #tpu.dot_dimension_numbers<[1], [0], [0], [1], [0, 0, 1, 1], [], []>} : vector<8x64xbf16>, vector<64x16xbf16>, vector<8x16xf32> -> vector<8x16xf32>
    %c0_21 = arith.constant 0 : index
    %c0_22 = arith.constant 0 : index
    %c0_23 = arith.constant 0 : index
    %30 = vector.load %arg9[%c0_21, %c0_22, %c0_23] : memref<24x1x16xf32, #tpu.memory_space<vmem>>, vector<1x1x16xf32>
    %31 = vector.shape_cast %30 : vector<1x1x16xf32> to vector<1x16xf32>
    %32 = vector.broadcast %31 : vector<1x16xf32> to vector<8x16xf32>
    %33 = arith.addf %29, %32 : vector<8x16xf32>
    %c0_24 = arith.constant 0 : index
    %c0_25 = arith.constant 0 : index
    %c0_26 = arith.constant 0 : index
    %34 = vector.load %arg7[%c0_24, %c0_25, %c0_26] : memref<8x64x16xbf16, #tpu.memory_space<vmem>>, vector<1x64x16xbf16>
    %35 = vector.shape_cast %34 : vector<1x64x16xbf16> to vector<64x16xbf16>
    %cst_27 = arith.constant dense<0.000000e+00> : vector<8x16xf32>
    %36 = tpu.matmul %24, %35, %cst_27 {dimension_numbers = #tpu.dot_dimension_numbers<[1], [0], [0], [1], [0, 0, 1, 1], [], []>} : vector<8x64xbf16>, vector<64x16xbf16>, vector<8x16xf32> -> vector<8x16xf32>
    %c4 = arith.constant 4 : index
    %c0_28 = arith.constant 0 : index
    %c0_29 = arith.constant 0 : index
    %37 = vector.load %arg9[%c4, %c0_28, %c0_29] : memref<24x1x16xf32, #tpu.memory_space<vmem>>, vector<1x1x16xf32>
    %38 = vector.shape_cast %37 : vector<1x1x16xf32> to vector<1x16xf32>
    %39 = vector.broadcast %38 : vector<1x16xf32> to vector<8x16xf32>
    %40 = arith.addf %36, %39 : vector<8x16xf32>
    %c0_30 = arith.constant 0 : index
    %c0_31 = arith.constant 0 : index
    %c0_32 = arith.constant 0 : index
    %41 = vector.load %arg8[%c0_30, %c0_31, %c0_32] : memref<8x64x16xbf16, #tpu.memory_space<vmem>>, vector<1x64x16xbf16>
    %42 = vector.shape_cast %41 : vector<1x64x16xbf16> to vector<64x16xbf16>
    %cst_33 = arith.constant dense<0.000000e+00> : vector<8x16xf32>
    %43 = tpu.matmul %24, %42, %cst_33 {dimension_numbers = #tpu.dot_dimension_numbers<[1], [0], [0], [1], [0, 0, 1, 1], [], []>} : vector<8x64xbf16>, vector<64x16xbf16>, vector<8x16xf32> -> vector<8x16xf32>
    %c8 = arith.constant 8 : index
    %c0_34 = arith.constant 0 : index
    %c0_35 = arith.constant 0 : index
    %44 = vector.load %arg9[%c8, %c0_34, %c0_35] : memref<24x1x16xf32, #tpu.memory_space<vmem>>, vector<1x1x16xf32>
    %45 = vector.shape_cast %44 : vector<1x1x16xf32> to vector<1x16xf32>
    %46 = vector.broadcast %45 : vector<1x16xf32> to vector<8x16xf32>
    %47 = arith.addf %43, %46 : vector<8x16xf32>
    %48 = arith.truncf %33 : vector<8x16xf32> to vector<8x16xbf16>
    %49 = arith.truncf %40 : vector<8x16xf32> to vector<8x16xbf16>
    %cst_36 = arith.constant dense<0.000000e+00> : vector<8x8xf32>
    %50 = tpu.matmul %48, %49, %cst_36 {dimension_numbers = #tpu.dot_dimension_numbers<[1], [1], [0], [0], [0, 0, 1, 0], [], []>} : vector<8x16xbf16>, vector<8x16xbf16>, vector<8x8xf32> -> vector<8x8xf32>
    %c0_37 = arith.constant 0 : index
    %c0_38 = arith.constant 0 : index
    %51 = vector.load %arg4[%c0_37, %c0_38] : memref<8x8xf32, #tpu.memory_space<vmem>>, vector<8x8xf32>
    %52 = arith.addf %50, %51 : vector<8x8xf32>
    %cst_39 = arith.constant dense<0xFF800000> : vector<8xf32>
    %53 = vector.multi_reduction <maximumf>, %52, %cst_39 [1] : vector<8x8xf32> to vector<8xf32>
    %54 = vector.shape_cast %53 : vector<8xf32> to vector<8x1xf32>
    %55 = vector.broadcast %54 : vector<8x1xf32> to vector<8x8xf32>
    %56 = arith.subf %52, %55 : vector<8x8xf32>
    %57 = math.exp %56 : vector<8x8xf32>
    %cst_40 = arith.constant dense<0.000000e+00> : vector<8xf32>
    %58 = vector.multi_reduction <add>, %57, %cst_40 [1] : vector<8x8xf32> to vector<8xf32>
    %59 = vector.shape_cast %58 : vector<8xf32> to vector<8x1xf32>
    %60 = tpu.reciprocal %59 {approx = true} : vector<8x1xf32> -> vector<8x1xf32>
    %61 = vector.broadcast %60 : vector<8x1xf32> to vector<8x8xf32>
    %62 = arith.mulf %57, %61 : vector<8x8xf32>
    %63 = arith.truncf %62 : vector<8x8xf32> to vector<8x8xbf16>
    %64 = arith.truncf %47 : vector<8x16xf32> to vector<8x16xbf16>
    %cst_41 = arith.constant dense<0.000000e+00> : vector<8x16xf32>
    %65 = tpu.matmul %63, %64, %cst_41 {dimension_numbers = #tpu.dot_dimension_numbers<[1], [0], [0], [1], [0, 0, 1, 1], [], []>} : vector<8x8xbf16>, vector<8x16xbf16>, vector<8x16xf32> -> vector<8x16xf32>
    %66 = arith.truncf %65 : vector<8x16xf32> to vector<8x16xbf16>
    %c0_42 = arith.constant 0 : index
    %c0_43 = arith.constant 0 : index
    %c0_44 = arith.constant 0 : index
    %67 = vector.load %arg10[%c0_42, %c0_43, %c0_44] : memref<8x16x64xbf16, #tpu.memory_space<vmem>>, vector<1x16x64xbf16>
    %68 = vector.shape_cast %67 : vector<1x16x64xbf16> to vector<16x64xbf16>
    %cst_45 = arith.constant dense<0.000000e+00> : vector<8x64xf32>
    %69 = tpu.matmul %66, %68, %cst_45 {dimension_numbers = #tpu.dot_dimension_numbers<[1], [0], [0], [1], [0, 0, 1, 1], [], []>} : vector<8x16xbf16>, vector<16x64xbf16>, vector<8x64xf32> -> vector<8x64xf32>
    %70 = vector.broadcast %26 : vector<1x64xf32> to vector<8x64xf32>
    %71 = arith.addf %70, %69 : vector<8x64xf32>
    %c1 = arith.constant 1 : index
    %c0_46 = arith.constant 0 : index
    %c0_47 = arith.constant 0 : index
    %72 = vector.load %arg6[%c1, %c0_46, %c0_47] : memref<8x64x16xbf16, #tpu.memory_space<vmem>>, vector<1x64x16xbf16>
    %73 = vector.shape_cast %72 : vector<1x64x16xbf16> to vector<64x16xbf16>
    %cst_48 = arith.constant dense<0.000000e+00> : vector<8x16xf32>
    %74 = tpu.matmul %24, %73, %cst_48 {dimension_numbers = #tpu.dot_dimension_numbers<[1], [0], [0], [1], [0, 0, 1, 1], [], []>} : vector<8x64xbf16>, vector<64x16xbf16>, vector<8x16xf32> -> vector<8x16xf32>
    %c1_49 = arith.constant 1 : index
    %c0_50 = arith.constant 0 : index
    %c0_51 = arith.constant 0 : index
    %75 = vector.load %arg9[%c1_49, %c0_50, %c0_51] : memref<24x1x16xf32, #tpu.memory_space<vmem>>, vector<1x1x16xf32>
    %76 = vector.shape_cast %75 : vector<1x1x16xf32> to vector<1x16xf32>
    %77 = vector.broadcast %76 : vector<1x16xf32> to vector<8x16xf32>
    %78 = arith.addf %74, %77 : vector<8x16xf32>
    %c1_52 = arith.constant 1 : index
    %c0_53 = arith.constant 0 : index
    %c0_54 = arith.constant 0 : index
    %79 = vector.load %arg7[%c1_52, %c0_53, %c0_54] : memref<8x64x16xbf16, #tpu.memory_space<vmem>>, vector<1x64x16xbf16>
    %80 = vector.shape_cast %79 : vector<1x64x16xbf16> to vector<64x16xbf16>
    %cst_55 = arith.constant dense<0.000000e+00> : vector<8x16xf32>
    %81 = tpu.matmul %24, %80, %cst_55 {dimension_numbers = #tpu.dot_dimension_numbers<[1], [0], [0], [1], [0, 0, 1, 1], [], []>} : vector<8x64xbf16>, vector<64x16xbf16>, vector<8x16xf32> -> vector<8x16xf32>
    %c5 = arith.constant 5 : index
    %c0_56 = arith.constant 0 : index
    %c0_57 = arith.constant 0 : index
    %82 = vector.load %arg9[%c5, %c0_56, %c0_57] : memref<24x1x16xf32, #tpu.memory_space<vmem>>, vector<1x1x16xf32>
    %83 = vector.shape_cast %82 : vector<1x1x16xf32> to vector<1x16xf32>
    %84 = vector.broadcast %83 : vector<1x16xf32> to vector<8x16xf32>
    %85 = arith.addf %81, %84 : vector<8x16xf32>
    %c1_58 = arith.constant 1 : index
    %c0_59 = arith.constant 0 : index
    %c0_60 = arith.constant 0 : index
    %86 = vector.load %arg8[%c1_58, %c0_59, %c0_60] : memref<8x64x16xbf16, #tpu.memory_space<vmem>>, vector<1x64x16xbf16>
    %87 = vector.shape_cast %86 : vector<1x64x16xbf16> to vector<64x16xbf16>
    %cst_61 = arith.constant dense<0.000000e+00> : vector<8x16xf32>
    %88 = tpu.matmul %24, %87, %cst_61 {dimension_numbers = #tpu.dot_dimension_numbers<[1], [0], [0], [1], [0, 0, 1, 1], [], []>} : vector<8x64xbf16>, vector<64x16xbf16>, vector<8x16xf32> -> vector<8x16xf32>
    %c9 = arith.constant 9 : index
    %c0_62 = arith.constant 0 : index
    %c0_63 = arith.constant 0 : index
    %89 = vector.load %arg9[%c9, %c0_62, %c0_63] : memref<24x1x16xf32, #tpu.memory_space<vmem>>, vector<1x1x16xf32>
    %90 = vector.shape_cast %89 : vector<1x1x16xf32> to vector<1x16xf32>
    %91 = vector.broadcast %90 : vector<1x16xf32> to vector<8x16xf32>
    %92 = arith.addf %88, %91 : vector<8x16xf32>
    %93 = arith.truncf %78 : vector<8x16xf32> to vector<8x16xbf16>
    %94 = arith.truncf %85 : vector<8x16xf32> to vector<8x16xbf16>
    %cst_64 = arith.constant dense<0.000000e+00> : vector<8x8xf32>
    %95 = tpu.matmul %93, %94, %cst_64 {dimension_numbers = #tpu.dot_dimension_numbers<[1], [1], [0], [0], [0, 0, 1, 0], [], []>} : vector<8x16xbf16>, vector<8x16xbf16>, vector<8x8xf32> -> vector<8x8xf32>
    %c0_65 = arith.constant 0 : index
    %c0_66 = arith.constant 0 : index
    %96 = vector.load %arg4[%c0_65, %c0_66] : memref<8x8xf32, #tpu.memory_space<vmem>>, vector<8x8xf32>
    %97 = arith.addf %95, %96 : vector<8x8xf32>
    %cst_67 = arith.constant dense<0xFF800000> : vector<8xf32>
    %98 = vector.multi_reduction <maximumf>, %97, %cst_67 [1] : vector<8x8xf32> to vector<8xf32>
    %99 = vector.shape_cast %98 : vector<8xf32> to vector<8x1xf32>
    %100 = vector.broadcast %99 : vector<8x1xf32> to vector<8x8xf32>
    %101 = arith.subf %97, %100 : vector<8x8xf32>
    %102 = math.exp %101 : vector<8x8xf32>
    %cst_68 = arith.constant dense<0.000000e+00> : vector<8xf32>
    %103 = vector.multi_reduction <add>, %102, %cst_68 [1] : vector<8x8xf32> to vector<8xf32>
    %104 = vector.shape_cast %103 : vector<8xf32> to vector<8x1xf32>
    %105 = tpu.reciprocal %104 {approx = true} : vector<8x1xf32> -> vector<8x1xf32>
    %106 = vector.broadcast %105 : vector<8x1xf32> to vector<8x8xf32>
    %107 = arith.mulf %102, %106 : vector<8x8xf32>
    %108 = arith.truncf %107 : vector<8x8xf32> to vector<8x8xbf16>
    %109 = arith.truncf %92 : vector<8x16xf32> to vector<8x16xbf16>
    %cst_69 = arith.constant dense<0.000000e+00> : vector<8x16xf32>
    %110 = tpu.matmul %108, %109, %cst_69 {dimension_numbers = #tpu.dot_dimension_numbers<[1], [0], [0], [1], [0, 0, 1, 1], [], []>} : vector<8x8xbf16>, vector<8x16xbf16>, vector<8x16xf32> -> vector<8x16xf32>
    %111 = arith.truncf %110 : vector<8x16xf32> to vector<8x16xbf16>
    %c1_70 = arith.constant 1 : index
    %c0_71 = arith.constant 0 : index
    %c0_72 = arith.constant 0 : index
    %112 = vector.load %arg10[%c1_70, %c0_71, %c0_72] : memref<8x16x64xbf16, #tpu.memory_space<vmem>>, vector<1x16x64xbf16>
    %113 = vector.shape_cast %112 : vector<1x16x64xbf16> to vector<16x64xbf16>
    %cst_73 = arith.constant dense<0.000000e+00> : vector<8x64xf32>
    %114 = tpu.matmul %111, %113, %cst_73 {dimension_numbers = #tpu.dot_dimension_numbers<[1], [0], [0], [1], [0, 0, 1, 1], [], []>} : vector<8x16xbf16>, vector<16x64xbf16>, vector<8x64xf32> -> vector<8x64xf32>
    %115 = arith.addf %71, %114 : vector<8x64xf32>
    %c2 = arith.constant 2 : index
    %c0_74 = arith.constant 0 : index
    %c0_75 = arith.constant 0 : index
    %116 = vector.load %arg6[%c2, %c0_74, %c0_75] : memref<8x64x16xbf16, #tpu.memory_space<vmem>>, vector<1x64x16xbf16>
    %117 = vector.shape_cast %116 : vector<1x64x16xbf16> to vector<64x16xbf16>
    %cst_76 = arith.constant dense<0.000000e+00> : vector<8x16xf32>
    %118 = tpu.matmul %24, %117, %cst_76 {dimension_numbers = #tpu.dot_dimension_numbers<[1], [0], [0], [1], [0, 0, 1, 1], [], []>} : vector<8x64xbf16>, vector<64x16xbf16>, vector<8x16xf32> -> vector<8x16xf32>
    %c2_77 = arith.constant 2 : index
    %c0_78 = arith.constant 0 : index
    %c0_79 = arith.constant 0 : index
    %119 = vector.load %arg9[%c2_77, %c0_78, %c0_79] : memref<24x1x16xf32, #tpu.memory_space<vmem>>, vector<1x1x16xf32>
    %120 = vector.shape_cast %119 : vector<1x1x16xf32> to vector<1x16xf32>
    %121 = vector.broadcast %120 : vector<1x16xf32> to vector<8x16xf32>
    %122 = arith.addf %118, %121 : vector<8x16xf32>
    %c2_80 = arith.constant 2 : index
    %c0_81 = arith.constant 0 : index
    %c0_82 = arith.constant 0 : index
    %123 = vector.load %arg7[%c2_80, %c0_81, %c0_82] : memref<8x64x16xbf16, #tpu.memory_space<vmem>>, vector<1x64x16xbf16>
    %124 = vector.shape_cast %123 : vector<1x64x16xbf16> to vector<64x16xbf16>
    %cst_83 = arith.constant dense<0.000000e+00> : vector<8x16xf32>
    %125 = tpu.matmul %24, %124, %cst_83 {dimension_numbers = #tpu.dot_dimension_numbers<[1], [0], [0], [1], [0, 0, 1, 1], [], []>} : vector<8x64xbf16>, vector<64x16xbf16>, vector<8x16xf32> -> vector<8x16xf32>
    %c6 = arith.constant 6 : index
    %c0_84 = arith.constant 0 : index
    %c0_85 = arith.constant 0 : index
    %126 = vector.load %arg9[%c6, %c0_84, %c0_85] : memref<24x1x16xf32, #tpu.memory_space<vmem>>, vector<1x1x16xf32>
    %127 = vector.shape_cast %126 : vector<1x1x16xf32> to vector<1x16xf32>
    %128 = vector.broadcast %127 : vector<1x16xf32> to vector<8x16xf32>
    %129 = arith.addf %125, %128 : vector<8x16xf32>
    %c2_86 = arith.constant 2 : index
    %c0_87 = arith.constant 0 : index
    %c0_88 = arith.constant 0 : index
    %130 = vector.load %arg8[%c2_86, %c0_87, %c0_88] : memref<8x64x16xbf16, #tpu.memory_space<vmem>>, vector<1x64x16xbf16>
    %131 = vector.shape_cast %130 : vector<1x64x16xbf16> to vector<64x16xbf16>
    %cst_89 = arith.constant dense<0.000000e+00> : vector<8x16xf32>
    %132 = tpu.matmul %24, %131, %cst_89 {dimension_numbers = #tpu.dot_dimension_numbers<[1], [0], [0], [1], [0, 0, 1, 1], [], []>} : vector<8x64xbf16>, vector<64x16xbf16>, vector<8x16xf32> -> vector<8x16xf32>
    %c10 = arith.constant 10 : index
    %c0_90 = arith.constant 0 : index
    %c0_91 = arith.constant 0 : index
    %133 = vector.load %arg9[%c10, %c0_90, %c0_91] : memref<24x1x16xf32, #tpu.memory_space<vmem>>, vector<1x1x16xf32>
    %134 = vector.shape_cast %133 : vector<1x1x16xf32> to vector<1x16xf32>
    %135 = vector.broadcast %134 : vector<1x16xf32> to vector<8x16xf32>
    %136 = arith.addf %132, %135 : vector<8x16xf32>
    %137 = arith.truncf %122 : vector<8x16xf32> to vector<8x16xbf16>
    %138 = arith.truncf %129 : vector<8x16xf32> to vector<8x16xbf16>
    %cst_92 = arith.constant dense<0.000000e+00> : vector<8x8xf32>
    %139 = tpu.matmul %137, %138, %cst_92 {dimension_numbers = #tpu.dot_dimension_numbers<[1], [1], [0], [0], [0, 0, 1, 0], [], []>} : vector<8x16xbf16>, vector<8x16xbf16>, vector<8x8xf32> -> vector<8x8xf32>
    %c0_93 = arith.constant 0 : index
    %c0_94 = arith.constant 0 : index
    %140 = vector.load %arg4[%c0_93, %c0_94] : memref<8x8xf32, #tpu.memory_space<vmem>>, vector<8x8xf32>
    %141 = arith.addf %139, %140 : vector<8x8xf32>
    %cst_95 = arith.constant dense<0xFF800000> : vector<8xf32>
    %142 = vector.multi_reduction <maximumf>, %141, %cst_95 [1] : vector<8x8xf32> to vector<8xf32>
    %143 = vector.shape_cast %142 : vector<8xf32> to vector<8x1xf32>
    %144 = vector.broadcast %143 : vector<8x1xf32> to vector<8x8xf32>
    %145 = arith.subf %141, %144 : vector<8x8xf32>
    %146 = math.exp %145 : vector<8x8xf32>
    %cst_96 = arith.constant dense<0.000000e+00> : vector<8xf32>
    %147 = vector.multi_reduction <add>, %146, %cst_96 [1] : vector<8x8xf32> to vector<8xf32>
    %148 = vector.shape_cast %147 : vector<8xf32> to vector<8x1xf32>
    %149 = tpu.reciprocal %148 {approx = true} : vector<8x1xf32> -> vector<8x1xf32>
    %150 = vector.broadcast %149 : vector<8x1xf32> to vector<8x8xf32>
    %151 = arith.mulf %146, %150 : vector<8x8xf32>
    %152 = arith.truncf %151 : vector<8x8xf32> to vector<8x8xbf16>
    %153 = arith.truncf %136 : vector<8x16xf32> to vector<8x16xbf16>
    %cst_97 = arith.constant dense<0.000000e+00> : vector<8x16xf32>
    %154 = tpu.matmul %152, %153, %cst_97 {dimension_numbers = #tpu.dot_dimension_numbers<[1], [0], [0], [1], [0, 0, 1, 1], [], []>} : vector<8x8xbf16>, vector<8x16xbf16>, vector<8x16xf32> -> vector<8x16xf32>
    %155 = arith.truncf %154 : vector<8x16xf32> to vector<8x16xbf16>
    %c2_98 = arith.constant 2 : index
    %c0_99 = arith.constant 0 : index
    %c0_100 = arith.constant 0 : index
    %156 = vector.load %arg10[%c2_98, %c0_99, %c0_100] : memref<8x16x64xbf16, #tpu.memory_space<vmem>>, vector<1x16x64xbf16>
    %157 = vector.shape_cast %156 : vector<1x16x64xbf16> to vector<16x64xbf16>
    %cst_101 = arith.constant dense<0.000000e+00> : vector<8x64xf32>
    %158 = tpu.matmul %155, %157, %cst_101 {dimension_numbers = #tpu.dot_dimension_numbers<[1], [0], [0], [1], [0, 0, 1, 1], [], []>} : vector<8x16xbf16>, vector<16x64xbf16>, vector<8x64xf32> -> vector<8x64xf32>
    %159 = arith.addf %115, %158 : vector<8x64xf32>
    %c3 = arith.constant 3 : index
    %c0_102 = arith.constant 0 : index
    %c0_103 = arith.constant 0 : index
    %160 = vector.load %arg6[%c3, %c0_102, %c0_103] : memref<8x64x16xbf16, #tpu.memory_space<vmem>>, vector<1x64x16xbf16>
    %161 = vector.shape_cast %160 : vector<1x64x16xbf16> to vector<64x16xbf16>
    %cst_104 = arith.constant dense<0.000000e+00> : vector<8x16xf32>
    %162 = tpu.matmul %24, %161, %cst_104 {dimension_numbers = #tpu.dot_dimension_numbers<[1], [0], [0], [1], [0, 0, 1, 1], [], []>} : vector<8x64xbf16>, vector<64x16xbf16>, vector<8x16xf32> -> vector<8x16xf32>
    %c3_105 = arith.constant 3 : index
    %c0_106 = arith.constant 0 : index
    %c0_107 = arith.constant 0 : index
    %163 = vector.load %arg9[%c3_105, %c0_106, %c0_107] : memref<24x1x16xf32, #tpu.memory_space<vmem>>, vector<1x1x16xf32>
    %164 = vector.shape_cast %163 : vector<1x1x16xf32> to vector<1x16xf32>
    %165 = vector.broadcast %164 : vector<1x16xf32> to vector<8x16xf32>
    %166 = arith.addf %162, %165 : vector<8x16xf32>
    %c3_108 = arith.constant 3 : index
    %c0_109 = arith.constant 0 : index
    %c0_110 = arith.constant 0 : index
    %167 = vector.load %arg7[%c3_108, %c0_109, %c0_110] : memref<8x64x16xbf16, #tpu.memory_space<vmem>>, vector<1x64x16xbf16>
    %168 = vector.shape_cast %167 : vector<1x64x16xbf16> to vector<64x16xbf16>
    %cst_111 = arith.constant dense<0.000000e+00> : vector<8x16xf32>
    %169 = tpu.matmul %24, %168, %cst_111 {dimension_numbers = #tpu.dot_dimension_numbers<[1], [0], [0], [1], [0, 0, 1, 1], [], []>} : vector<8x64xbf16>, vector<64x16xbf16>, vector<8x16xf32> -> vector<8x16xf32>
    %c7 = arith.constant 7 : index
    %c0_112 = arith.constant 0 : index
    %c0_113 = arith.constant 0 : index
    %170 = vector.load %arg9[%c7, %c0_112, %c0_113] : memref<24x1x16xf32, #tpu.memory_space<vmem>>, vector<1x1x16xf32>
    %171 = vector.shape_cast %170 : vector<1x1x16xf32> to vector<1x16xf32>
    %172 = vector.broadcast %171 : vector<1x16xf32> to vector<8x16xf32>
    %173 = arith.addf %169, %172 : vector<8x16xf32>
    %c3_114 = arith.constant 3 : index
    %c0_115 = arith.constant 0 : index
    %c0_116 = arith.constant 0 : index
    %174 = vector.load %arg8[%c3_114, %c0_115, %c0_116] : memref<8x64x16xbf16, #tpu.memory_space<vmem>>, vector<1x64x16xbf16>
    %175 = vector.shape_cast %174 : vector<1x64x16xbf16> to vector<64x16xbf16>
    %cst_117 = arith.constant dense<0.000000e+00> : vector<8x16xf32>
    %176 = tpu.matmul %24, %175, %cst_117 {dimension_numbers = #tpu.dot_dimension_numbers<[1], [0], [0], [1], [0, 0, 1, 1], [], []>} : vector<8x64xbf16>, vector<64x16xbf16>, vector<8x16xf32> -> vector<8x16xf32>
    %c11 = arith.constant 11 : index
    %c0_118 = arith.constant 0 : index
    %c0_119 = arith.constant 0 : index
    %177 = vector.load %arg9[%c11, %c0_118, %c0_119] : memref<24x1x16xf32, #tpu.memory_space<vmem>>, vector<1x1x16xf32>
    %178 = vector.shape_cast %177 : vector<1x1x16xf32> to vector<1x16xf32>
    %179 = vector.broadcast %178 : vector<1x16xf32> to vector<8x16xf32>
    %180 = arith.addf %176, %179 : vector<8x16xf32>
    %181 = arith.truncf %166 : vector<8x16xf32> to vector<8x16xbf16>
    %182 = arith.truncf %173 : vector<8x16xf32> to vector<8x16xbf16>
    %cst_120 = arith.constant dense<0.000000e+00> : vector<8x8xf32>
    %183 = tpu.matmul %181, %182, %cst_120 {dimension_numbers = #tpu.dot_dimension_numbers<[1], [1], [0], [0], [0, 0, 1, 0], [], []>} : vector<8x16xbf16>, vector<8x16xbf16>, vector<8x8xf32> -> vector<8x8xf32>
    %c0_121 = arith.constant 0 : index
    %c0_122 = arith.constant 0 : index
    %184 = vector.load %arg4[%c0_121, %c0_122] : memref<8x8xf32, #tpu.memory_space<vmem>>, vector<8x8xf32>
    %185 = arith.addf %183, %184 : vector<8x8xf32>
    %cst_123 = arith.constant dense<0xFF800000> : vector<8xf32>
    %186 = vector.multi_reduction <maximumf>, %185, %cst_123 [1] : vector<8x8xf32> to vector<8xf32>
    %187 = vector.shape_cast %186 : vector<8xf32> to vector<8x1xf32>
    %188 = vector.broadcast %187 : vector<8x1xf32> to vector<8x8xf32>
    %189 = arith.subf %185, %188 : vector<8x8xf32>
    %190 = math.exp %189 : vector<8x8xf32>
    %cst_124 = arith.constant dense<0.000000e+00> : vector<8xf32>
    %191 = vector.multi_reduction <add>, %190, %cst_124 [1] : vector<8x8xf32> to vector<8xf32>
    %192 = vector.shape_cast %191 : vector<8xf32> to vector<8x1xf32>
    %193 = tpu.reciprocal %192 {approx = true} : vector<8x1xf32> -> vector<8x1xf32>
    %194 = vector.broadcast %193 : vector<8x1xf32> to vector<8x8xf32>
    %195 = arith.mulf %190, %194 : vector<8x8xf32>
    %196 = arith.truncf %195 : vector<8x8xf32> to vector<8x8xbf16>
    %197 = arith.truncf %180 : vector<8x16xf32> to vector<8x16xbf16>
    %cst_125 = arith.constant dense<0.000000e+00> : vector<8x16xf32>
    %198 = tpu.matmul %196, %197, %cst_125 {dimension_numbers = #tpu.dot_dimension_numbers<[1], [0], [0], [1], [0, 0, 1, 1], [], []>} : vector<8x8xbf16>, vector<8x16xbf16>, vector<8x16xf32> -> vector<8x16xf32>
    %199 = arith.truncf %198 : vector<8x16xf32> to vector<8x16xbf16>
    %c3_126 = arith.constant 3 : index
    %c0_127 = arith.constant 0 : index
    %c0_128 = arith.constant 0 : index
    %200 = vector.load %arg10[%c3_126, %c0_127, %c0_128] : memref<8x16x64xbf16, #tpu.memory_space<vmem>>, vector<1x16x64xbf16>
    %201 = vector.shape_cast %200 : vector<1x16x64xbf16> to vector<16x64xbf16>
    %cst_129 = arith.constant dense<0.000000e+00> : vector<8x64xf32>
    %202 = tpu.matmul %199, %201, %cst_129 {dimension_numbers = #tpu.dot_dimension_numbers<[1], [0], [0], [1], [0, 0, 1, 1], [], []>} : vector<8x16xbf16>, vector<16x64xbf16>, vector<8x64xf32> -> vector<8x64xf32>
    %203 = arith.addf %159, %202 : vector<8x64xf32>
    %204 = arith.addf %7, %203 : vector<8x64xf32>
    %cst_130 = arith.constant dense<0.000000e+00> : vector<8xf32>
    %205 = vector.multi_reduction <add>, %204, %cst_130 [1] : vector<8x64xf32> to vector<8xf32>
    %206 = vector.shape_cast %205 : vector<8xf32> to vector<8x1xf32>
    %cst_131 = arith.constant 6.400000e+01 : f32
    %207 = vector.broadcast %cst_131 : f32 to vector<8x1xf32>
    %208 = arith.divf %206, %207 : vector<8x1xf32>
    %209 = vector.broadcast %208 : vector<8x1xf32> to vector<8x64xf32>
    %210 = arith.subf %204, %209 : vector<8x64xf32>
    %211 = arith.mulf %210, %210 : vector<8x64xf32>
    %cst_132 = arith.constant dense<0.000000e+00> : vector<8xf32>
    %212 = vector.multi_reduction <add>, %211, %cst_132 [1] : vector<8x64xf32> to vector<8xf32>
    %213 = vector.shape_cast %212 : vector<8xf32> to vector<8x1xf32>
    %cst_133 = arith.constant 6.400000e+01 : f32
    %214 = vector.broadcast %cst_133 : f32 to vector<8x1xf32>
    %215 = arith.divf %213, %214 : vector<8x1xf32>
    %cst_134 = arith.constant 9.99999997E-7 : f32
    %216 = vector.broadcast %cst_134 : f32 to vector<8x1xf32>
    %217 = arith.addf %215, %216 : vector<8x1xf32>
    %218 = math.rsqrt %217 : vector<8x1xf32>
    %219 = vector.broadcast %218 : vector<8x1xf32> to vector<8x64xf32>
    %220 = arith.mulf %210, %219 : vector<8x64xf32>
    %221 = arith.truncf %220 : vector<8x64xf32> to vector<8x64xbf16>
    %c0_135 = arith.constant 0 : index
    %c0_136 = arith.constant 0 : index
    %c0_137 = arith.constant 0 : index
    %222 = vector.load %arg12[%c0_135, %c0_136, %c0_137] : memref<2x64x128xbf16, #tpu.memory_space<vmem>>, vector<1x64x128xbf16>
    %223 = vector.shape_cast %222 : vector<1x64x128xbf16> to vector<64x128xbf16>
    %cst_138 = arith.constant dense<0.000000e+00> : vector<8x128xf32>
    %224 = tpu.matmul %221, %223, %cst_138 {dimension_numbers = #tpu.dot_dimension_numbers<[1], [0], [0], [1], [0, 0, 1, 1], [], []>} : vector<8x64xbf16>, vector<64x128xbf16>, vector<8x128xf32> -> vector<8x128xf32>
    %c0_139 = arith.constant 0 : index
    %c0_140 = arith.constant 0 : index
    %c0_141 = arith.constant 0 : index
    %225 = vector.load %arg13[%c0_139, %c0_140, %c0_141] : memref<2x1x128xf32, #tpu.memory_space<vmem>>, vector<1x1x128xf32>
    %226 = vector.shape_cast %225 : vector<1x1x128xf32> to vector<1x128xf32>
    %227 = vector.broadcast %226 : vector<1x128xf32> to vector<8x128xf32>
    %228 = arith.addf %224, %227 : vector<8x128xf32>
    %cst_142 = arith.constant 5.000000e-01 : f32
    %229 = vector.broadcast %cst_142 : f32 to vector<8x128xf32>
    %230 = arith.mulf %229, %228 : vector<8x128xf32>
    %cst_143 = arith.constant 4.471500e-02 : f32
    %231 = vector.broadcast %cst_143 : f32 to vector<8x128xf32>
    %232 = arith.mulf %231, %228 : vector<8x128xf32>
    %233 = arith.mulf %232, %228 : vector<8x128xf32>
    %234 = arith.mulf %233, %228 : vector<8x128xf32>
    %235 = arith.addf %228, %234 : vector<8x128xf32>
    %cst_144 = arith.constant 0.797884583 : f32
    %236 = vector.broadcast %cst_144 : f32 to vector<8x128xf32>
    %237 = arith.mulf %236, %235 : vector<8x128xf32>
    %238 = math.tanh %237 : vector<8x128xf32>
    %cst_145 = arith.constant 1.000000e+00 : f32
    %239 = vector.broadcast %cst_145 : f32 to vector<8x128xf32>
    %240 = arith.addf %239, %238 : vector<8x128xf32>
    %241 = arith.mulf %230, %240 : vector<8x128xf32>
    %242 = arith.truncf %241 : vector<8x128xf32> to vector<8x128xbf16>
    %c0_146 = arith.constant 0 : index
    %c0_147 = arith.constant 0 : index
    %c0_148 = arith.constant 0 : index
    %243 = vector.load %arg14[%c0_146, %c0_147, %c0_148] : memref<2x128x64xbf16, #tpu.memory_space<vmem>>, vector<1x128x64xbf16>
    %244 = vector.shape_cast %243 : vector<1x128x64xbf16> to vector<128x64xbf16>
    %cst_149 = arith.constant dense<0.000000e+00> : vector<8x64xf32>
    %245 = tpu.matmul %242, %244, %cst_149 {dimension_numbers = #tpu.dot_dimension_numbers<[1], [0], [0], [1], [0, 0, 1, 1], [], []>} : vector<8x128xbf16>, vector<128x64xbf16>, vector<8x64xf32> -> vector<8x64xf32>
    %c0_150 = arith.constant 0 : index
    %c0_151 = arith.constant 0 : index
    %c0_152 = arith.constant 0 : index
    %246 = vector.load %arg15[%c0_150, %c0_151, %c0_152] : memref<2x1x64xf32, #tpu.memory_space<vmem>>, vector<1x1x64xf32>
    %247 = vector.shape_cast %246 : vector<1x1x64xf32> to vector<1x64xf32>
    %248 = vector.broadcast %247 : vector<1x64xf32> to vector<8x64xf32>
    %249 = arith.addf %245, %248 : vector<8x64xf32>
    %250 = arith.addf %204, %249 : vector<8x64xf32>
    %cst_153 = arith.constant dense<0.000000e+00> : vector<8xf32>
    %251 = vector.multi_reduction <add>, %250, %cst_153 [1] : vector<8x64xf32> to vector<8xf32>
    %252 = vector.shape_cast %251 : vector<8xf32> to vector<8x1xf32>
    %cst_154 = arith.constant 6.400000e+01 : f32
    %253 = vector.broadcast %cst_154 : f32 to vector<8x1xf32>
    %254 = arith.divf %252, %253 : vector<8x1xf32>
    %255 = vector.broadcast %254 : vector<8x1xf32> to vector<8x64xf32>
    %256 = arith.subf %250, %255 : vector<8x64xf32>
    %257 = arith.mulf %256, %256 : vector<8x64xf32>
    %cst_155 = arith.constant dense<0.000000e+00> : vector<8xf32>
    %258 = vector.multi_reduction <add>, %257, %cst_155 [1] : vector<8x64xf32> to vector<8xf32>
    %259 = vector.shape_cast %258 : vector<8xf32> to vector<8x1xf32>
    %cst_156 = arith.constant 6.400000e+01 : f32
    %260 = vector.broadcast %cst_156 : f32 to vector<8x1xf32>
    %261 = arith.divf %259, %260 : vector<8x1xf32>
    %cst_157 = arith.constant 9.99999997E-7 : f32
    %262 = vector.broadcast %cst_157 : f32 to vector<8x1xf32>
    %263 = arith.addf %261, %262 : vector<8x1xf32>
    %264 = math.rsqrt %263 : vector<8x1xf32>
    %265 = vector.broadcast %264 : vector<8x1xf32> to vector<8x64xf32>
    %266 = arith.mulf %256, %265 : vector<8x64xf32>
    %267 = arith.truncf %266 : vector<8x64xf32> to vector<8x64xbf16>
    %c1_158 = arith.constant 1 : index
    %c0_159 = arith.constant 0 : index
    %c0_160 = arith.constant 0 : index
    %268 = vector.load %arg11[%c1_158, %c0_159, %c0_160] : memref<2x1x64xf32, #tpu.memory_space<vmem>>, vector<1x1x64xf32>
    %269 = vector.shape_cast %268 : vector<1x1x64xf32> to vector<1x64xf32>
    %c4_161 = arith.constant 4 : index
    %c0_162 = arith.constant 0 : index
    %c0_163 = arith.constant 0 : index
    %270 = vector.load %arg6[%c4_161, %c0_162, %c0_163] : memref<8x64x16xbf16, #tpu.memory_space<vmem>>, vector<1x64x16xbf16>
    %271 = vector.shape_cast %270 : vector<1x64x16xbf16> to vector<64x16xbf16>
    %cst_164 = arith.constant dense<0.000000e+00> : vector<8x16xf32>
    %272 = tpu.matmul %267, %271, %cst_164 {dimension_numbers = #tpu.dot_dimension_numbers<[1], [0], [0], [1], [0, 0, 1, 1], [], []>} : vector<8x64xbf16>, vector<64x16xbf16>, vector<8x16xf32> -> vector<8x16xf32>
    %c12 = arith.constant 12 : index
    %c0_165 = arith.constant 0 : index
    %c0_166 = arith.constant 0 : index
    %273 = vector.load %arg9[%c12, %c0_165, %c0_166] : memref<24x1x16xf32, #tpu.memory_space<vmem>>, vector<1x1x16xf32>
    %274 = vector.shape_cast %273 : vector<1x1x16xf32> to vector<1x16xf32>
    %275 = vector.broadcast %274 : vector<1x16xf32> to vector<8x16xf32>
    %276 = arith.addf %272, %275 : vector<8x16xf32>
    %c4_167 = arith.constant 4 : index
    %c0_168 = arith.constant 0 : index
    %c0_169 = arith.constant 0 : index
    %277 = vector.load %arg7[%c4_167, %c0_168, %c0_169] : memref<8x64x16xbf16, #tpu.memory_space<vmem>>, vector<1x64x16xbf16>
    %278 = vector.shape_cast %277 : vector<1x64x16xbf16> to vector<64x16xbf16>
    %cst_170 = arith.constant dense<0.000000e+00> : vector<8x16xf32>
    %279 = tpu.matmul %267, %278, %cst_170 {dimension_numbers = #tpu.dot_dimension_numbers<[1], [0], [0], [1], [0, 0, 1, 1], [], []>} : vector<8x64xbf16>, vector<64x16xbf16>, vector<8x16xf32> -> vector<8x16xf32>
    %c16 = arith.constant 16 : index
    %c0_171 = arith.constant 0 : index
    %c0_172 = arith.constant 0 : index
    %280 = vector.load %arg9[%c16, %c0_171, %c0_172] : memref<24x1x16xf32, #tpu.memory_space<vmem>>, vector<1x1x16xf32>
    %281 = vector.shape_cast %280 : vector<1x1x16xf32> to vector<1x16xf32>
    %282 = vector.broadcast %281 : vector<1x16xf32> to vector<8x16xf32>
    %283 = arith.addf %279, %282 : vector<8x16xf32>
    %c4_173 = arith.constant 4 : index
    %c0_174 = arith.constant 0 : index
    %c0_175 = arith.constant 0 : index
    %284 = vector.load %arg8[%c4_173, %c0_174, %c0_175] : memref<8x64x16xbf16, #tpu.memory_space<vmem>>, vector<1x64x16xbf16>
    %285 = vector.shape_cast %284 : vector<1x64x16xbf16> to vector<64x16xbf16>
    %cst_176 = arith.constant dense<0.000000e+00> : vector<8x16xf32>
    %286 = tpu.matmul %267, %285, %cst_176 {dimension_numbers = #tpu.dot_dimension_numbers<[1], [0], [0], [1], [0, 0, 1, 1], [], []>} : vector<8x64xbf16>, vector<64x16xbf16>, vector<8x16xf32> -> vector<8x16xf32>
    %c20 = arith.constant 20 : index
    %c0_177 = arith.constant 0 : index
    %c0_178 = arith.constant 0 : index
    %287 = vector.load %arg9[%c20, %c0_177, %c0_178] : memref<24x1x16xf32, #tpu.memory_space<vmem>>, vector<1x1x16xf32>
    %288 = vector.shape_cast %287 : vector<1x1x16xf32> to vector<1x16xf32>
    %289 = vector.broadcast %288 : vector<1x16xf32> to vector<8x16xf32>
    %290 = arith.addf %286, %289 : vector<8x16xf32>
    %291 = arith.truncf %276 : vector<8x16xf32> to vector<8x16xbf16>
    %292 = arith.truncf %283 : vector<8x16xf32> to vector<8x16xbf16>
    %cst_179 = arith.constant dense<0.000000e+00> : vector<8x8xf32>
    %293 = tpu.matmul %291, %292, %cst_179 {dimension_numbers = #tpu.dot_dimension_numbers<[1], [1], [0], [0], [0, 0, 1, 0], [], []>} : vector<8x16xbf16>, vector<8x16xbf16>, vector<8x8xf32> -> vector<8x8xf32>
    %c0_180 = arith.constant 0 : index
    %c0_181 = arith.constant 0 : index
    %294 = vector.load %arg4[%c0_180, %c0_181] : memref<8x8xf32, #tpu.memory_space<vmem>>, vector<8x8xf32>
    %295 = arith.addf %293, %294 : vector<8x8xf32>
    %cst_182 = arith.constant dense<0xFF800000> : vector<8xf32>
    %296 = vector.multi_reduction <maximumf>, %295, %cst_182 [1] : vector<8x8xf32> to vector<8xf32>
    %297 = vector.shape_cast %296 : vector<8xf32> to vector<8x1xf32>
    %298 = vector.broadcast %297 : vector<8x1xf32> to vector<8x8xf32>
    %299 = arith.subf %295, %298 : vector<8x8xf32>
    %300 = math.exp %299 : vector<8x8xf32>
    %cst_183 = arith.constant dense<0.000000e+00> : vector<8xf32>
    %301 = vector.multi_reduction <add>, %300, %cst_183 [1] : vector<8x8xf32> to vector<8xf32>
    %302 = vector.shape_cast %301 : vector<8xf32> to vector<8x1xf32>
    %303 = tpu.reciprocal %302 {approx = true} : vector<8x1xf32> -> vector<8x1xf32>
    %304 = vector.broadcast %303 : vector<8x1xf32> to vector<8x8xf32>
    %305 = arith.mulf %300, %304 : vector<8x8xf32>
    %306 = arith.truncf %305 : vector<8x8xf32> to vector<8x8xbf16>
    %307 = arith.truncf %290 : vector<8x16xf32> to vector<8x16xbf16>
    %cst_184 = arith.constant dense<0.000000e+00> : vector<8x16xf32>
    %308 = tpu.matmul %306, %307, %cst_184 {dimension_numbers = #tpu.dot_dimension_numbers<[1], [0], [0], [1], [0, 0, 1, 1], [], []>} : vector<8x8xbf16>, vector<8x16xbf16>, vector<8x16xf32> -> vector<8x16xf32>
    %309 = arith.truncf %308 : vector<8x16xf32> to vector<8x16xbf16>
    %c4_185 = arith.constant 4 : index
    %c0_186 = arith.constant 0 : index
    %c0_187 = arith.constant 0 : index
    %310 = vector.load %arg10[%c4_185, %c0_186, %c0_187] : memref<8x16x64xbf16, #tpu.memory_space<vmem>>, vector<1x16x64xbf16>
    %311 = vector.shape_cast %310 : vector<1x16x64xbf16> to vector<16x64xbf16>
    %cst_188 = arith.constant dense<0.000000e+00> : vector<8x64xf32>
    %312 = tpu.matmul %309, %311, %cst_188 {dimension_numbers = #tpu.dot_dimension_numbers<[1], [0], [0], [1], [0, 0, 1, 1], [], []>} : vector<8x16xbf16>, vector<16x64xbf16>, vector<8x64xf32> -> vector<8x64xf32>
    %313 = vector.broadcast %269 : vector<1x64xf32> to vector<8x64xf32>
    %314 = arith.addf %313, %312 : vector<8x64xf32>
    %c5_189 = arith.constant 5 : index
    %c0_190 = arith.constant 0 : index
    %c0_191 = arith.constant 0 : index
    %315 = vector.load %arg6[%c5_189, %c0_190, %c0_191] : memref<8x64x16xbf16, #tpu.memory_space<vmem>>, vector<1x64x16xbf16>
    %316 = vector.shape_cast %315 : vector<1x64x16xbf16> to vector<64x16xbf16>
    %cst_192 = arith.constant dense<0.000000e+00> : vector<8x16xf32>
    %317 = tpu.matmul %267, %316, %cst_192 {dimension_numbers = #tpu.dot_dimension_numbers<[1], [0], [0], [1], [0, 0, 1, 1], [], []>} : vector<8x64xbf16>, vector<64x16xbf16>, vector<8x16xf32> -> vector<8x16xf32>
    %c13 = arith.constant 13 : index
    %c0_193 = arith.constant 0 : index
    %c0_194 = arith.constant 0 : index
    %318 = vector.load %arg9[%c13, %c0_193, %c0_194] : memref<24x1x16xf32, #tpu.memory_space<vmem>>, vector<1x1x16xf32>
    %319 = vector.shape_cast %318 : vector<1x1x16xf32> to vector<1x16xf32>
    %320 = vector.broadcast %319 : vector<1x16xf32> to vector<8x16xf32>
    %321 = arith.addf %317, %320 : vector<8x16xf32>
    %c5_195 = arith.constant 5 : index
    %c0_196 = arith.constant 0 : index
    %c0_197 = arith.constant 0 : index
    %322 = vector.load %arg7[%c5_195, %c0_196, %c0_197] : memref<8x64x16xbf16, #tpu.memory_space<vmem>>, vector<1x64x16xbf16>
    %323 = vector.shape_cast %322 : vector<1x64x16xbf16> to vector<64x16xbf16>
    %cst_198 = arith.constant dense<0.000000e+00> : vector<8x16xf32>
    %324 = tpu.matmul %267, %323, %cst_198 {dimension_numbers = #tpu.dot_dimension_numbers<[1], [0], [0], [1], [0, 0, 1, 1], [], []>} : vector<8x64xbf16>, vector<64x16xbf16>, vector<8x16xf32> -> vector<8x16xf32>
    %c17 = arith.constant 17 : index
    %c0_199 = arith.constant 0 : index
    %c0_200 = arith.constant 0 : index
    %325 = vector.load %arg9[%c17, %c0_199, %c0_200] : memref<24x1x16xf32, #tpu.memory_space<vmem>>, vector<1x1x16xf32>
    %326 = vector.shape_cast %325 : vector<1x1x16xf32> to vector<1x16xf32>
    %327 = vector.broadcast %326 : vector<1x16xf32> to vector<8x16xf32>
    %328 = arith.addf %324, %327 : vector<8x16xf32>
    %c5_201 = arith.constant 5 : index
    %c0_202 = arith.constant 0 : index
    %c0_203 = arith.constant 0 : index
    %329 = vector.load %arg8[%c5_201, %c0_202, %c0_203] : memref<8x64x16xbf16, #tpu.memory_space<vmem>>, vector<1x64x16xbf16>
    %330 = vector.shape_cast %329 : vector<1x64x16xbf16> to vector<64x16xbf16>
    %cst_204 = arith.constant dense<0.000000e+00> : vector<8x16xf32>
    %331 = tpu.matmul %267, %330, %cst_204 {dimension_numbers = #tpu.dot_dimension_numbers<[1], [0], [0], [1], [0, 0, 1, 1], [], []>} : vector<8x64xbf16>, vector<64x16xbf16>, vector<8x16xf32> -> vector<8x16xf32>
    %c21 = arith.constant 21 : index
    %c0_205 = arith.constant 0 : index
    %c0_206 = arith.constant 0 : index
    %332 = vector.load %arg9[%c21, %c0_205, %c0_206] : memref<24x1x16xf32, #tpu.memory_space<vmem>>, vector<1x1x16xf32>
    %333 = vector.shape_cast %332 : vector<1x1x16xf32> to vector<1x16xf32>
    %334 = vector.broadcast %333 : vector<1x16xf32> to vector<8x16xf32>
    %335 = arith.addf %331, %334 : vector<8x16xf32>
    %336 = arith.truncf %321 : vector<8x16xf32> to vector<8x16xbf16>
    %337 = arith.truncf %328 : vector<8x16xf32> to vector<8x16xbf16>
    %cst_207 = arith.constant dense<0.000000e+00> : vector<8x8xf32>
    %338 = tpu.matmul %336, %337, %cst_207 {dimension_numbers = #tpu.dot_dimension_numbers<[1], [1], [0], [0], [0, 0, 1, 0], [], []>} : vector<8x16xbf16>, vector<8x16xbf16>, vector<8x8xf32> -> vector<8x8xf32>
    %c0_208 = arith.constant 0 : index
    %c0_209 = arith.constant 0 : index
    %339 = vector.load %arg4[%c0_208, %c0_209] : memref<8x8xf32, #tpu.memory_space<vmem>>, vector<8x8xf32>
    %340 = arith.addf %338, %339 : vector<8x8xf32>
    %cst_210 = arith.constant dense<0xFF800000> : vector<8xf32>
    %341 = vector.multi_reduction <maximumf>, %340, %cst_210 [1] : vector<8x8xf32> to vector<8xf32>
    %342 = vector.shape_cast %341 : vector<8xf32> to vector<8x1xf32>
    %343 = vector.broadcast %342 : vector<8x1xf32> to vector<8x8xf32>
    %344 = arith.subf %340, %343 : vector<8x8xf32>
    %345 = math.exp %344 : vector<8x8xf32>
    %cst_211 = arith.constant dense<0.000000e+00> : vector<8xf32>
    %346 = vector.multi_reduction <add>, %345, %cst_211 [1] : vector<8x8xf32> to vector<8xf32>
    %347 = vector.shape_cast %346 : vector<8xf32> to vector<8x1xf32>
    %348 = tpu.reciprocal %347 {approx = true} : vector<8x1xf32> -> vector<8x1xf32>
    %349 = vector.broadcast %348 : vector<8x1xf32> to vector<8x8xf32>
    %350 = arith.mulf %345, %349 : vector<8x8xf32>
    %351 = arith.truncf %350 : vector<8x8xf32> to vector<8x8xbf16>
    %352 = arith.truncf %335 : vector<8x16xf32> to vector<8x16xbf16>
    %cst_212 = arith.constant dense<0.000000e+00> : vector<8x16xf32>
    %353 = tpu.matmul %351, %352, %cst_212 {dimension_numbers = #tpu.dot_dimension_numbers<[1], [0], [0], [1], [0, 0, 1, 1], [], []>} : vector<8x8xbf16>, vector<8x16xbf16>, vector<8x16xf32> -> vector<8x16xf32>
    %354 = arith.truncf %353 : vector<8x16xf32> to vector<8x16xbf16>
    %c5_213 = arith.constant 5 : index
    %c0_214 = arith.constant 0 : index
    %c0_215 = arith.constant 0 : index
    %355 = vector.load %arg10[%c5_213, %c0_214, %c0_215] : memref<8x16x64xbf16, #tpu.memory_space<vmem>>, vector<1x16x64xbf16>
    %356 = vector.shape_cast %355 : vector<1x16x64xbf16> to vector<16x64xbf16>
    %cst_216 = arith.constant dense<0.000000e+00> : vector<8x64xf32>
    %357 = tpu.matmul %354, %356, %cst_216 {dimension_numbers = #tpu.dot_dimension_numbers<[1], [0], [0], [1], [0, 0, 1, 1], [], []>} : vector<8x16xbf16>, vector<16x64xbf16>, vector<8x64xf32> -> vector<8x64xf32>
    %358 = arith.addf %314, %357 : vector<8x64xf32>
    %c6_217 = arith.constant 6 : index
    %c0_218 = arith.constant 0 : index
    %c0_219 = arith.constant 0 : index
    %359 = vector.load %arg6[%c6_217, %c0_218, %c0_219] : memref<8x64x16xbf16, #tpu.memory_space<vmem>>, vector<1x64x16xbf16>
    %360 = vector.shape_cast %359 : vector<1x64x16xbf16> to vector<64x16xbf16>
    %cst_220 = arith.constant dense<0.000000e+00> : vector<8x16xf32>
    %361 = tpu.matmul %267, %360, %cst_220 {dimension_numbers = #tpu.dot_dimension_numbers<[1], [0], [0], [1], [0, 0, 1, 1], [], []>} : vector<8x64xbf16>, vector<64x16xbf16>, vector<8x16xf32> -> vector<8x16xf32>
    %c14 = arith.constant 14 : index
    %c0_221 = arith.constant 0 : index
    %c0_222 = arith.constant 0 : index
    %362 = vector.load %arg9[%c14, %c0_221, %c0_222] : memref<24x1x16xf32, #tpu.memory_space<vmem>>, vector<1x1x16xf32>
    %363 = vector.shape_cast %362 : vector<1x1x16xf32> to vector<1x16xf32>
    %364 = vector.broadcast %363 : vector<1x16xf32> to vector<8x16xf32>
    %365 = arith.addf %361, %364 : vector<8x16xf32>
    %c6_223 = arith.constant 6 : index
    %c0_224 = arith.constant 0 : index
    %c0_225 = arith.constant 0 : index
    %366 = vector.load %arg7[%c6_223, %c0_224, %c0_225] : memref<8x64x16xbf16, #tpu.memory_space<vmem>>, vector<1x64x16xbf16>
    %367 = vector.shape_cast %366 : vector<1x64x16xbf16> to vector<64x16xbf16>
    %cst_226 = arith.constant dense<0.000000e+00> : vector<8x16xf32>
    %368 = tpu.matmul %267, %367, %cst_226 {dimension_numbers = #tpu.dot_dimension_numbers<[1], [0], [0], [1], [0, 0, 1, 1], [], []>} : vector<8x64xbf16>, vector<64x16xbf16>, vector<8x16xf32> -> vector<8x16xf32>
    %c18 = arith.constant 18 : index
    %c0_227 = arith.constant 0 : index
    %c0_228 = arith.constant 0 : index
    %369 = vector.load %arg9[%c18, %c0_227, %c0_228] : memref<24x1x16xf32, #tpu.memory_space<vmem>>, vector<1x1x16xf32>
    %370 = vector.shape_cast %369 : vector<1x1x16xf32> to vector<1x16xf32>
    %371 = vector.broadcast %370 : vector<1x16xf32> to vector<8x16xf32>
    %372 = arith.addf %368, %371 : vector<8x16xf32>
    %c6_229 = arith.constant 6 : index
    %c0_230 = arith.constant 0 : index
    %c0_231 = arith.constant 0 : index
    %373 = vector.load %arg8[%c6_229, %c0_230, %c0_231] : memref<8x64x16xbf16, #tpu.memory_space<vmem>>, vector<1x64x16xbf16>
    %374 = vector.shape_cast %373 : vector<1x64x16xbf16> to vector<64x16xbf16>
    %cst_232 = arith.constant dense<0.000000e+00> : vector<8x16xf32>
    %375 = tpu.matmul %267, %374, %cst_232 {dimension_numbers = #tpu.dot_dimension_numbers<[1], [0], [0], [1], [0, 0, 1, 1], [], []>} : vector<8x64xbf16>, vector<64x16xbf16>, vector<8x16xf32> -> vector<8x16xf32>
    %c22 = arith.constant 22 : index
    %c0_233 = arith.constant 0 : index
    %c0_234 = arith.constant 0 : index
    %376 = vector.load %arg9[%c22, %c0_233, %c0_234] : memref<24x1x16xf32, #tpu.memory_space<vmem>>, vector<1x1x16xf32>
    %377 = vector.shape_cast %376 : vector<1x1x16xf32> to vector<1x16xf32>
    %378 = vector.broadcast %377 : vector<1x16xf32> to vector<8x16xf32>
    %379 = arith.addf %375, %378 : vector<8x16xf32>
    %380 = arith.truncf %365 : vector<8x16xf32> to vector<8x16xbf16>
    %381 = arith.truncf %372 : vector<8x16xf32> to vector<8x16xbf16>
    %cst_235 = arith.constant dense<0.000000e+00> : vector<8x8xf32>
    %382 = tpu.matmul %380, %381, %cst_235 {dimension_numbers = #tpu.dot_dimension_numbers<[1], [1], [0], [0], [0, 0, 1, 0], [], []>} : vector<8x16xbf16>, vector<8x16xbf16>, vector<8x8xf32> -> vector<8x8xf32>
    %c0_236 = arith.constant 0 : index
    %c0_237 = arith.constant 0 : index
    %383 = vector.load %arg4[%c0_236, %c0_237] : memref<8x8xf32, #tpu.memory_space<vmem>>, vector<8x8xf32>
    %384 = arith.addf %382, %383 : vector<8x8xf32>
    %cst_238 = arith.constant dense<0xFF800000> : vector<8xf32>
    %385 = vector.multi_reduction <maximumf>, %384, %cst_238 [1] : vector<8x8xf32> to vector<8xf32>
    %386 = vector.shape_cast %385 : vector<8xf32> to vector<8x1xf32>
    %387 = vector.broadcast %386 : vector<8x1xf32> to vector<8x8xf32>
    %388 = arith.subf %384, %387 : vector<8x8xf32>
    %389 = math.exp %388 : vector<8x8xf32>
    %cst_239 = arith.constant dense<0.000000e+00> : vector<8xf32>
    %390 = vector.multi_reduction <add>, %389, %cst_239 [1] : vector<8x8xf32> to vector<8xf32>
    %391 = vector.shape_cast %390 : vector<8xf32> to vector<8x1xf32>
    %392 = tpu.reciprocal %391 {approx = true} : vector<8x1xf32> -> vector<8x1xf32>
    %393 = vector.broadcast %392 : vector<8x1xf32> to vector<8x8xf32>
    %394 = arith.mulf %389, %393 : vector<8x8xf32>
    %395 = arith.truncf %394 : vector<8x8xf32> to vector<8x8xbf16>
    %396 = arith.truncf %379 : vector<8x16xf32> to vector<8x16xbf16>
    %cst_240 = arith.constant dense<0.000000e+00> : vector<8x16xf32>
    %397 = tpu.matmul %395, %396, %cst_240 {dimension_numbers = #tpu.dot_dimension_numbers<[1], [0], [0], [1], [0, 0, 1, 1], [], []>} : vector<8x8xbf16>, vector<8x16xbf16>, vector<8x16xf32> -> vector<8x16xf32>
    %398 = arith.truncf %397 : vector<8x16xf32> to vector<8x16xbf16>
    %c6_241 = arith.constant 6 : index
    %c0_242 = arith.constant 0 : index
    %c0_243 = arith.constant 0 : index
    %399 = vector.load %arg10[%c6_241, %c0_242, %c0_243] : memref<8x16x64xbf16, #tpu.memory_space<vmem>>, vector<1x16x64xbf16>
    %400 = vector.shape_cast %399 : vector<1x16x64xbf16> to vector<16x64xbf16>
    %cst_244 = arith.constant dense<0.000000e+00> : vector<8x64xf32>
    %401 = tpu.matmul %398, %400, %cst_244 {dimension_numbers = #tpu.dot_dimension_numbers<[1], [0], [0], [1], [0, 0, 1, 1], [], []>} : vector<8x16xbf16>, vector<16x64xbf16>, vector<8x64xf32> -> vector<8x64xf32>
    %402 = arith.addf %358, %401 : vector<8x64xf32>
    %c7_245 = arith.constant 7 : index
    %c0_246 = arith.constant 0 : index
    %c0_247 = arith.constant 0 : index
    %403 = vector.load %arg6[%c7_245, %c0_246, %c0_247] : memref<8x64x16xbf16, #tpu.memory_space<vmem>>, vector<1x64x16xbf16>
    %404 = vector.shape_cast %403 : vector<1x64x16xbf16> to vector<64x16xbf16>
    %cst_248 = arith.constant dense<0.000000e+00> : vector<8x16xf32>
    %405 = tpu.matmul %267, %404, %cst_248 {dimension_numbers = #tpu.dot_dimension_numbers<[1], [0], [0], [1], [0, 0, 1, 1], [], []>} : vector<8x64xbf16>, vector<64x16xbf16>, vector<8x16xf32> -> vector<8x16xf32>
    %c15 = arith.constant 15 : index
    %c0_249 = arith.constant 0 : index
    %c0_250 = arith.constant 0 : index
    %406 = vector.load %arg9[%c15, %c0_249, %c0_250] : memref<24x1x16xf32, #tpu.memory_space<vmem>>, vector<1x1x16xf32>
    %407 = vector.shape_cast %406 : vector<1x1x16xf32> to vector<1x16xf32>
    %408 = vector.broadcast %407 : vector<1x16xf32> to vector<8x16xf32>
    %409 = arith.addf %405, %408 : vector<8x16xf32>
    %c7_251 = arith.constant 7 : index
    %c0_252 = arith.constant 0 : index
    %c0_253 = arith.constant 0 : index
    %410 = vector.load %arg7[%c7_251, %c0_252, %c0_253] : memref<8x64x16xbf16, #tpu.memory_space<vmem>>, vector<1x64x16xbf16>
    %411 = vector.shape_cast %410 : vector<1x64x16xbf16> to vector<64x16xbf16>
    %cst_254 = arith.constant dense<0.000000e+00> : vector<8x16xf32>
    %412 = tpu.matmul %267, %411, %cst_254 {dimension_numbers = #tpu.dot_dimension_numbers<[1], [0], [0], [1], [0, 0, 1, 1], [], []>} : vector<8x64xbf16>, vector<64x16xbf16>, vector<8x16xf32> -> vector<8x16xf32>
    %c19 = arith.constant 19 : index
    %c0_255 = arith.constant 0 : index
    %c0_256 = arith.constant 0 : index
    %413 = vector.load %arg9[%c19, %c0_255, %c0_256] : memref<24x1x16xf32, #tpu.memory_space<vmem>>, vector<1x1x16xf32>
    %414 = vector.shape_cast %413 : vector<1x1x16xf32> to vector<1x16xf32>
    %415 = vector.broadcast %414 : vector<1x16xf32> to vector<8x16xf32>
    %416 = arith.addf %412, %415 : vector<8x16xf32>
    %c7_257 = arith.constant 7 : index
    %c0_258 = arith.constant 0 : index
    %c0_259 = arith.constant 0 : index
    %417 = vector.load %arg8[%c7_257, %c0_258, %c0_259] : memref<8x64x16xbf16, #tpu.memory_space<vmem>>, vector<1x64x16xbf16>
    %418 = vector.shape_cast %417 : vector<1x64x16xbf16> to vector<64x16xbf16>
    %cst_260 = arith.constant dense<0.000000e+00> : vector<8x16xf32>
    %419 = tpu.matmul %267, %418, %cst_260 {dimension_numbers = #tpu.dot_dimension_numbers<[1], [0], [0], [1], [0, 0, 1, 1], [], []>} : vector<8x64xbf16>, vector<64x16xbf16>, vector<8x16xf32> -> vector<8x16xf32>
    %c23 = arith.constant 23 : index
    %c0_261 = arith.constant 0 : index
    %c0_262 = arith.constant 0 : index
    %420 = vector.load %arg9[%c23, %c0_261, %c0_262] : memref<24x1x16xf32, #tpu.memory_space<vmem>>, vector<1x1x16xf32>
    %421 = vector.shape_cast %420 : vector<1x1x16xf32> to vector<1x16xf32>
    %422 = vector.broadcast %421 : vector<1x16xf32> to vector<8x16xf32>
    %423 = arith.addf %419, %422 : vector<8x16xf32>
    %424 = arith.truncf %409 : vector<8x16xf32> to vector<8x16xbf16>
    %425 = arith.truncf %416 : vector<8x16xf32> to vector<8x16xbf16>
    %cst_263 = arith.constant dense<0.000000e+00> : vector<8x8xf32>
    %426 = tpu.matmul %424, %425, %cst_263 {dimension_numbers = #tpu.dot_dimension_numbers<[1], [1], [0], [0], [0, 0, 1, 0], [], []>} : vector<8x16xbf16>, vector<8x16xbf16>, vector<8x8xf32> -> vector<8x8xf32>
    %c0_264 = arith.constant 0 : index
    %c0_265 = arith.constant 0 : index
    %427 = vector.load %arg4[%c0_264, %c0_265] : memref<8x8xf32, #tpu.memory_space<vmem>>, vector<8x8xf32>
    %428 = arith.addf %426, %427 : vector<8x8xf32>
    %cst_266 = arith.constant dense<0xFF800000> : vector<8xf32>
    %429 = vector.multi_reduction <maximumf>, %428, %cst_266 [1] : vector<8x8xf32> to vector<8xf32>
    %430 = vector.shape_cast %429 : vector<8xf32> to vector<8x1xf32>
    %431 = vector.broadcast %430 : vector<8x1xf32> to vector<8x8xf32>
    %432 = arith.subf %428, %431 : vector<8x8xf32>
    %433 = math.exp %432 : vector<8x8xf32>
    %cst_267 = arith.constant dense<0.000000e+00> : vector<8xf32>
    %434 = vector.multi_reduction <add>, %433, %cst_267 [1] : vector<8x8xf32> to vector<8xf32>
    %435 = vector.shape_cast %434 : vector<8xf32> to vector<8x1xf32>
    %436 = tpu.reciprocal %435 {approx = true} : vector<8x1xf32> -> vector<8x1xf32>
    %437 = vector.broadcast %436 : vector<8x1xf32> to vector<8x8xf32>
    %438 = arith.mulf %433, %437 : vector<8x8xf32>
    %439 = arith.truncf %438 : vector<8x8xf32> to vector<8x8xbf16>
    %440 = arith.truncf %423 : vector<8x16xf32> to vector<8x16xbf16>
    %cst_268 = arith.constant dense<0.000000e+00> : vector<8x16xf32>
    %441 = tpu.matmul %439, %440, %cst_268 {dimension_numbers = #tpu.dot_dimension_numbers<[1], [0], [0], [1], [0, 0, 1, 1], [], []>} : vector<8x8xbf16>, vector<8x16xbf16>, vector<8x16xf32> -> vector<8x16xf32>
    %442 = arith.truncf %441 : vector<8x16xf32> to vector<8x16xbf16>
    %c7_269 = arith.constant 7 : index
    %c0_270 = arith.constant 0 : index
    %c0_271 = arith.constant 0 : index
    %443 = vector.load %arg10[%c7_269, %c0_270, %c0_271] : memref<8x16x64xbf16, #tpu.memory_space<vmem>>, vector<1x16x64xbf16>
    %444 = vector.shape_cast %443 : vector<1x16x64xbf16> to vector<16x64xbf16>
    %cst_272 = arith.constant dense<0.000000e+00> : vector<8x64xf32>
    %445 = tpu.matmul %442, %444, %cst_272 {dimension_numbers = #tpu.dot_dimension_numbers<[1], [0], [0], [1], [0, 0, 1, 1], [], []>} : vector<8x16xbf16>, vector<16x64xbf16>, vector<8x64xf32> -> vector<8x64xf32>
    %446 = arith.addf %402, %445 : vector<8x64xf32>
    %447 = arith.addf %250, %446 : vector<8x64xf32>
    %cst_273 = arith.constant dense<0.000000e+00> : vector<8xf32>
    %448 = vector.multi_reduction <add>, %447, %cst_273 [1] : vector<8x64xf32> to vector<8xf32>
    %449 = vector.shape_cast %448 : vector<8xf32> to vector<8x1xf32>
    %cst_274 = arith.constant 6.400000e+01 : f32
    %450 = vector.broadcast %cst_274 : f32 to vector<8x1xf32>
    %451 = arith.divf %449, %450 : vector<8x1xf32>
    %452 = vector.broadcast %451 : vector<8x1xf32> to vector<8x64xf32>
    %453 = arith.subf %447, %452 : vector<8x64xf32>
    %454 = arith.mulf %453, %453 : vector<8x64xf32>
    %cst_275 = arith.constant dense<0.000000e+00> : vector<8xf32>
    %455 = vector.multi_reduction <add>, %454, %cst_275 [1] : vector<8x64xf32> to vector<8xf32>
    %456 = vector.shape_cast %455 : vector<8xf32> to vector<8x1xf32>
    %cst_276 = arith.constant 6.400000e+01 : f32
    %457 = vector.broadcast %cst_276 : f32 to vector<8x1xf32>
    %458 = arith.divf %456, %457 : vector<8x1xf32>
    %cst_277 = arith.constant 9.99999997E-7 : f32
    %459 = vector.broadcast %cst_277 : f32 to vector<8x1xf32>
    %460 = arith.addf %458, %459 : vector<8x1xf32>
    %461 = math.rsqrt %460 : vector<8x1xf32>
    %462 = vector.broadcast %461 : vector<8x1xf32> to vector<8x64xf32>
    %463 = arith.mulf %453, %462 : vector<8x64xf32>
    %464 = arith.truncf %463 : vector<8x64xf32> to vector<8x64xbf16>
    %c1_278 = arith.constant 1 : index
    %c0_279 = arith.constant 0 : index
    %c0_280 = arith.constant 0 : index
    %465 = vector.load %arg12[%c1_278, %c0_279, %c0_280] : memref<2x64x128xbf16, #tpu.memory_space<vmem>>, vector<1x64x128xbf16>
    %466 = vector.shape_cast %465 : vector<1x64x128xbf16> to vector<64x128xbf16>
    %cst_281 = arith.constant dense<0.000000e+00> : vector<8x128xf32>
    %467 = tpu.matmul %464, %466, %cst_281 {dimension_numbers = #tpu.dot_dimension_numbers<[1], [0], [0], [1], [0, 0, 1, 1], [], []>} : vector<8x64xbf16>, vector<64x128xbf16>, vector<8x128xf32> -> vector<8x128xf32>
    %c1_282 = arith.constant 1 : index
    %c0_283 = arith.constant 0 : index
    %c0_284 = arith.constant 0 : index
    %468 = vector.load %arg13[%c1_282, %c0_283, %c0_284] : memref<2x1x128xf32, #tpu.memory_space<vmem>>, vector<1x1x128xf32>
    %469 = vector.shape_cast %468 : vector<1x1x128xf32> to vector<1x128xf32>
    %470 = vector.broadcast %469 : vector<1x128xf32> to vector<8x128xf32>
    %471 = arith.addf %467, %470 : vector<8x128xf32>
    %cst_285 = arith.constant 5.000000e-01 : f32
    %472 = vector.broadcast %cst_285 : f32 to vector<8x128xf32>
    %473 = arith.mulf %472, %471 : vector<8x128xf32>
    %cst_286 = arith.constant 4.471500e-02 : f32
    %474 = vector.broadcast %cst_286 : f32 to vector<8x128xf32>
    %475 = arith.mulf %474, %471 : vector<8x128xf32>
    %476 = arith.mulf %475, %471 : vector<8x128xf32>
    %477 = arith.mulf %476, %471 : vector<8x128xf32>
    %478 = arith.addf %471, %477 : vector<8x128xf32>
    %cst_287 = arith.constant 0.797884583 : f32
    %479 = vector.broadcast %cst_287 : f32 to vector<8x128xf32>
    %480 = arith.mulf %479, %478 : vector<8x128xf32>
    %481 = math.tanh %480 : vector<8x128xf32>
    %cst_288 = arith.constant 1.000000e+00 : f32
    %482 = vector.broadcast %cst_288 : f32 to vector<8x128xf32>
    %483 = arith.addf %482, %481 : vector<8x128xf32>
    %484 = arith.mulf %473, %483 : vector<8x128xf32>
    %485 = arith.truncf %484 : vector<8x128xf32> to vector<8x128xbf16>
    %c1_289 = arith.constant 1 : index
    %c0_290 = arith.constant 0 : index
    %c0_291 = arith.constant 0 : index
    %486 = vector.load %arg14[%c1_289, %c0_290, %c0_291] : memref<2x128x64xbf16, #tpu.memory_space<vmem>>, vector<1x128x64xbf16>
    %487 = vector.shape_cast %486 : vector<1x128x64xbf16> to vector<128x64xbf16>
    %cst_292 = arith.constant dense<0.000000e+00> : vector<8x64xf32>
    %488 = tpu.matmul %485, %487, %cst_292 {dimension_numbers = #tpu.dot_dimension_numbers<[1], [0], [0], [1], [0, 0, 1, 1], [], []>} : vector<8x128xbf16>, vector<128x64xbf16>, vector<8x64xf32> -> vector<8x64xf32>
    %c1_293 = arith.constant 1 : index
    %c0_294 = arith.constant 0 : index
    %c0_295 = arith.constant 0 : index
    %489 = vector.load %arg15[%c1_293, %c0_294, %c0_295] : memref<2x1x64xf32, #tpu.memory_space<vmem>>, vector<1x1x64xf32>
    %490 = vector.shape_cast %489 : vector<1x1x64xf32> to vector<1x64xf32>
    %491 = vector.broadcast %490 : vector<1x64xf32> to vector<8x64xf32>
    %492 = arith.addf %488, %491 : vector<8x64xf32>
    %493 = arith.addf %447, %492 : vector<8x64xf32>
    %494 = vector.extract_strided_slice %493 {offsets = [0, 0], sizes = [1, 64], strides = [1, 1]} : vector<8x64xf32> to vector<1x64xf32>
    %cst_296 = arith.constant dense<0.000000e+00> : vector<1xf32>
    %495 = vector.multi_reduction <add>, %494, %cst_296 [1] : vector<1x64xf32> to vector<1xf32>
    %496 = vector.shape_cast %495 : vector<1xf32> to vector<1x1xf32>
    %cst_297 = arith.constant 6.400000e+01 : f32
    %497 = vector.broadcast %cst_297 : f32 to vector<1x1xf32>
    %498 = arith.divf %496, %497 : vector<1x1xf32>
    %499 = vector.broadcast %498 : vector<1x1xf32> to vector<1x64xf32>
    %500 = arith.subf %494, %499 : vector<1x64xf32>
    %501 = arith.mulf %500, %500 : vector<1x64xf32>
    %cst_298 = arith.constant dense<0.000000e+00> : vector<1xf32>
    %502 = vector.multi_reduction <add>, %501, %cst_298 [1] : vector<1x64xf32> to vector<1xf32>
    %503 = vector.shape_cast %502 : vector<1xf32> to vector<1x1xf32>
    %cst_299 = arith.constant 6.400000e+01 : f32
    %504 = vector.broadcast %cst_299 : f32 to vector<1x1xf32>
    %505 = arith.divf %503, %504 : vector<1x1xf32>
    %cst_300 = arith.constant 9.99999997E-7 : f32
    %506 = vector.broadcast %cst_300 : f32 to vector<1x1xf32>
    %507 = arith.addf %505, %506 : vector<1x1xf32>
    %508 = math.rsqrt %507 : vector<1x1xf32>
    %509 = vector.broadcast %508 : vector<1x1xf32> to vector<1x64xf32>
    %510 = arith.mulf %500, %509 : vector<1x64xf32>
    %511 = arith.truncf %510 : vector<1x64xf32> to vector<1x64xbf16>
    %c0_301 = arith.constant 0 : index
    %c0_302 = arith.constant 0 : index
    %512 = vector.load %arg16[%c0_301, %c0_302] : memref<64x128xbf16, #tpu.memory_space<vmem>>, vector<64x128xbf16>
    %cst_303 = arith.constant dense<0.000000e+00> : vector<1x128xf32>
    %513 = tpu.matmul %511, %512, %cst_303 {dimension_numbers = #tpu.dot_dimension_numbers<[1], [0], [0], [1], [0, 0, 1, 1], [], []>} : vector<1x64xbf16>, vector<64x128xbf16>, vector<1x128xf32> -> vector<1x128xf32>
    %c0_304 = arith.constant 0 : index
    %c0_305 = arith.constant 0 : index
    %514 = vector.load %arg17[%c0_304, %c0_305] : memref<1x128xf32, #tpu.memory_space<vmem>>, vector<1x128xf32>
    %515 = arith.addf %513, %514 : vector<1x128xf32>
    %c0_306 = arith.constant 0 : index
    %c0_307 = arith.constant 0 : index
    %c0_308 = arith.constant 0 : index
    %516 = vector.load %arg18[%c0_306, %c0_307, %c0_308] : memref<1x1x128xf32, #tpu.memory_space<vmem>>, vector<1x1x128xf32>
    %517 = vector.shape_cast %516 : vector<1x1x128xf32> to vector<1x128xf32>
    %518 = vector.shape_cast %515 : vector<1x128xf32> to vector<1x1x128xf32>
    tpu.vector_store %arg18[%c0_306, %c0_307, %c0_308], %518 {strides = array<i32>} : memref<1x1x128xf32, #tpu.memory_space<vmem>>, vector<1x1x128xf32>,
    return
  }
  func.func @transform_0(%arg0: i32) -> (i32, i32, i32) {
    %c0_i32 = arith.constant 0 : i32
    %c0_i32_0 = arith.constant 0 : i32
    %c0_i32_1 = arith.constant 0 : i32
    return %arg0, %c0_i32, %c0_i32_0 : i32, i32, i32
  }
  func.func @transform_1(%arg0: i32) -> (i32, i32) {
    %c0_i32 = arith.constant 0 : i32
    %c0_i32_0 = arith.constant 0 : i32
    %c0_i32_1 = arith.constant 0 : i32
    return %c0_i32, %c0_i32_0 : i32, i32
  }
  func.func @transform_2(%arg0: i32) -> (i32, i32) {
    %c0_i32 = arith.constant 0 : i32
    %c0_i32_0 = arith.constant 0 : i32
    %c0_i32_1 = arith.constant 0 : i32
    return %c0_i32, %c0_i32_0 : i32, i32
  }
  func.func @transform_3(%arg0: i32) -> (i32, i32) {
    %c0_i32 = arith.constant 0 : i32
    %c0_i32_0 = arith.constant 0 : i32
    %c0_i32_1 = arith.constant 0 : i32
    return %c0_i32, %c0_i32_0 : i32, i32
  }
  func.func @transform_4(%arg0: i32) -> (i32, i32) {
    %c0_i32 = arith.constant 0 : i32
    %c0_i32_0 = arith.constant 0 : i32
    %c0_i32_1 = arith.constant 0 : i32
    return %c0_i32, %c0_i32_0 : i32, i32
  }
  func.func @transform_5(%arg0: i32) -> (i32, i32, i32) {
    %c0_i32 = arith.constant 0 : i32
    %c0_i32_0 = arith.constant 0 : i32
    %c0_i32_1 = arith.constant 0 : i32
    %c0_i32_2 = arith.constant 0 : i32
    return %c0_i32, %c0_i32_0, %c0_i32_1 : i32, i32, i32
  }
  func.func @transform_6(%arg0: i32) -> (i32, i32, i32) {
    %c0_i32 = arith.constant 0 : i32
    %c0_i32_0 = arith.constant 0 : i32
    %c0_i32_1 = arith.constant 0 : i32
    %c0_i32_2 = arith.constant 0 : i32
    return %c0_i32, %c0_i32_0, %c0_i32_1 : i32, i32, i32
  }
  func.func @transform_7(%arg0: i32) -> (i32, i32, i32) {
    %c0_i32 = arith.constant 0 : i32
    %c0_i32_0 = arith.constant 0 : i32
    %c0_i32_1 = arith.constant 0 : i32
    %c0_i32_2 = arith.constant 0 : i32
    return %c0_i32, %c0_i32_0, %c0_i32_1 : i32, i32, i32
  }
  func.func @transform_8(%arg0: i32) -> (i32, i32, i32) {
    %c0_i32 = arith.constant 0 : i32
    %c0_i32_0 = arith.constant 0 : i32
    %c0_i32_1 = arith.constant 0 : i32
    %c0_i32_2 = arith.constant 0 : i32
    return %c0_i32, %c0_i32_0, %c0_i32_1 : i32, i32, i32
  }
  func.func @transform_9(%arg0: i32) -> (i32, i32, i32) {
    %c0_i32 = arith.constant 0 : i32
    %c0_i32_0 = arith.constant 0 : i32
    %c0_i32_1 = arith.constant 0 : i32
    %c0_i32_2 = arith.constant 0 : i32
    return %c0_i32, %c0_i32_0, %c0_i32_1 : i32, i32, i32
  }
  func.func @transform_10(%arg0: i32) -> (i32, i32, i32) {
    %c0_i32 = arith.constant 0 : i32
    %c0_i32_0 = arith.constant 0 : i32
    %c0_i32_1 = arith.constant 0 : i32
    %c0_i32_2 = arith.constant 0 : i32
    return %c0_i32, %c0_i32_0, %c0_i32_1 : i32, i32, i32
  }
  func.func @transform_11(%arg0: i32) -> (i32, i32, i32) {
    %c0_i32 = arith.constant 0 : i32
    %c0_i32_0 = arith.constant 0 : i32
    %c0_i32_1 = arith.constant 0 : i32
    %c0_i32_2 = arith.constant 0 : i32
    return %c0_i32, %c0_i32_0, %c0_i32_1 : i32, i32, i32
  }
  func.func @transform_12(%arg0: i32) -> (i32, i32, i32) {
    %c0_i32 = arith.constant 0 : i32
    %c0_i32_0 = arith.constant 0 : i32
    %c0_i32_1 = arith.constant 0 : i32
    %c0_i32_2 = arith.constant 0 : i32
    return %c0_i32, %c0_i32_0, %c0_i32_1 : i32, i32, i32
  }
  func.func @transform_13(%arg0: i32) -> (i32, i32, i32) {
    %c0_i32 = arith.constant 0 : i32
    %c0_i32_0 = arith.constant 0 : i32
    %c0_i32_1 = arith.constant 0 : i32
    %c0_i32_2 = arith.constant 0 : i32
    return %c0_i32, %c0_i32_0, %c0_i32_1 : i32, i32, i32
  }
  func.func @transform_14(%arg0: i32) -> (i32, i32, i32) {
    %c0_i32 = arith.constant 0 : i32
    %c0_i32_0 = arith.constant 0 : i32
    %c0_i32_1 = arith.constant 0 : i32
    %c0_i32_2 = arith.constant 0 : i32
    return %c0_i32, %c0_i32_0, %c0_i32_1 : i32, i32, i32
  }
  func.func @transform_15(%arg0: i32) -> (i32, i32) {
    %c0_i32 = arith.constant 0 : i32
    %c0_i32_0 = arith.constant 0 : i32
    %c0_i32_1 = arith.constant 0 : i32
    return %c0_i32, %c0_i32_0 : i32, i32
  }
  func.func @transform_16(%arg0: i32) -> (i32, i32) {
    %c0_i32 = arith.constant 0 : i32
    %c0_i32_0 = arith.constant 0 : i32
    %c0_i32_1 = arith.constant 0 : i32
    return %c0_i32, %c0_i32_0 : i32, i32
  }
  func.func @transform_17(%arg0: i32) -> (i32, i32, i32) {
    %c0_i32 = arith.constant 0 : i32
    %c0_i32_0 = arith.constant 0 : i32
    %c0_i32_1 = arith.constant 0 : i32
    return %arg0, %c0_i32, %c0_i32_0 : i32, i32, i32
  }
}

</mosaic_0001>

<bundles_post_ra>
// kernel: vit_forward.1
= control target key start
LH: loop header
LB: loop body
LE: loop exit
PB: predicated region body
PF: predicated region fallthrough
CT: control target
= control target key end

     0   :  { %s10489_s0 = inlined_call_operand.vmem [shape: bf16[2,4,3072], index: 0, kind: input, shape index: {}]   ;;  %s10490_s1 = inlined_call_operand.vmem [shape: f32[8,4], index: 1, kind: input, shape index: {}]   ;;  %s10491_s2 = inlined_call_operand.vmem [shape: f32[8,64], index: 2, kind: input, shape index: {}]   ;;  %s10492_s3 = inlined_call_operand.vmem [shape: f32[8,8], index: 3, kind: input, shape index: {}]   ;;  %s10493_s4 = inlined_call_operand.vmem [shape: bf16[3072,64], index: 4, kind: input, shape index: {}]   ;;  %s10494_s5 = inlined_call_operand.vmem [shape: bf16[8,64,16], index: 5, kind: input, shape index: {}]   ;;  %s10495_s6 = inlined_call_operand.vmem [shape: bf16[8,64,16], index: 6, kind: input, shape index: {}]   ;;  %s10496_s7 = inlined_call_operand.vmem [shape: bf16[8,64,16], index: 7, kind: input, shape index: {}]   ;;  %s10497_s8 = inlined_call_operand.vmem [shape: f32[24,1,16], index: 8, kind: input, shape index: {}]   ;;  %s10498_s9 = inlined_call_operand.vmem [shape: bf16[8,16,64], index: 9, kind: input, shape index: {}]   ;;  %s10499_s10 = inlined_call_operand.vmem [shape: f32[2,1,64], index: 10, kind: input, shape index: {}]   ;;  %s10500_s11 = inlined_call_operand.vmem [shape: bf16[2,64,128], index: 11, kind: input, shape index: {}]   ;;  %s10501_s12 = inlined_call_operand.vmem [shape: f32[2,1,128], index: 12, kind: input, shape index: {}]   ;;  %s10502_s13 = inlined_call_operand.vmem [shape: bf16[2,128,64], index: 13, kind: input, shape index: {}]   ;;  %s10503_s14 = inlined_call_operand.vmem [shape: f32[2,1,64], index: 14, kind: input, shape index: {}]   ;;  %s10504_s15 = inlined_call_operand.vmem [shape: bf16[64,128], index: 15, kind: input, shape index: {}]   ;;  %s10505_s16 = inlined_call_operand.vmem [shape: f32[1,128], index: 16, kind: input, shape index: {}]   ;;  %s10506_s17 = inlined_call_operand.hbm [shape: f32[2,1,128], index: 17, kind: output, shape index: {}]  }
   0x1   :  { %10513 = sst [smem:[#allocation11_spill]] %s10489_s0 }
   0x2   :  { %10514 = sst [smem:[#allocation12_spill]] %s10490_s1 }
   0x3   :  { %22 = vsyncpa [#allocation3], 0 }
   0x4   :  { %24 = vsyncpa [#allocation3 + $0x1], 0  ;;  %s8869_s24 = smov 0   ;;  %s8871_s25 = smov 0  }
   0x5   :  { %s8873_s26 = smov 0   ;;  %s8875_s27 = smov 0  }
   0x6 LB: > { %10515 = sst [smem:[#allocation5_spill]] %s8761_s24  ;;  %s8890_s28 = sadd.s32 4294967295, %s8773_s27   ;;  %s8773_s27 = sphi %s8875_s27, %s10528_s27   ;;  %s8769_s26 = sphi %s8873_s26, %s10530_s26   ;;  %s8765_s25 = sphi %s8871_s25, %s10532_s25   ;;  %s8761_s24 = sphi %s8869_s24, %s10531_s24  }
   0x7   : > { %10516 = sst [smem:[#allocation6_spill]] %s8769_s26  ;;  %s6664_s29 = sadd.s32 4294967294, %s8773_s27  }
   0x8   : > { %10517 = sst [smem:[#allocation7_spill]] %s8773_s27  ;;  %s8894_s0 = sadd.s32 1, %s8773_s27  }
   0x9   : > { %10518 = sst [smem:[#allocation8_spill]] %s8894_s0  ;;  %s399_s30 = sadd.s32 1, %s8769_s26 }
   0xa   : > { %s396_s18 = ssub.s32 %s8773_s27, %s8894_s0  ;;  %p409_p0 = scmp.ne.s32.totalorder %s8769_s26, %s8765_s25 }
   0xb   : > { %p397_p1 = scmp.eq.s32.totalorder %s396_s18, 0  ;;  %p410_p2 = scmp.eq.s32.totalorder %s8890_s28, 1 }
   0xc   : > { %p415_p3 = scmp.ne.s32.totalorder %s8765_s25, %s8761_s24  ;;  %p416_p4 = scmp.eq.s32.totalorder %s6664_s29, 1 }
   0xd   : > { %s8905_s19 = scalar_select %p397_p1, %s8769_s26, %s399_s30  }
   0xe   : > { %p8907_p5 = por %p410_p2, %p409_p0  ;;  %p8911_p6 = por %p416_p4, %p415_p3 }
   0xf   : > { %10519 = sst [smem:[#allocation9_spill]] %s8905_s19  ;;  %p6667_p7 = scmp.ge.s32.totalorder %s8773_s27, 1 }
  0x10   : > { %s10521_s20 = scalar_select %p8911_p6, 1, 0 }
  0x11   : > { %p490_p8 = scmp.lt.s32.totalorder %s8773_s27, 3 }
  0x12   : > { %10522 = sst [smem:[#allocation10_spill]] %s10521_s20 }
  0x13   : > { %p491_p9 = pnand %p6667_p7, %p490_p8 }
  0x14   : > { %v8334_v0 = vld [vmem:[%s10493_s4 + $0x40] sm:$0xff] (!%p491_p9)   ;;  %v8338_v4 = vld [vmem:[%s10493_s4 + $0x48] sm:$0xff] (!%p491_p9)   ;;  %v8342_v8 = vld [vmem:[%s10493_s4 + $0x50] sm:$0xff] (!%p491_p9)   ;;  %p541_p10 = scmp.lt.s32.totalorder (!%p491_p9), %s8890_s28, 1  ;;  %v947_v28 = vlaneseq (!%p491_p9)  ;;  %s10523_s24 = sld [smem:[#allocation11_spill]] (!%p491_p9)  ;;  %vm8777_vm0 = vmmov (!%p491_p9), 0  }
  0x15   : > { %494 = sbr.rel (%p491_p9) target bundleno = 11633 (0x2d71), region = 88  ;;  %v8335_v1 = vld [vmem:[%s10493_s4 + $0xc0] sm:$0xff] (!%p491_p9)   ;;  %7311 = vmatprep.subr.bf16.mxu0 (!%p491_p9), %v8334_v0  ;;  %v8339_v5 = vld [vmem:[%s10493_s4 + $0xc8] sm:$0xff] (!%p491_p9)   ;;  %v8343_v9 = vld [vmem:[%s10493_s4 + $0xd0] sm:$0xff] (!%p491_p9)   ;;  %v8775_v36 = vmov (!%p491_p9), 1983009808  }
  0x16   : > { %v8336_v2 = vld [vmem:[%s10493_s4] sm:$0xff] (!%p491_p9)   ;;  %7333 = vmatprep.subr.bf16.mxu1 (!%p491_p9), %v8335_v1  ;;  %v8340_v6 = vld [vmem:[%s10493_s4 + $0x8] sm:$0xff] (!%p491_p9)   ;;  %v8344_v10 = vld [vmem:[%s10493_s4 + $0x10] sm:$0xff] (!%p491_p9)   ;;  %v948_v33 = vshrl.u32 (!%p491_p9), %v947_v28, 7  ;;  %v945_v37 = vunpack.c.l.s4 (!%p491_p9), %v8775_v36  ;;  %vm2707_vm1 = vcmask (!%p491_p9), 1043456   ;;  %vm2703_vm2 = vcmask (!%p491_p9), 31744  }
  0x17   : > { %v8337_v3 = vld [vmem:[%s10493_s4 + $0x80] sm:$0xff] (!%p491_p9)   ;;  %7312 = vmatpush3.bf16.msra.mxu0 (!%p491_p9), %v8336_v2  ;;  %v8341_v7 = vld [vmem:[%s10493_s4 + $0x88] sm:$0xff] (!%p491_p9)   ;;  %v8345_v11 = vld [vmem:[%s10493_s4 + $0x90] sm:$0xff] (!%p491_p9)   ;;  %vm2781_vm3 = vcmask (!%p491_p9), 523264   ;;  %vm3043_vm4 = vcmask (!%p491_p9), 130048   ;;  %vm3090_vm5 = vcmask (!%p491_p9), 64512  }
  0x18   : > { %7334 = vmatpush3.bf16.msra.mxu1 (!%p491_p9), %v8337_v3  ;;  %7313 = vmatprep.subr.bf16.mxu0 (!%p491_p9), %v8338_v4  ;;  %v8346_v12 = vld [vmem:[%s10493_s4 + $0x58] sm:$0xff] (!%p491_p9)   ;;  %v8350_v16 = vld [vmem:[%s10493_s4 + $0x60] sm:$0xff] (!%p491_p9)   ;;  %v8354_v20 = vld [vmem:[%s10493_s4 + $0x68] sm:$0xff] (!%p491_p9)   ;;  %v946_v39 = vunpack.c.0.s8 (!%p491_p9), %v945_v37  ;;  %vm6504_vm6 = vcmask (!%p491_p9), 516096   ;;  %s539_s19 = sand.u32 (!%p491_p9), 1, %s8765_s25  }
  0x19   : > { %7335 = vmatprep.subr.bf16.mxu1 (!%p491_p9), %v8339_v5  ;;  %v8347_v13 = vld [vmem:[%s10493_s4 + $0xd8] sm:$0xff] (!%p491_p9)   ;;  %v8351_v17 = vld [vmem:[%s10493_s4 + $0xe0] sm:$0xff] (!%p491_p9)   ;;  %v8355_v21 = vld [vmem:[%s10493_s4 + $0xe8] sm:$0xff] (!%p491_p9)   ;;  %s540_s21 = scalar_lea.vmem (!%p491_p9), [#allocation2], %s539_s19  ;;  %s6597_s23 = scalar_lea.sflag (!%p491_p9), [#allocation3], %s539_s19 }
  0x1a   : > { %v8348_v14 = vld [vmem:[%s10493_s4 + $0x18] sm:$0xff] (!%p491_p9)   ;;  %v8352_v18 = vld [vmem:[%s10493_s4 + $0x20] sm:$0xff] (!%p491_p9)   ;;  %v8356_v22 = vld [vmem:[%s10493_s4 + $0x28] sm:$0xff] (!%p491_p9)   ;;  %v9027_v41 = vsub.s32 (!%p491_p9), %v946_v39, %v948_v33 }
  0x1b   : > { %7314 = vmatpush3.bf16.msra.mxu0 (!%p491_p9), %v8340_v6  ;;  %v8349_v15 = vld [vmem:[%s10493_s4 + $0x98] sm:$0xff] (!%p491_p9)   ;;  %v8353_v19 = vld [vmem:[%s10493_s4 + $0xa0] sm:$0xff] (!%p491_p9)   ;;  %v8357_v23 = vld [vmem:[%s10493_s4 + $0xa8] sm:$0xff] (!%p491_p9)  }
  0x1c   : > { %7336 = vmatpush3.bf16.msra.mxu1 %v8341_v7  ;;  %7315 = vmatprep.subr.bf16.mxu0 %v8342_v8  ;;  %s542_s30 = scalar_select %p541_p10, %s8890_s28, 1  ;;  %v8358_v24 = vld [vmem:[%s10493_s4 + $0x70] sm:$0xff]   ;;  %v8362_v29 = vld [vmem:[%s10493_s4 + $0x78] sm:$0xff]   ;;  %v8367_v35 = vld [vmem:[%s10493_s4 + $0x140] sm:$0xff]  }
  0x1d   : > { %7337 = vmatprep.subr.bf16.mxu1 %v8343_v9  ;;  %v8359_v25 = vld [vmem:[%s10493_s4 + $0xf0] sm:$0xff]   ;;  %v8363_v30 = vld [vmem:[%s10493_s4 + $0xf8] sm:$0xff]   ;;  %v8368_v38 = vld [vmem:[%s10493_s4 + $0x1c0] sm:$0xff]  }
  0x1e   : > { %s8291_s29 = smul.u32 48, %s542_s30  ;;  %v8360_v26 = vld [vmem:[%s10493_s4 + $0x30] sm:$0xff]   ;;  %v8364_v31 = vld [vmem:[%s10493_s4 + $0x38] sm:$0xff]   ;;  %v8369_v44 = vld [vmem:[%s10493_s4 + $0x100] sm:$0xff]  }
  0x1f   : > { %7316 = vmatpush3.bf16.msra.mxu0 %v8344_v10  ;;  %v8361_v27 = vld [vmem:[%s10493_s4 + $0xb0] sm:$0xff]   ;;  %v8365_v32 = vld [vmem:[%s10493_s4 + $0xb8] sm:$0xff]   ;;  %v8370_v45 = vld [vmem:[%s10493_s4 + $0x180] sm:$0xff]  }
  0x20   : > { %7338 = vmatpush3.bf16.msra.mxu1 %v8345_v11  ;;  %7317 = vmatprep.subr.bf16.mxu0 %v8346_v12  ;;  %s9012_s18 = scalar_lea.vmem %s10523_s24, %s8291_s29  ;;  %v8371_v48 = vld [vmem:[%s10493_s4 + $0x148] sm:$0xff]   ;;  %v8375_v52 = vld [vmem:[%s10493_s4 + $0x150] sm:$0xff]   ;;  %v8379_v56 = vld [vmem:[%s10493_s4 + $0x158] sm:$0xff]   ;;  %s10524_s29 = sld [smem:[#allocation12_spill]] }
  0x21   : > { %7339 = vmatprep.subr.bf16.mxu1 %v8347_v13  ;;  %v547_v34 = vld [vmem:[%s9012_s18] sm:$0xff]  ;;  %v8372_v49 = vld [vmem:[%s10493_s4 + $0x1c8] sm:$0xff]   ;;  %v8376_v53 = vld [vmem:[%s10493_s4 + $0x1d0] sm:$0xff]   ;;  %s8778_s24 = smov [#allocation2]  }
  0x22   : > { %v943_v40 = vcombine.high %v547_v34, %v547_v34  ;;  %v950_v42 = vrot.slane %v547_v34, %v9027_v41  ;;  %v8373_v50 = vld [vmem:[%s10493_s4 + $0x108] sm:$0xff]   ;;  %v8377_v54 = vld [vmem:[%s10493_s4 + $0x110] sm:$0xff]   ;;  %v8380_v57 = vld [vmem:[%s10493_s4 + $0x1d8] sm:$0xff]   ;;  %s8715_s26 = sshll.u32 %s8778_s24, 4  ;;  %s8716_s26 = int_to_ptr.vmem [resolvable:$false] %s8715_s26 }
  0x23   : > { %7318 = vmatpush3.bf16.msra.mxu0 %v8348_v14  ;;  %v8374_v51 = vld [vmem:[%s10493_s4 + $0x188] sm:$0xff]   ;;  %v8378_v55 = vld [vmem:[%s10493_s4 + $0x190] sm:$0xff]   ;;  %v8381_v58 = vld [vmem:[%s10493_s4 + $0x118] sm:$0xff]   ;;  %s8717_s0 = scalar_lea.vmem %s8716_s26, 32 }
  0x24   : > { %7340 = vmatpush3.bf16.msra.mxu1 %v8349_v15  ;;  %7319 = vmatprep.subr.bf16.mxu0 %v8350_v16  ;;  %v957_v43 = vrot.slane %v943_v40, %v9027_v41  ;;  %v958_v46 = vcombine.high %v950_v42, %v950_v42  ;;  %v8382_v59 = vld [vmem:[%s10493_s4 + $0x198] sm:$0xff]   ;;  %v8383_v60 = vld [vmem:[%s10493_s4 + $0x160] sm:$0xff]   ;;  %v8387_v0 = vld [vmem:[%s10493_s4 + $0x168] sm:$0xff]  }
  0x25   : > { %7341 = vmatprep.subr.bf16.mxu1 %v8351_v17  ;;  %v8384_v61 = vld [vmem:[%s10493_s4 + $0x1e0] sm:$0xff]   ;;  %v8388_v1 = vld [vmem:[%s10493_s4 + $0x1e8] sm:$0xff]   ;;  %v8391_v4 = vld [vmem:[%s10493_s4 + $0x170] sm:$0xff]  }
  0x26   : > { %v959_v47 = vcombine.high %v957_v43, %v957_v43  ;;  %2253 = vmatprep.mubr.bf16.mxu0 %v958_v46  ;;  %v8385_v62 = vld [vmem:[%s10493_s4 + $0x120] sm:$0xff]   ;;  %v8389_v2 = vld [vmem:[%s10493_s4 + $0x128] sm:$0xff]   ;;  %v8392_v5 = vld [vmem:[%s10493_s4 + $0x1f0] sm:$0xff]  }
  0x27   : > { %7320 = vmatpush3.bf16.msra.mxu0 %v8352_v18  ;;  %v8386_v63 = vld [vmem:[%s10493_s4 + $0x1a0] sm:$0xff]   ;;  %v8390_v3 = vld [vmem:[%s10493_s4 + $0x1a8] sm:$0xff]   ;;  %v8393_v6 = vld [vmem:[%s10493_s4 + $0x130] sm:$0xff]  }
  0x28   : > { %7342 = vmatpush3.bf16.msra.mxu1 %v8353_v19  ;;  %7321 = vmatprep.subr.bf16.mxu0 %v8354_v20  ;;  %v8394_v7 = vld [vmem:[%s10493_s4 + $0x1b0] sm:$0xff]   ;;  %v548_v8 = vld [vmem:[%s9012_s18 + $0x8] sm:$0xff]  ;;  %v8395_v9 = vld [vmem:[%s10493_s4 + $0x178] sm:$0xff]  }
  0x29   : > { %7343 = vmatprep.subr.bf16.mxu1 %v8355_v21  ;;  %2293 = vmatprep.mubr.bf16.mxu1 %v959_v47  ;;  %v967_v10 = vrot.slane %v548_v8, %v9027_v41  ;;  %v960_v11 = vcombine.high %v548_v8, %v548_v8  ;;  %v8396_v12 = vld [vmem:[%s10493_s4 + $0x1f8] sm:$0xff]   ;;  %v8400_v18 = vld [vmem:[%s10493_s4 + $0x240] sm:$0xff]   ;;  %v8410_v28 = vld [vmem:[%s10493_s4 + $0x210] sm:$0xff]  }
  0x2a   : > { %v8397_v13 = vld [vmem:[%s10493_s4 + $0x138] sm:$0xff]   ;;  %v8401_v19 = vld [vmem:[%s10493_s4 + $0x2c0] sm:$0xff]   ;;  %v8421_v39 = vld [vmem:[%s10493_s4 + $0x2e8] sm:$0xff]  }
  0x2b   : > { %7322 = vmatpush3.bf16.msra.mxu0 %v8356_v22  ;;  %v975_v14 = vcombine.high %v967_v10, %v967_v10  ;;  %v974_v15 = vrot.slane %v960_v11, %v9027_v41  ;;  %v8398_v16 = vld [vmem:[%s10493_s4 + $0x1b8] sm:$0xff]   ;;  %v8402_v20 = vld [vmem:[%s10493_s4 + $0x200] sm:$0xff]   ;;  %v8404_v22 = vld [vmem:[%s10493_s4 + $0x248] sm:$0xff]  }
  0x2c   : > { %7344 = vmatpush3.bf16.msra.mxu1 %v8357_v23  ;;  %7323 = vmatprep.subr.bf16.mxu0 %v8358_v24  ;;  %v8403_v21 = vld [vmem:[%s10493_s4 + $0x280] sm:$0xff]   ;;  %v8405_v23 = vld [vmem:[%s10493_s4 + $0x2c8] sm:$0xff]   ;;  %v8415_v33 = vld [vmem:[%s10493_s4 + $0x298] sm:$0xff]  }
  0x2d   : > { %7345 = vmatprep.subr.bf16.mxu1 %v8359_v25  ;;  %v976_v17 = vcombine.high %v974_v15, %v974_v15  ;;  %v8406_v24 = vld [vmem:[%s10493_s4 + $0x208] sm:$0xff]   ;;  %v8416_v34 = vld [vmem:[%s10493_s4 + $0x260] sm:$0xff]   ;;  %v8427_v46 = vld [vmem:[%s10493_s4 + $0x2b0] sm:$0xff]  }
  0x2e   : > { %v8407_v25 = vld [vmem:[%s10493_s4 + $0x288] sm:$0xff]   ;;  %v8418_v36 = vld [vmem:[%s10493_s4 + $0x220] sm:$0xff]   ;;  %v549_v47 = vld [vmem:[%s9012_s18 + $0x10] sm:$0xff] }
  0x2f   : > { %7324 = vmatpush3.bf16.msra.mxu0 %v8360_v26  ;;  %v8408_v26 = vld [vmem:[%s10493_s4 + $0x250] sm:$0xff]   ;;  %v8419_v37 = vld [vmem:[%s10493_s4 + $0x2a0] sm:$0xff]   ;;  %v8422_v40 = vld [vmem:[%s10493_s4 + $0x228] sm:$0xff]  }
  0x30   : > { %7346 = vmatpush3.bf16.msra.mxu1 %v8361_v27  ;;  %7325 = vmatprep.subr.bf16.mxu0 %v8362_v29  ;;  %v8409_v27 = vld [vmem:[%s10493_s4 + $0x2d0] sm:$0xff]   ;;  %v8448_v8 = vld [vmem:[%s10493_s4 + $0x398] sm:$0xff]   ;;  %v8451_v11 = vld [vmem:[%s10493_s4 + $0x320] sm:$0xff]  }
  0x31   : > { %7347 = vmatprep.subr.bf16.mxu1 %v8363_v30  ;;  %v8411_v29 = vld [vmem:[%s10493_s4 + $0x290] sm:$0xff]   ;;  %v8412_v30 = vld [vmem:[%s10493_s4 + $0x258] sm:$0xff]  }
  0x33   : > { %7326 = vmatpush3.bf16.msra.mxu0 %v8364_v31  ;;  %v8413_v31 = vld [vmem:[%s10493_s4 + $0x2d8] sm:$0xff]  }
  0x34   : > { %7348 = vmatpush3.bf16.msra.mxu1 %v8365_v32  ;;  %7355 = vmatprep.subr.bf16.mxu0 %v8367_v35  ;;  %v8414_v32 = vld [vmem:[%s10493_s4 + $0x218] sm:$0xff]   ;;  %v8417_v35 = vld [vmem:[%s10493_s4 + $0x2e0] sm:$0xff]  }
  0x35   : > { %7377 = vmatprep.subr.bf16.mxu1 %v8368_v38  ;;  %v8420_v38 = vld [vmem:[%s10493_s4 + $0x268] sm:$0xff]  }
  0x36   : > { %2254 = vmatmul.mubr.bf16.vlgmr.msra.gmra.mrb[0].mxu0 %v950_v42  ;;  %v8423_v42 = vld [vmem:[%s10493_s4 + $0x2a8] sm:$0xff]  }
  0x37   : > { %2294 = vmatmul.mubr.bf16.vlgmr.msra.gmra.mrb[0].mxu1 %v957_v43  ;;  %7356 = vmatpush3.bf16.msra.mxu0 %v8369_v44  ;;  %v8424_v43 = vld [vmem:[%s10493_s4 + $0x270] sm:$0xff]  }
  0x38   : > { %7378 = vmatpush3.bf16.msra.mxu1 %v8370_v45  ;;  %7357 = vmatprep.subr.bf16.mxu0 %v8371_v48  ;;  %v8425_v44 = vld [vmem:[%s10493_s4 + $0x2f0] sm:$0xff]   ;;  %v8428_v48 = vld [vmem:[%s10493_s4 + $0x278] sm:$0xff]  }
  0x39   : > { %7379 = vmatprep.subr.bf16.mxu1 %v8372_v49  ;;  %2333 = vmatprep.mubr.bf16.mxu0 %v975_v14  ;;  %v8426_v45 = vld [vmem:[%s10493_s4 + $0x230] sm:$0xff]   ;;  %v984_v49 = vrot.slane %v549_v47, %v9027_v41  ;;  %v8454_v14 = vld [vmem:[%s10493_s4 + $0x3e8] sm:$0xff]  }
  0x3a   : > { %2373 = vmatprep.mubr.bf16.mxu1 %v976_v17  ;;  %v8457_v17 = vld [vmem:[%s10493_s4 + $0x370] sm:$0xff]  }
  0x3b   : > { %7358 = vmatpush3.bf16.msra.mxu0 %v8373_v50  ;;  %v977_v50 = vcombine.high %v549_v47, %v549_v47  ;;  %v8481_v47 = vld [vmem:[%s10493_s4 + $0x498] sm:$0xff]  }
  0x3c   : > { %7380 = vmatpush3.bf16.msra.mxu1 %v8374_v51  ;;  %7359 = vmatprep.subr.bf16.mxu0 %v8375_v52  ;;  %v8429_v51 = vld [vmem:[%s10493_s4 + $0x2f8] sm:$0xff]  }
  0x3d   : > { %7381 = vmatprep.subr.bf16.mxu1 %v8376_v53  ;;  %v8430_v52 = vld [vmem:[%s10493_s4 + $0x238] sm:$0xff]   ;;  %v992_v53 = vcombine.high %v984_v49, %v984_v49 }
  0x3f   : > { %7360 = vmatpush3.bf16.msra.mxu0 %v8377_v54  ;;  %v991_v54 = vrot.slane %v977_v50, %v9027_v41  ;;  %v8484_v50 = vld [vmem:[%s10493_s4 + $0x420] sm:$0xff]  }
  0x40   : > { %7382 = vmatpush3.bf16.msra.mxu1 %v8378_v55  ;;  %7361 = vmatprep.subr.bf16.mxu0 %v8379_v56  ;;  %v8431_v55 = vld [vmem:[%s10493_s4 + $0x2b8] sm:$0xff]  }
  0x41   : > { %7383 = vmatprep.subr.bf16.mxu1 %v8380_v57  ;;  %v993_v56 = vcombine.high %v991_v54, %v991_v54  ;;  %v8433_v57 = vld [vmem:[%s10493_s4 + $0x340] sm:$0xff]  }
  0x43   : > { %7362 = vmatpush3.bf16.msra.mxu0 %v8381_v58  ;;  %v8434_v58 = vld [vmem:[%s10493_s4 + $0x3c0] sm:$0xff]  }
  0x44   : > { %7384 = vmatpush3.bf16.msra.mxu1 %v8382_v59  ;;  %7363 = vmatprep.subr.bf16.mxu0 %v8383_v60  ;;  %v8435_v59 = vld [vmem:[%s10493_s4 + $0x300] sm:$0xff]  }
  0x45   : > { %7385 = vmatprep.subr.bf16.mxu1 %v8384_v61  ;;  %v8436_v60 = vld [vmem:[%s10493_s4 + $0x380] sm:$0xff]   ;;  %v8437_v61 = vld [vmem:[%s10493_s4 + $0x348] sm:$0xff]  }
  0x47   : > { %7364 = vmatpush3.bf16.msra.mxu0 %v8385_v62  ;;  %v8438_v62 = vld [vmem:[%s10493_s4 + $0x3c8] sm:$0xff]  }
  0x48   : > { %7386 = vmatpush3.bf16.msra.mxu1 %v8386_v63  ;;  %7365 = vmatprep.subr.bf16.mxu0 %v8387_v0  ;;  %v8439_v63 = vld [vmem:[%s10493_s4 + $0x308] sm:$0xff]  }
  0x49   : > { %7387 = vmatprep.subr.bf16.mxu1 %v8388_v1  ;;  %v8440_v0 = vld [vmem:[%s10493_s4 + $0x388] sm:$0xff]   ;;  %v8441_v1 = vld [vmem:[%s10493_s4 + $0x350] sm:$0xff]  }
  0x4b   : > { %7366 = vmatpush3.bf16.msra.mxu0 %v8389_v2  ;;  %v8442_v2 = vld [vmem:[%s10493_s4 + $0x3d0] sm:$0xff]  }
  0x4c   : > { %7388 = vmatpush3.bf16.msra.mxu1 %v8390_v3  ;;  %7367 = vmatprep.subr.bf16.mxu0 %v8391_v4  ;;  %v8443_v3 = vld [vmem:[%s10493_s4 + $0x310] sm:$0xff]  }
  0x4d   : > { %7389 = vmatprep.subr.bf16.mxu1 %v8392_v5  ;;  %v8444_v4 = vld [vmem:[%s10493_s4 + $0x390] sm:$0xff]   ;;  %v8445_v5 = vld [vmem:[%s10493_s4 + $0x358] sm:$0xff]  }
  0x4f   : > { %7368 = vmatpush3.bf16.msra.mxu0 %v8393_v6  ;;  %v8446_v6 = vld [vmem:[%s10493_s4 + $0x3d8] sm:$0xff]  }
  0x50   : > { %7390 = vmatpush3.bf16.msra.mxu1 %v8394_v7  ;;  %7369 = vmatprep.subr.bf16.mxu0 %v8395_v9  ;;  %v8447_v7 = vld [vmem:[%s10493_s4 + $0x318] sm:$0xff]   ;;  %v8449_v9 = vld [vmem:[%s10493_s4 + $0x360] sm:$0xff]  }
  0x51   : > { %7391 = vmatprep.subr.bf16.mxu1 %v8396_v12  ;;  %v8452_v12 = vld [vmem:[%s10493_s4 + $0x3a0] sm:$0xff]  }
  0x53   : > { %7370 = vmatpush3.bf16.msra.mxu0 %v8397_v13  ;;  %v8453_v13 = vld [vmem:[%s10493_s4 + $0x368] sm:$0xff]  }
  0x54   : > { %7392 = vmatpush3.bf16.msra.mxu1 %v8398_v16  ;;  %7399 = vmatprep.subr.bf16.mxu0 %v8400_v18  ;;  %v8456_v16 = vld [vmem:[%s10493_s4 + $0x3a8] sm:$0xff]   ;;  %v8458_v18 = vld [vmem:[%s10493_s4 + $0x3f0] sm:$0xff]  }
  0x55   : > { %7421 = vmatprep.subr.bf16.mxu1 %v8401_v19  ;;  %v8459_v19 = vld [vmem:[%s10493_s4 + $0x330] sm:$0xff]  }
  0x56   : > { %2334 = vmatmul.mubr.bf16.vlgmr.msra.gmra.mrb[4].mxu0 %v967_v10  ;;  %v8450_v10 = vld [vmem:[%s10493_s4 + $0x3e0] sm:$0xff]  }
  0x57   : > { %2374 = vmatmul.mubr.bf16.vlgmr.msra.gmra.mrb[4].mxu1 %v974_v15  ;;  %7400 = vmatpush3.bf16.msra.mxu0 %v8402_v20  ;;  %v8455_v15 = vld [vmem:[%s10493_s4 + $0x328] sm:$0xff]   ;;  %v8460_v20 = vld [vmem:[%s10493_s4 + $0x3b0] sm:$0xff]  }
  0x58   : > { %7422 = vmatpush3.bf16.msra.mxu1 %v8403_v21  ;;  %7401 = vmatprep.subr.bf16.mxu0 %v8404_v22  ;;  %v8461_v21 = vld [vmem:[%s10493_s4 + $0x378] sm:$0xff]  }
  0x59   : > { %7423 = vmatprep.subr.bf16.mxu1 %v8405_v23  ;;  %2413 = vmatprep.mubr.bf16.mxu0 %v992_v53  ;;  %v550_v22 = vld [vmem:[%s9012_s18 + $0x18] sm:$0xff]  ;;  %v8487_v53 = vld [vmem:[%s10493_s4 + $0x4e8] sm:$0xff]  }
  0x5a   : > { %2453 = vmatprep.mubr.bf16.mxu1 %v993_v56  ;;  %v8462_v23 = vld [vmem:[%s10493_s4 + $0x3f8] sm:$0xff]   ;;  %v8490_v56 = vld [vmem:[%s10493_s4 + $0x470] sm:$0xff]  }
  0x5b   : > { %7402 = vmatpush3.bf16.msra.mxu0 %v8406_v24  ;;  %v1001_v24 = vrot.slane %v550_v22, %v9027_v41 }
  0x5c   : > { %7424 = vmatpush3.bf16.msra.mxu1 %v8407_v25  ;;  %7403 = vmatprep.subr.bf16.mxu0 %v8408_v26  ;;  %v994_v25 = vcombine.high %v550_v22, %v550_v22  ;;  %v8463_v26 = vld [vmem:[%s10493_s4 + $0x338] sm:$0xff]   ;;  %v8515_v22 = vld [vmem:[%s10493_s4 + $0x560] sm:$0xff]  }
  0x5d   : > { %7425 = vmatprep.subr.bf16.mxu1 %v8409_v27  ;;  %v8464_v27 = vld [vmem:[%s10493_s4 + $0x3b8] sm:$0xff]  }
  0x5f   : > { %7404 = vmatpush3.bf16.msra.mxu0 %v8410_v28  ;;  %v1009_v28 = vcombine.high %v1001_v24, %v1001_v24 }
  0x60   : > { %7426 = vmatpush3.bf16.msra.mxu1 %v8411_v29  ;;  %7405 = vmatprep.subr.bf16.mxu0 %v8412_v30  ;;  %v1008_v29 = vrot.slane %v994_v25, %v9027_v41  ;;  %v8466_v30 = vld [vmem:[%s10493_s4 + $0x440] sm:$0xff]  }
  0x61   : > { %7427 = vmatprep.subr.bf16.mxu1 %v8413_v31  ;;  %v8518_v25 = vld [vmem:[%s10493_s4 + $0x5a0] sm:$0xff]  }
  0x62   : > { %v1010_v31 = vcombine.high %v1008_v29, %v1008_v29 }
  0x63   : > { %7406 = vmatpush3.bf16.msra.mxu0 %v8414_v32  ;;  %v8467_v32 = vld [vmem:[%s10493_s4 + $0x4c0] sm:$0xff]  }
  0x64   : > { %7428 = vmatpush3.bf16.msra.mxu1 %v8415_v33  ;;  %7407 = vmatprep.subr.bf16.mxu0 %v8416_v34  ;;  %v8468_v33 = vld [vmem:[%s10493_s4 + $0x400] sm:$0xff]  }
  0x65   : > { %7429 = vmatprep.subr.bf16.mxu1 %v8417_v35  ;;  %v8469_v34 = vld [vmem:[%s10493_s4 + $0x480] sm:$0xff]   ;;  %v8470_v35 = vld [vmem:[%s10493_s4 + $0x448] sm:$0xff]  }
  0x67   : > { %7408 = vmatpush3.bf16.msra.mxu0 %v8418_v36  ;;  %v8471_v36 = vld [vmem:[%s10493_s4 + $0x4c8] sm:$0xff]  }
  0x68   : > { %7430 = vmatpush3.bf16.msra.mxu1 %v8419_v37  ;;  %7409 = vmatprep.subr.bf16.mxu0 %v8420_v38  ;;  %v8472_v37 = vld [vmem:[%s10493_s4 + $0x408] sm:$0xff]  }
  0x69   : > { %7431 = vmatprep.subr.bf16.mxu1 %v8421_v39  ;;  %v8473_v38 = vld [vmem:[%s10493_s4 + $0x488] sm:$0xff]   ;;  %v8474_v39 = vld [vmem:[%s10493_s4 + $0x450] sm:$0xff]  }
  0x6b   : > { %7410 = vmatpush3.bf16.msra.mxu0 %v8422_v40  ;;  %v8475_v40 = vld [vmem:[%s10493_s4 + $0x4d0] sm:$0xff]  }
  0x6c   : > { %7432 = vmatpush3.bf16.msra.mxu1 %v8423_v42  ;;  %7411 = vmatprep.subr.bf16.mxu0 %v8424_v43  ;;  %v8476_v42 = vld [vmem:[%s10493_s4 + $0x410] sm:$0xff]  }
  0x6d   : > { %7433 = vmatprep.subr.bf16.mxu1 %v8425_v44  ;;  %v8477_v43 = vld [vmem:[%s10493_s4 + $0x490] sm:$0xff]   ;;  %v8478_v44 = vld [vmem:[%s10493_s4 + $0x458] sm:$0xff]  }
  0x6f   : > { %7412 = vmatpush3.bf16.msra.mxu0 %v8426_v45  ;;  %v8479_v45 = vld [vmem:[%s10493_s4 + $0x4d8] sm:$0xff]  }
  0x70   : > { %7434 = vmatpush3.bf16.msra.mxu1 %v8427_v46  ;;  %7413 = vmatprep.subr.bf16.mxu0 %v8428_v48  ;;  %v8480_v46 = vld [vmem:[%s10493_s4 + $0x418] sm:$0xff]   ;;  %v8482_v48 = vld [vmem:[%s10493_s4 + $0x460] sm:$0xff]  }
  0x71   : > { %7435 = vmatprep.subr.bf16.mxu1 %v8429_v51  ;;  %v8485_v51 = vld [vmem:[%s10493_s4 + $0x4a0] sm:$0xff]  }
  0x73   : > { %7414 = vmatpush3.bf16.msra.mxu0 %v8430_v52  ;;  %v8486_v52 = vld [vmem:[%s10493_s4 + $0x468] sm:$0xff]  }
  0x74   : > { %7436 = vmatpush3.bf16.msra.mxu1 %v8431_v55  ;;  %7443 = vmatprep.subr.bf16.mxu0 %v8433_v57  ;;  %v8489_v55 = vld [vmem:[%s10493_s4 + $0x4a8] sm:$0xff]   ;;  %v8491_v57 = vld [vmem:[%s10493_s4 + $0x4f0] sm:$0xff]  }
  0x75   : > { %7465 = vmatprep.subr.bf16.mxu1 %v8434_v58  ;;  %v8492_v58 = vld [vmem:[%s10493_s4 + $0x430] sm:$0xff]  }
  0x76   : > { %2414 = vmatmul.mubr.bf16.vlgmr.msra.gmra.mrb[8].mxu0 %v984_v49  ;;  %v8483_v49 = vld [vmem:[%s10493_s4 + $0x4e0] sm:$0xff]  }
  0x77   : > { %2454 = vmatmul.mubr.bf16.vlgmr.msra.gmra.mrb[8].mxu1 %v991_v54  ;;  %7444 = vmatpush3.bf16.msra.mxu0 %v8435_v59  ;;  %v8488_v54 = vld [vmem:[%s10493_s4 + $0x428] sm:$0xff]   ;;  %v8493_v59 = vld [vmem:[%s10493_s4 + $0x4b0] sm:$0xff]  }
  0x78   : > { %7466 = vmatpush3.bf16.msra.mxu1 %v8436_v60  ;;  %7445 = vmatprep.subr.bf16.mxu0 %v8437_v61  ;;  %v8494_v60 = vld [vmem:[%s10493_s4 + $0x478] sm:$0xff]   ;;  %v551_v61 = vld [vmem:[%s9012_s18 + $0x20] sm:$0xff] }
  0x79   : > { %7467 = vmatprep.subr.bf16.mxu1 %v8438_v62  ;;  %2493 = vmatprep.mubr.bf16.mxu0 %v1009_v28  ;;  %v8495_v62 = vld [vmem:[%s10493_s4 + $0x4f8] sm:$0xff]   ;;  %v8521_v28 = vld [vmem:[%s10493_s4 + $0x528] sm:$0xff]  }
  0x7a   : > { %2533 = vmatprep.mubr.bf16.mxu1 %v1010_v31  ;;  %v8524_v31 = vld [vmem:[%s10493_s4 + $0x5f0] sm:$0xff]  }
  0x7b   : > { %7446 = vmatpush3.bf16.msra.mxu0 %v8439_v63  ;;  %v1018_v63 = vrot.slane %v551_v61, %v9027_v41 }
  0x7c   : > { %7468 = vmatpush3.bf16.msra.mxu1 %v8440_v0  ;;  %7447 = vmatprep.subr.bf16.mxu0 %v8441_v1  ;;  %v1011_v0 = vcombine.high %v551_v61, %v551_v61  ;;  %v8496_v1 = vld [vmem:[%s10493_s4 + $0x438] sm:$0xff]  }
  0x7d   : > { %7469 = vmatprep.subr.bf16.mxu1 %v8442_v2  ;;  %v8497_v2 = vld [vmem:[%s10493_s4 + $0x4b8] sm:$0xff]  }
  0x7f   : > { %7448 = vmatpush3.bf16.msra.mxu0 %v8443_v3  ;;  %v1026_v3 = vcombine.high %v1018_v63, %v1018_v63 }
  0x80   : > { %7470 = vmatpush3.bf16.msra.mxu1 %v8444_v4  ;;  %7449 = vmatprep.subr.bf16.mxu0 %v8445_v5  ;;  %v1025_v4 = vrot.slane %v1011_v0, %v9027_v41  ;;  %v8499_v5 = vld [vmem:[%s10493_s4 + $0x540] sm:$0xff]  }
  0x81   : > { %7471 = vmatprep.subr.bf16.mxu1 %v8446_v6 }
  0x82   : > { %v1027_v6 = vcombine.high %v1025_v4, %v1025_v4 }
  0x83   : > { %7450 = vmatpush3.bf16.msra.mxu0 %v8447_v7  ;;  %v8500_v7 = vld [vmem:[%s10493_s4 + $0x5c0] sm:$0xff]  }
  0x84   : > { %7472 = vmatpush3.bf16.msra.mxu1 %v8448_v8  ;;  %7451 = vmatprep.subr.bf16.mxu0 %v8449_v9  ;;  %v8501_v8 = vld [vmem:[%s10493_s4 + $0x500] sm:$0xff]  }
  0x85   : > { %7473 = vmatprep.subr.bf16.mxu1 %v8450_v10  ;;  %v8502_v9 = vld [vmem:[%s10493_s4 + $0x580] sm:$0xff]   ;;  %v8503_v10 = vld [vmem:[%s10493_s4 + $0x548] sm:$0xff]  }
  0x87   : > { %7452 = vmatpush3.bf16.msra.mxu0 %v8451_v11  ;;  %v8504_v11 = vld [vmem:[%s10493_s4 + $0x5c8] sm:$0xff]  }
  0x88   : > { %7474 = vmatpush3.bf16.msra.mxu1 %v8452_v12  ;;  %7453 = vmatprep.subr.bf16.mxu0 %v8453_v13  ;;  %v8505_v12 = vld [vmem:[%s10493_s4 + $0x508] sm:$0xff]  }
  0x89   : > { %7475 = vmatprep.subr.bf16.mxu1 %v8454_v14  ;;  %v8506_v13 = vld [vmem:[%s10493_s4 + $0x588] sm:$0xff]   ;;  %v8507_v14 = vld [vmem:[%s10493_s4 + $0x550] sm:$0xff]  }
  0x8b   : > { %7454 = vmatpush3.bf16.msra.mxu0 %v8455_v15  ;;  %v8508_v15 = vld [vmem:[%s10493_s4 + $0x5d0] sm:$0xff]  }
  0x8c   : > { %7476 = vmatpush3.bf16.msra.mxu1 %v8456_v16  ;;  %7455 = vmatprep.subr.bf16.mxu0 %v8457_v17  ;;  %v8509_v16 = vld [vmem:[%s10493_s4 + $0x510] sm:$0xff]  }
  0x8d   : > { %7477 = vmatprep.subr.bf16.mxu1 %v8458_v18  ;;  %v8510_v17 = vld [vmem:[%s10493_s4 + $0x590] sm:$0xff]   ;;  %v8511_v18 = vld [vmem:[%s10493_s4 + $0x558] sm:$0xff]  }
  0x8f   : > { %7456 = vmatpush3.bf16.msra.mxu0 %v8459_v19  ;;  %v8512_v19 = vld [vmem:[%s10493_s4 + $0x5d8] sm:$0xff]  }
  0x90   : > { %7478 = vmatpush3.bf16.msra.mxu1 %v8460_v20  ;;  %7457 = vmatprep.subr.bf16.mxu0 %v8461_v21  ;;  %v8513_v20 = vld [vmem:[%s10493_s4 + $0x518] sm:$0xff]  }
  0x91   : > { %7479 = vmatprep.subr.bf16.mxu1 %v8462_v23  ;;  %v8514_v21 = vld [vmem:[%s10493_s4 + $0x598] sm:$0xff]   ;;  %v8516_v23 = vld [vmem:[%s10493_s4 + $0x5e0] sm:$0xff]  }
  0x93   : > { %7458 = vmatpush3.bf16.msra.mxu0 %v8463_v26  ;;  %v8519_v26 = vld [vmem:[%s10493_s4 + $0x568] sm:$0xff]  }
  0x94   : > { %7480 = vmatpush3.bf16.msra.mxu1 %v8464_v27  ;;  %7487 = vmatprep.subr.bf16.mxu0 %v8466_v30  ;;  %v8520_v27 = vld [vmem:[%s10493_s4 + $0x5e8] sm:$0xff]   ;;  %v8523_v30 = vld [vmem:[%s10493_s4 + $0x570] sm:$0xff]  }
  0x95   : > { %7509 = vmatprep.subr.bf16.mxu1 %v8467_v32  ;;  %v8525_v32 = vld [vmem:[%s10493_s4 + $0x530] sm:$0xff]  }
  0x96   : > { %2494 = vmatmul.mubr.bf16.vlgmr.msra.gmra.mrb[12].mxu0 %v1001_v24  ;;  %v8517_v24 = vld [vmem:[%s10493_s4 + $0x520] sm:$0xff]  }
  0x97   : > { %2534 = vmatmul.mubr.bf16.vlgmr.msra.gmra.mrb[12].mxu1 %v1008_v29  ;;  %7488 = vmatpush3.bf16.msra.mxu0 %v8468_v33  ;;  %v8522_v29 = vld [vmem:[%s10493_s4 + $0x5a8] sm:$0xff]   ;;  %v8526_v33 = vld [vmem:[%s10493_s4 + $0x5b0] sm:$0xff]  }
  0x98   : > { %7510 = vmatpush3.bf16.msra.mxu1 %v8469_v34  ;;  %7489 = vmatprep.subr.bf16.mxu0 %v8470_v35  ;;  %v8527_v34 = vld [vmem:[%s10493_s4 + $0x578] sm:$0xff]  }
  0x99   : > { %7511 = vmatprep.subr.bf16.mxu1 %v8471_v36  ;;  %2573 = vmatprep.mubr.bf16.mxu0 %v1026_v3  ;;  %v8528_v35 = vld [vmem:[%s10493_s4 + $0x5f8] sm:$0xff]   ;;  %v552_v36 = vld [vmem:[%s9012_s18 + $0x28] sm:$0xff]  ;;  %v8776_v3 = vmov 0.0   ;;  %s7308_s18 = sshll.u32 %s8890_s28, 4 }
  0x9a   : > { %2613 = vmatprep.mubr.bf16.mxu1 %v1027_v6  ;;  %s10447_s30 = scalar_lea.hbm %s10506_s17, %s7308_s18 }
  0x9b   : > { %7490 = vmatpush3.bf16.msra.mxu0 %v8472_v37  ;;  %v1035_v37 = vrot.slane %v552_v36, %v9027_v41 }
  0x9c   : > { %7512 = vmatpush3.bf16.msra.mxu1 %v8473_v38  ;;  %7491 = vmatprep.subr.bf16.mxu0 %v8474_v39  ;;  %v1028_v38 = vcombine.high %v552_v36, %v552_v36  ;;  %v8529_v39 = vld [vmem:[%s10493_s4 + $0x538] sm:$0xff]  }
  0x9d   : > { %7513 = vmatprep.subr.bf16.mxu1 %v8475_v40  ;;  %v8530_v40 = vld [vmem:[%s10493_s4 + $0x5b8] sm:$0xff]  }
  0x9f   : > { %7492 = vmatpush3.bf16.msra.mxu0 %v8476_v42  ;;  %v1043_v42 = vcombine.high %v1035_v37, %v1035_v37 }
  0xa0   : > { %7514 = vmatpush3.bf16.msra.mxu1 %v8477_v43  ;;  %7493 = vmatprep.subr.bf16.mxu0 %v8478_v44  ;;  %v1042_v43 = vrot.slane %v1028_v38, %v9027_v41 }
  0xa1   : > { %7515 = vmatprep.subr.bf16.mxu1 %v8479_v45 }
  0xa2   : > { %v1044_v44 = vcombine.high %v1042_v43, %v1042_v43 }
  0xa3   : > { %7494 = vmatpush3.bf16.msra.mxu0 %v8480_v46 }
  0xa4   : > { %7516 = vmatpush3.bf16.msra.mxu1 %v8481_v47  ;;  %7495 = vmatprep.subr.bf16.mxu0 %v8482_v48 }
  0xa5   : > { %7517 = vmatprep.subr.bf16.mxu1 %v8483_v49 }
  0xa7   : > { %7496 = vmatpush3.bf16.msra.mxu0 %v8484_v50 }
  0xa8   : > { %7518 = vmatpush3.bf16.msra.mxu1 %v8485_v51  ;;  %7497 = vmatprep.subr.bf16.mxu0 %v8486_v52 }
  0xa9   : > { %7519 = vmatprep.subr.bf16.mxu1 %v8487_v53 }
  0xab   : > { %7498 = vmatpush3.bf16.msra.mxu0 %v8488_v54 }
  0xac   : > { %7520 = vmatpush3.bf16.msra.mxu1 %v8489_v55  ;;  %7499 = vmatprep.subr.bf16.mxu0 %v8490_v56 }
  0xad   : > { %7521 = vmatprep.subr.bf16.mxu1 %v8491_v57 }
  0xaf   : > { %7500 = vmatpush3.bf16.msra.mxu0 %v8492_v58 }
  0xb0   : > { %7522 = vmatpush3.bf16.msra.mxu1 %v8493_v59  ;;  %7501 = vmatprep.subr.bf16.mxu0 %v8494_v60 }
  0xb1   : > { %7523 = vmatprep.subr.bf16.mxu1 %v8495_v62 }
  0xb3   : > { %7502 = vmatpush3.bf16.msra.mxu0 %v8496_v1 }
  0xb4   : > { %7524 = vmatpush3.bf16.msra.mxu1 %v8497_v2  ;;  %7531 = vmatprep.subr.bf16.mxu0 %v8499_v5 }
  0xb5   : > { %7553 = vmatprep.subr.bf16.mxu1 %v8500_v7 }
  0xb6   : > { %2574 = vmatmul.mubr.bf16.vlgmr.msra.gmra.mrb[16].mxu0 %v1018_v63 }
  0xb7   : > { %2614 = vmatmul.mubr.bf16.vlgmr.msra.gmra.mrb[16].mxu1 %v1025_v4  ;;  %7532 = vmatpush3.bf16.msra.mxu0 %v8501_v8 }
  0xb8   : > { %7554 = vmatpush3.bf16.msra.mxu1 %v8502_v9  ;;  %7533 = vmatprep.subr.bf16.mxu0 %v8503_v10 }
  0xb9   : > { %7555 = vmatprep.subr.bf16.mxu1 %v8504_v11  ;;  %2653 = vmatprep.mubr.bf16.mxu0 %v1043_v42 }
  0xba   : > { %2693 = vmatprep.mubr.bf16.mxu1 %v1044_v44 }
  0xbb   : > { %7534 = vmatpush3.bf16.msra.mxu0 %v8505_v12 }
  0xbc   : > { %7556 = vmatpush3.bf16.msra.mxu1 %v8506_v13  ;;  %7535 = vmatprep.subr.bf16.mxu0 %v8507_v14 }
  0xbd   : > { %7557 = vmatprep.subr.bf16.mxu1 %v8508_v15 }
  0xbf   : > { %7536 = vmatpush3.bf16.msra.mxu0 %v8509_v16 }
  0xc0   : > { %7558 = vmatpush3.bf16.msra.mxu1 %v8510_v17  ;;  %7537 = vmatprep.subr.bf16.mxu0 %v8511_v18 }
  0xc1   : > { %7559 = vmatprep.subr.bf16.mxu1 %v8512_v19 }
  0xc3   : > { %7538 = vmatpush3.bf16.msra.mxu0 %v8513_v20 }
  0xc4   : > { %7560 = vmatpush3.bf16.msra.mxu1 %v8514_v21  ;;  %7539 = vmatprep.subr.bf16.mxu0 %v8515_v22 }
  0xc5   : > { %7561 = vmatprep.subr.bf16.mxu1 %v8516_v23 }
  0xc7   : > { %7540 = vmatpush3.bf16.msra.mxu0 %v8517_v24 }
  0xc8   : > { %7562 = vmatpush3.bf16.msra.mxu1 %v8518_v25  ;;  %7541 = vmatprep.subr.bf16.mxu0 %v8519_v26 }
  0xc9   : > { %7563 = vmatprep.subr.bf16.mxu1 %v8520_v27 }
  0xcb   : > { %7542 = vmatpush3.bf16.msra.mxu0 %v8521_v28 }
  0xcc   : > { %7564 = vmatpush3.bf16.msra.mxu1 %v8522_v29  ;;  %7543 = vmatprep.subr.bf16.mxu0 %v8523_v30 }
  0xcd   : > { %7565 = vmatprep.subr.bf16.mxu1 %v8524_v31 }
  0xcf   : > { %7544 = vmatpush3.bf16.msra.mxu0 %v8525_v32 }
  0xd0   : > { %7566 = vmatpush3.bf16.msra.mxu1 %v8526_v33  ;;  %7545 = vmatprep.subr.bf16.mxu0 %v8527_v34 }
  0xd1   : > { %7567 = vmatprep.subr.bf16.mxu1 %v8528_v35 }
  0xd3   : > { %7546 = vmatpush3.bf16.msra.mxu0 %v8529_v39 }
  0xd4   : > { %7568 = vmatpush3.bf16.msra.mxu1 %v8530_v40  ;;  %7778 = vmatprep.subr.mxu0 %v8776_v3 }
  0xd5   : > { %7783 = vmatprep.subr.bf16.mxu1 %v8776_v3 }
  0xd6   : > { %2654 = vmatmul.mubr.bf16.vlgmr.msra.gmra.mrb[20].mxu0 %v1035_v37 }
  0xd7   : > { %2694 = vmatmul.mubr.bf16.vlgmr.msra.gmra.mrb[20].mxu1 %v1042_v43  ;;  %7780 = vmatprep.mubr.msk.f32.mxu0 %vm8777_vm0, %v8776_v3 }
  0xd8   : > { %7791 = vmatprep.mubr.msk.bf16.mxu1 %vm8777_vm0, %v8776_v3 }
 0x109   : > { %v7327_v45 = vpop.f32.mrb[0].mxu0 }
 0x10a   : > { %v7349_v46 = vpop.f32.mrb[0].mxu1  ;;  %v7328_v47 = vpop.f32.mrb[1].mxu0 }
 0x10b   : > { %v7350_v48 = vpop.f32.mrb[1].mxu1  ;;  %v7329_v49 = vadd.f32 %v7328_v47, %v7327_v45  ;;  %v7330_v51 = vpop.f32.mrb[2].mxu0 }
 0x10c   : > { %v7351_v50 = vadd.f32 %v7350_v48, %v7349_v46  ;;  %v7352_v52 = vpop.f32.mrb[2].mxu1  ;;  %v7331_v41 = vpop.f32.mrb[3].mxu0 }
 0x10d   : > { %v7353_v53 = vpop.f32.mrb[3].mxu1  ;;  %v2701_v41 = vld [vmem:[%s10524_s29] sm:$0xff]  ;;  %s6609_s29 = sshll.u32 %s540_s21, 4  ;;  %s10449_s29 = int_to_ptr.vmem [resolvable:$true] %s6609_s29 }
 0x10e   : > { %v2296_v54 = vadd.f32 %v7351_v50, %v7329_v49  ;;  %v2702_v53 = vld [vmem:[%s10491_s2] sm:$0xff]  ;;  %s8711_s28 = scalar_lea.vmem %s10449_s29, 16  ;;  %p8718_p0 = scmp.lt.s32.totalorder %s10449_s29, %s8716_s26 }
 0x10f   : > { %p8712_p11 = scmp.ne.s32.totalorder %s10449_s29, %s8711_s28  ;;  %p8719_p1 = scmp.lt.s32.totalorder %s8717_s0, %s8711_s28 }
 0x111   : > { %p8713_p12 = pnand %p8712_p11, %p8907_p5  ;;  %p8720_p2 = por %p8719_p1, %p8718_p0 }
 0x113   : > { %p8714_p13 = pneg %p8713_p12 }
 0x115   : > { %p8721_p3 = pnand %p8720_p2, %p8714_p13 }
 0x129   : > { %v7371_v55 = vpop.f32.mrb[4].mxu0 }
 0x12a   : > { %v7393_v56 = vpop.f32.mrb[4].mxu1  ;;  %v7372_v57 = vpop.f32.mrb[5].mxu0 }
 0x12b   : > { %v7394_v58 = vpop.f32.mrb[5].mxu1  ;;  %v7373_v59 = vadd.f32 %v7372_v57, %v7371_v55  ;;  %v7374_v61 = vpop.f32.mrb[6].mxu0 }
 0x12c   : > { %v7395_v60 = vadd.f32 %v7394_v58, %v7393_v56  ;;  %v7396_v62 = vpop.f32.mrb[6].mxu1  ;;  %v7375_v63 = vpop.f32.mrb[7].mxu0 }
 0x12d   : > { %v7397_v0 = vpop.f32.mrb[7].mxu1  ;;  %v2336_v1 = vadd.f32 %v7373_v59, %v2296_v54  ;;  %v8532_v63 = vld [vmem:[%s10494_s5] sm:$0xff]  }
 0x12e   : > { %v8533_v0 = vld [vmem:[%s10495_s6] sm:$0xff]   ;;  %7784 = vmatpush3.bf16.msra.mxu1 %v8532_v63 }
 0x12f   : > { %v2376_v2 = vadd.f32 %v7395_v60, %v2336_v1  ;;  %7785 = vmatprep.subr.bf16.mxu1 %v8776_v3  ;;  %v8534_v1 = vld [vmem:[%s10494_s5 + $0x8] sm:$0xff]   ;;  %v8548_v63 = vld [vmem:[%s10496_s7 + $0x20] sm:$0xff]  }
 0x132   : > { %7786 = vmatpush3.bf16.msra.mxu1 %v8534_v1  ;;  %v8550_v1 = vld [vmem:[%s10496_s7 + $0x30] sm:$0xff]  }
 0x133   : > { %7787 = vmatprep.subr.bf16.mxu1 %v8776_v3 }
 0x149   : > { %v7415_v4 = vpop.f32.mrb[8].mxu0 }
 0x14a   : > { %v7437_v5 = vpop.f32.mrb[8].mxu1  ;;  %v7416_v6 = vpop.f32.mrb[9].mxu0 }
 0x14b   : > { %v7438_v7 = vpop.f32.mrb[9].mxu1  ;;  %v7417_v8 = vadd.f32 %v7416_v6, %v7415_v4  ;;  %v7418_v10 = vpop.f32.mrb[10].mxu0  ;;  %v8536_v4 = vld [vmem:[%s10494_s5 + $0x10] sm:$0xff]   ;;  %v8538_v6 = vld [vmem:[%s10494_s5 + $0x18] sm:$0xff]  }
 0x14c   : > { %v7439_v9 = vadd.f32 %v7438_v7, %v7437_v5  ;;  %v7440_v11 = vpop.f32.mrb[10].mxu1  ;;  %v7419_v12 = vpop.f32.mrb[11].mxu0  ;;  %v8537_v5 = vld [vmem:[%s10495_s6 + $0x10] sm:$0xff]   ;;  %7788 = vmatpush3.bf16.msra.mxu1 %v8536_v4  ;;  %v8539_v7 = vld [vmem:[%s10495_s6 + $0x18] sm:$0xff]  }
 0x14d   : > { %v7441_v13 = vpop.f32.mrb[11].mxu1  ;;  %v2416_v14 = vadd.f32 %v7417_v8, %v2376_v2  ;;  %v8535_v2 = vld [vmem:[%s10495_s6 + $0x8] sm:$0xff]   ;;  %7789 = vmatprep.subr.bf16.mxu1 %v8776_v3 }
 0x14e   : > { %v8540_v13 = vld [vmem:[%s10496_s7] sm:$0xff]  }
 0x14f   : > { %v2456_v15 = vadd.f32 %v7439_v9, %v2416_v14 }
 0x150   : > { %7790 = vmatpush3.bf16.msra.mxu1 %v8538_v6 }
 0x151   : > { %7807 = vmatprep.subr.bf16.mxu1 %v8776_v3 }
 0x169   : > { %v7459_v16 = vpop.f32.mrb[12].mxu0 }
 0x16a   : > { %v7481_v17 = vpop.f32.mrb[12].mxu1  ;;  %v7460_v18 = vpop.f32.mrb[13].mxu0 }
 0x16b   : > { %v7482_v19 = vpop.f32.mrb[13].mxu1  ;;  %v7461_v20 = vadd.f32 %v7460_v18, %v7459_v16  ;;  %v7462_v22 = vpop.f32.mrb[14].mxu0  ;;  %v8542_v16 = vld [vmem:[%s10496_s7 + $0x10] sm:$0xff]   ;;  %v6870_v18 = vld [vmem:[%s10497_s8 + $0x4] ss:$0 sm:$0xff] }
 0x16c   : > { %v7483_v21 = vadd.f32 %v7482_v19, %v7481_v17  ;;  %v7484_v23 = vpop.f32.mrb[14].mxu1  ;;  %v7463_v24 = vpop.f32.mrb[15].mxu0  ;;  %v8543_v17 = vld [vmem:[%s10496_s7 + $0x18] sm:$0xff]  }
 0x16d   : > { %v7485_v25 = vpop.f32.mrb[15].mxu1  ;;  %v2496_v26 = vadd.f32 %v7461_v20, %v2456_v15  ;;  %v8541_v15 = vld [vmem:[%s10496_s7 + $0x8] sm:$0xff]  }
 0x16f   : > { %v2536_v27 = vadd.f32 %v7483_v21, %v2496_v26 }
 0x189   : > { %v7503_v28 = vpop.f32.mrb[16].mxu0 }
 0x18a   : > { %v7525_v29 = vpop.f32.mrb[16].mxu1  ;;  %v7504_v30 = vpop.f32.mrb[17].mxu0 }
 0x18b   : > { %v7526_v31 = vpop.f32.mrb[17].mxu1  ;;  %v7505_v32 = vadd.f32 %v7504_v30, %v7503_v28  ;;  %v7506_v34 = vpop.f32.mrb[18].mxu0 }
 0x18c   : > { %v7527_v33 = vadd.f32 %v7526_v31, %v7525_v29  ;;  %v7528_v35 = vpop.f32.mrb[18].mxu1  ;;  %v7507_v36 = vpop.f32.mrb[19].mxu0  ;;  %v6863_v29 = vld [vmem:[%s10497_s8] ss:$0 sm:$0xff] }
 0x18d   : > { %v7529_v37 = vpop.f32.mrb[19].mxu1  ;;  %v2576_v38 = vadd.f32 %v7505_v32, %v2536_v27 }
 0x18f   : > { %v2616_v39 = vadd.f32 %v7527_v33, %v2576_v38  ;;  %v6877_v33 = vld [vmem:[%s10497_s8 + $0x8] ss:$0 sm:$0xff] }
 0x1a9   : > { %v7547_v40 = vpop.f32.mrb[20].mxu0 }
 0x1aa   : > { %v7569_v42 = vpop.f32.mrb[20].mxu1  ;;  %v7548_v43 = vpop.f32.mrb[21].mxu0 }
 0x1ab   : > { %v7570_v44 = vpop.f32.mrb[21].mxu1  ;;  %v7549_v45 = vadd.f32 %v7548_v43, %v7547_v40  ;;  %v7550_v47 = vpop.f32.mrb[22].mxu0 }
 0x1ac   : > { %v7571_v46 = vadd.f32 %v7570_v44, %v7569_v42  ;;  %v7572_v48 = vpop.f32.mrb[22].mxu1  ;;  %v7551_v49 = vpop.f32.mrb[23].mxu0  ;;  %v9623_v42 = vld [vmem:[%s10492_s3] sm:$0xff] }
 0x1ad   : > { %v7573_v50 = vpop.f32.mrb[23].mxu1  ;;  %v2656_v51 = vadd.f32 %v7549_v45, %v2616_v39 }
 0x1af   : > { %v2696_v52 = vadd.f32 %v7571_v46, %v2656_v51 }
 0x1b1   : > { %7779 = vmatpush3.msk.msra.mxu0 %vm2707_vm1, %v2696_v52 }
 0x1b2   : > { %7781 = vmatmul.mubr.msk.f32.vlgmr.msra.gmra.mrb[24].mxu0 %vm2703_vm2, %v2701_v41  ;;  %7795 = vmatprep.subr.bf16.mxu0 %v8776_v3 }
 0x1b3   : > { %7803 = vmatprep.mubr.msk.bf16.mxu0 %vm8777_vm0, %v8776_v3  ;;  %7796 = vmatpush3.bf16.msra.mxu0 %v8533_v0  ;;  %v8549_v0 = vld [vmem:[%s10496_s7 + $0x28] sm:$0xff]  }
 0x1b4   : > { %7797 = vmatprep.subr.bf16.mxu0 %v8776_v3 }
 0x1b7   : > { %7798 = vmatpush3.bf16.msra.mxu0 %v8535_v2  ;;  %v8551_v2 = vld [vmem:[%s10496_s7 + $0x38] sm:$0xff]  }
 0x1b8   : > { %7799 = vmatprep.subr.bf16.mxu0 %v8776_v3 }
 0x1bb   : > { %7800 = vmatpush3.bf16.msra.mxu0 %v8537_v5  ;;  %v8553_v5 = vld [vmem:[%s10495_s6 + $0x20] sm:$0xff]  }
 0x1bc   : > { %7801 = vmatprep.subr.bf16.mxu0 %v8776_v3 }
 0x1bf   : > { %7802 = vmatpush3.bf16.msra.mxu0 %v8539_v7 }
 0x1c0   : > { %7819 = vmatprep.subr.bf16.mxu0 %v8776_v3 }
 0x285   : > { %v2777_v54 = vpop.f32.mrb[24].mxu0 }
 0x286   : > { %v9536_v55 = vadd.f32 %v2777_v54, %v2702_v53  ;;  %v7782_v56 = vpop.f32.mrb[25].mxu0  ;;  %v8552_v53 = vld [vmem:[%s10498_s9] sm:$0xff]  }
 0x288   : > { %v2782_v57 = vsel %vm2781_vm3, %v9536_v55, 0.0 }
 0x289   : > { %2783 = vadd.xlane.f32.xlu0 %v2782_v57 }
 0x316   : > { %v2784_v58 = vpop.xlane.xlu0 %2783 }
 0x317   : > { %v2786_v59 = vmul.f32 0.015625, %v2784_v58  ;;  %v8544_v58 = vld [vmem:[%s10494_s5 + $0x20] sm:$0xff]  }
 0x319   : > { %v2787_v60 = vsub.f32 %v9536_v55, %v2786_v59 }
 0x31b   : > { %v2788_v61 = vmul.f32 %v2787_v60, %v2787_v60 }
 0x31d   : > { %v2789_v62 = vsel %vm2781_vm3, %v2788_v61, 0.0  ;;  %v8546_v61 = vld [vmem:[%s10494_s5 + $0x30] sm:$0xff]  }
 0x31e   : > { %2790 = vadd.xlane.f32.xlu0 %v2789_v62  ;;  %v8547_v62 = vld [vmem:[%s10494_s5 + $0x38] sm:$0xff]  }
 0x3ab   : > { %v2791_v8 = vpop.xlane.xlu0 %2790 }
 0x3ac   : > { %v2792_v9 = vmul.f32 0.015625, %v2791_v8 }
 0x3ae   : > { %v2793_v10 = vadd.f32 1e-06, %v2792_v9 }
 0x3b0   : > { %8664 = vrsqrt.f32 %v2793_v10  ;;  %v8554_v10 = vld [vmem:[%s10495_s6 + $0x28] sm:$0xff]  }
 0x3ba   : > { %v8665_v11 = vpop.eup %8664 }
 0x3bb   : > { %v2795_v12 = vmul.f32 %v8665_v11, %v2787_v60  ;;  %v8545_v60 = vld [vmem:[%s10494_s5 + $0x28] sm:$0xff]   ;;  %v8555_v11 = vld [vmem:[%s10495_s6 + $0x30] sm:$0xff]  }
 0x3bd   : > { %v9577_v14 = vpack.c.bf16 %v2795_v12, %v2795_v12  ;;  %v8556_v12 = vld [vmem:[%s10495_s6 + $0x38] sm:$0xff]  }
 0x3bf   : > { %7792 = vmatmul.mubr.msk.bf16.vlgmr.msra.gmra.mrb[24].mxu1 %vm2781_vm3, %v9577_v14  ;;  %7804 = vmatmul.mubr.msk.bf16.vlgmr.msra.gmra.mrb[28].mxu0 %vm2781_vm3, %v9577_v14 }
 0x3c0   : > { %7808 = vmatpush3.bf16.msra.mxu1 %v8540_v13  ;;  %7815 = vmatprep.mubr.msk.bf16.mxu1 %vm8777_vm0, %v8776_v3 }
 0x3c1   : > { %7809 = vmatprep.subr.bf16.mxu1 %v8776_v3  ;;  %7821 = vmatprep.mubr.msk.bf16.mxu0 %vm8777_vm0, %v8776_v3 }
 0x3c4   : > { %7810 = vmatpush3.bf16.msra.mxu1 %v8541_v15 }
 0x3c5   : > { %7811 = vmatprep.subr.bf16.mxu1 %v8776_v3 }
 0x3c8   : > { %7812 = vmatpush3.bf16.msra.mxu1 %v8542_v16 }
 0x3c9   : > { %7813 = vmatprep.subr.bf16.mxu1 %v8776_v3 }
 0x3cc   : > { %7814 = vmatpush3.bf16.msra.mxu1 %v8543_v17 }
 0x3cd   : > { %7831 = vmatprep.subr.bf16.mxu1 %v8776_v3 }
 0x3cf   : > { %7816 = vmatmul.mubr.msk.bf16.vlgmr.msra.gmra.mrb[28].mxu1 %vm2781_vm3, %v9577_v14 }
 0x3d0   : > { %7833 = vmatprep.mubr.msk.bf16.mxu1 %vm8777_vm0, %v8776_v3  ;;  %7832 = vmatpush3.bf16.msra.mxu1 %v8552_v53  ;;  %v8565_v53 = vld [vmem:[%s10498_s9 + $0x8] sm:$0xff]  }
 0x3d1   : > { %7849 = vmatprep.subr.bf16.mxu1 %v8776_v3 }
 0x492   : > { %v2874_v19 = vpop.f32.mrb[24].mxu1  ;;  %v2954_v20 = vpop.f32.mrb[28].mxu0 }
 0x493   : > { %v2955_v21 = vadd.f32 %v6870_v18, %v2954_v20  ;;  %v7793_v22 = vpop.f32.mrb[25].mxu1  ;;  %v7805_v23 = vpop.f32.mrb[29].mxu0  ;;  %v2875_v31 = vadd.f32 %v6863_v29, %v2874_v19 }
 0x494   : > { %v2877_v24 = vpop.f32.mrb[26].mxu1  ;;  %v2957_v25 = vpop.f32.mrb[30].mxu0 }
 0x495   : > { %v3041_v26 = vpack.c.bf16 %v2955_v21, %v2955_v21  ;;  %v7794_v27 = vpop.f32.mrb[27].mxu1  ;;  %v7806_v28 = vpop.f32.mrb[31].mxu0  ;;  %v3040_v32 = vpack.c.bf16 %v2875_v31, %v2875_v31 }
 0x497   : > { %v3048_v30 = vsel %vm3043_vm4, %v3041_v26, 0  ;;  %v6912_v26 = vld [vmem:[%s10497_s8 + $0x5] ss:$0 sm:$0xff] }
 0x498   : > { %7820 = vmatpush3.bf16.xpose.msra.mxu0 %v3048_v30  ;;  %v6927_v30 = vld [vmem:[%s10497_s8 + $0x9] ss:$0 sm:$0xff] }
 0x499   : > { %7825 = vmatprep.subr.bf16.mxu0 %v8776_v3 }
 0x49f   : > { %7822 = vmatmul.mubr.msk.bf16.vlgmr.msra.gmra.mrb[32].mxu0 %vm3043_vm4, %v3040_v32 }
 0x4a0   : > { %7827 = vmatprep.mubr.msk.bf16.mxu0 %vm8777_vm0, %v8776_v3 }
 0x4a2   : > { %v3034_v34 = vpop.f32.mrb[28].mxu1 }
 0x4a3   : > { %v3035_v35 = vadd.f32 %v6877_v33, %v3034_v34  ;;  %v7817_v36 = vpop.f32.mrb[29].mxu1  ;;  %v6897_v34 = vld [vmem:[%s10497_s8 + $0x1] ss:$0 sm:$0xff] }
 0x4a4   : > { %v3037_v37 = vpop.f32.mrb[30].mxu1 }
 0x4a5   : > { %v3103_v38 = vpack.c.bf16 %v3035_v35, %v3035_v35  ;;  %v7818_v39 = vpop.f32.mrb[31].mxu1 }
 0x4a7   : > { %v3108_v40 = vsel %vm2707_vm1, %v3103_v38, 0 }
 0x4a8   : > { %7826 = vmatpush3.bf16.msra.mxu0 %v3108_v40 }
 0x4a9   : > { %7837 = vmatprep.subr.bf16.mxu0 %v8776_v3 }
 0x572   : > { %v3084_v43 = vpop.f32.mrb[32].mxu0 }
 0x573   : > { %v3085_v44 = vadd.f32 %v3084_v43, %v9623_v42  ;;  %v7823_v45 = vpop.f32.mrb[33].mxu0 }
 0x574   : > { %v3087_v46 = vpop.f32.mrb[34].mxu0 }
 0x575   : > { %v7824_v47 = vpop.f32.mrb[35].mxu0  ;;  %v3091_v48 = vsel %vm3090_vm5, %v3085_v44, -inf }
 0x576   : > { %3092 = vmax.xlane.f32.xlu1 %v3091_v48 }
 0x603   : > { %v3093_v49 = vpop.xlane.xlu1 %3092 }
 0x604   : > { %v3094_v50 = vsub.f32 %v3085_v44, %v3093_v49 }
 0x606   : > { %v3095_v51 = vmul.f32 1.442695, %v3094_v50 }
 0x608   : > { %8666 = vpow2.f32 %v3095_v51 }
 0x612   : > { %v8667_v52 = vpop.eup %8666 }
 0x613   : > { %v3097_v41 = vsel %vm3090_vm5, %v8667_v52, 0.0 }
 0x614   : > { %3098 = vadd.xlane.f32.xlu1 %v3097_v41 }
 0x6a1   : > { %v3099_v54 = vpop.xlane.xlu1 %3098 }
 0x6a2   : > { %8668 = vrcp.f32 %v3099_v54 }
 0x6ac   : > { %v8669_v56 = vpop.eup %8668 }
 0x6ad   : > { %v3101_v57 = vmul.f32 %v8669_v56, %v8667_v52 }
 0x6af   : > { %v3102_v59 = vpack.c.bf16 %v3101_v57, %v3101_v57 }
 0x6b1   : > { %7828 = vmatmul.mubr.msk.bf16.vlgmr.msra.gmra.mrb[36].mxu0 %vm3090_vm5, %v3102_v59 }
 0x6b2   : > { %7838 = vmatpush3.bf16.msra.mxu0 %v8544_v58  ;;  %7845 = vmatprep.mubr.msk.bf16.mxu0 %vm8777_vm0, %v8776_v3  ;;  %v8557_v58 = vld [vmem:[%s10494_s5 + $0x40] sm:$0xff]  }
 0x6b3   : > { %7839 = vmatprep.subr.bf16.mxu0 %v8776_v3 }
 0x6b6   : > { %7840 = vmatpush3.bf16.msra.mxu0 %v8545_v60  ;;  %v8558_v60 = vld [vmem:[%s10494_s5 + $0x48] sm:$0xff]  }
 0x6b7   : > { %7841 = vmatprep.subr.bf16.mxu0 %v8776_v3 }
 0x6ba   : > { %7842 = vmatpush3.bf16.msra.mxu0 %v8546_v61  ;;  %v8559_v61 = vld [vmem:[%s10494_s5 + $0x50] sm:$0xff]  }
 0x6bb   : > { %7843 = vmatprep.subr.bf16.mxu0 %v8776_v3 }
 0x6be   : > { %7844 = vmatpush3.bf16.msra.mxu0 %v8547_v62  ;;  %v8560_v62 = vld [vmem:[%s10494_s5 + $0x58] sm:$0xff]  }
 0x6bf   : > { %7861 = vmatprep.subr.bf16.mxu0 %v8776_v3 }
 0x6c1   : > { %7846 = vmatmul.mubr.msk.bf16.vlgmr.msra.gmra.mrb[40].mxu0 %vm2781_vm3, %v9577_v14 }
 0x6c2   : > { %7862 = vmatpush3.bf16.msra.mxu0 %v8548_v63  ;;  %7869 = vmatprep.mubr.msk.bf16.mxu0 %vm8777_vm0, %v8776_v3  ;;  %v8561_v63 = vld [vmem:[%s10496_s7 + $0x40] sm:$0xff]  }
 0x6c3   : > { %7863 = vmatprep.subr.bf16.mxu0 %v8776_v3 }
 0x6c6   : > { %7864 = vmatpush3.bf16.msra.mxu0 %v8549_v0  ;;  %v8562_v0 = vld [vmem:[%s10496_s7 + $0x48] sm:$0xff]  }
 0x6c7   : > { %7865 = vmatprep.subr.bf16.mxu0 %v8776_v3 }
 0x6ca   : > { %7866 = vmatpush3.bf16.msra.mxu0 %v8550_v1  ;;  %v8563_v1 = vld [vmem:[%s10496_s7 + $0x50] sm:$0xff]  }
 0x6cb   : > { %7867 = vmatprep.subr.bf16.mxu0 %v8776_v3 }
 0x6ce   : > { %7868 = vmatpush3.bf16.msra.mxu0 %v8551_v2  ;;  %v8564_v2 = vld [vmem:[%s10496_s7 + $0x58] sm:$0xff]  }
 0x6cf   : > { %7885 = vmatprep.subr.bf16.mxu0 %v8776_v3 }
 0x6d1   : > { %7870 = vmatmul.mubr.msk.bf16.vlgmr.msra.gmra.mrb[44].mxu0 %vm2781_vm3, %v9577_v14 }
 0x6d2   : > { %7887 = vmatprep.mubr.msk.bf16.mxu0 %vm8777_vm0, %v8776_v3  ;;  %7886 = vmatpush3.bf16.msra.mxu0 %v8565_v53 }
 0x6d3   : > { %7903 = vmatprep.subr.bf16.mxu0 %v8776_v3 }
 0x784   : > { %v3144_v4 = vpop.f32.mrb[36].mxu0 }
 0x785   : > { %v3150_v6 = vpack.c.bf16 %v3144_v4, %v3144_v4  ;;  %v7829_v7 = vpop.f32.mrb[37].mxu0 }
 0x786   : > { %v3147_v8 = vpop.f32.mrb[38].mxu0 }
 0x787   : > { %v7830_v9 = vpop.f32.mrb[39].mxu0  ;;  %7834 = vmatmul.mubr.msk.bf16.vlgmr.msra.gmra.mrb[32].mxu1 %vm3043_vm4, %v3150_v6 }
 0x788   : > { %7850 = vmatpush3.bf16.msra.mxu1 %v8553_v5  ;;  %7857 = vmatprep.mubr.msk.bf16.mxu1 %vm8777_vm0, %v8776_v3  ;;  %v8566_v5 = vld [vmem:[%s10495_s6 + $0x40] sm:$0xff]  }
 0x789   : > { %7851 = vmatprep.subr.bf16.mxu1 %v8776_v3 }
 0x78c   : > { %7852 = vmatpush3.bf16.msra.mxu1 %v8554_v10  ;;  %v8567_v10 = vld [vmem:[%s10495_s6 + $0x48] sm:$0xff]  }
 0x78d   : > { %7853 = vmatprep.subr.bf16.mxu1 %v8776_v3 }
 0x790   : > { %7854 = vmatpush3.bf16.msra.mxu1 %v8555_v11  ;;  %v8568_v11 = vld [vmem:[%s10495_s6 + $0x50] sm:$0xff]  }
 0x791   : > { %7855 = vmatprep.subr.bf16.mxu1 %v8776_v3 }
 0x794   : > { %v3284_v13 = vpop.f32.mrb[40].mxu0  ;;  %7856 = vmatpush3.bf16.msra.mxu1 %v8556_v12  ;;  %v8569_v12 = vld [vmem:[%s10495_s6 + $0x58] sm:$0xff]  }
 0x795   : > { %v7847_v15 = vpop.f32.mrb[41].mxu0  ;;  %7873 = vmatprep.subr.bf16.mxu1 %v8776_v3  ;;  %v3285_v37 = vadd.f32 %v6897_v34, %v3284_v13  ;;  %v6978_v34 = vld [vmem:[%s10497_s8 + $0xa] ss:$0 sm:$0xff] }
 0x796   : > { %v3287_v16 = vpop.f32.mrb[42].mxu0 }
 0x797   : > { %v7848_v17 = vpop.f32.mrb[43].mxu0  ;;  %7858 = vmatmul.mubr.msk.bf16.vlgmr.msra.gmra.mrb[36].mxu1 %vm2781_vm3, %v9577_v14  ;;  %v3452_v39 = vpack.c.bf16 %v3285_v37, %v3285_v37  ;;  %v6948_v37 = vld [vmem:[%s10497_s8 + $0x2] ss:$0 sm:$0xff] }
 0x798   : > { %7875 = vmatprep.mubr.msk.bf16.mxu1 %vm8777_vm0, %v8776_v3 }
 0x7a4   : > { %v3446_v18 = vpop.f32.mrb[44].mxu0 }
 0x7a5   : > { %v7871_v19 = vpop.f32.mrb[45].mxu0  ;;  %v3447_v35 = vadd.f32 %v6927_v30, %v3446_v18  ;;  %v6963_v30 = vld [vmem:[%s10497_s8 + $0x6] ss:$0 sm:$0xff] }
 0x7a6   : > { %v3449_v20 = vpop.f32.mrb[46].mxu0 }
 0x7a7   : > { %v7872_v21 = vpop.f32.mrb[47].mxu0  ;;  %v3512_v38 = vpack.c.bf16 %v3447_v35, %v3447_v35 }
 0x7a9   : > { %v3517_v40 = vsel %vm2707_vm1, %v3512_v38, 0 }
 0x85a   : > { %v9698_v22 = vpop.f32.mrb[32].mxu1 }
 0x85b   : > { %v7835_v23 = vpop.f32.mrb[33].mxu1 }
 0x85c   : > { %v3199_v24 = vpop.f32.mrb[34].mxu1  ;;  %v6887_v23 = vld [vmem:[%s10499_s10] ss:$0 sm:$0xff] }
 0x85d   : > { %v7836_v25 = vpop.f32.mrb[35].mxu1  ;;  %v3208_v24 = vadd.f32 %v6887_v23, %v9698_v22 }
 0x86a   : > { %v3365_v27 = vpop.f32.mrb[36].mxu1 }
 0x86b   : > { %v3366_v28 = vadd.f32 %v6912_v26, %v3365_v27  ;;  %v7859_v29 = vpop.f32.mrb[37].mxu1 }
 0x86c   : > { %v3368_v31 = vpop.f32.mrb[38].mxu1 }
 0x86d   : > { %v3453_v32 = vpack.c.bf16 %v3366_v28, %v3366_v28  ;;  %v7860_v33 = vpop.f32.mrb[39].mxu1 }
 0x86f   : > { %v3458_v36 = vsel %vm3043_vm4, %v3453_v32, 0 }
 0x870   : > { %7874 = vmatpush3.bf16.xpose.msra.mxu1 %v3458_v36 }
 0x871   : > { %7879 = vmatprep.subr.bf16.mxu1 %v8776_v3 }
 0x877   : > { %7876 = vmatmul.mubr.msk.bf16.vlgmr.msra.gmra.mrb[40].mxu1 %vm3043_vm4, %v3452_v39 }
 0x878   : > { %7880 = vmatpush3.bf16.msra.mxu1 %v3517_v40  ;;  %7881 = vmatprep.mubr.msk.bf16.mxu1 %vm8777_vm0, %v8776_v3 }
 0x879   : > { %7891 = vmatprep.subr.bf16.mxu1 %v8776_v3 }
 0x94a   : > { %v3494_v43 = vpop.f32.mrb[40].mxu1 }
 0x94b   : > { %v3495_v44 = vadd.f32 %v3494_v43, %v9623_v42  ;;  %v7877_v45 = vpop.f32.mrb[41].mxu1 }
 0x94c   : > { %v3497_v46 = vpop.f32.mrb[42].mxu1 }
 0x94d   : > { %v7878_v47 = vpop.f32.mrb[43].mxu1  ;;  %v3500_v48 = vsel %vm3090_vm5, %v3495_v44, -inf }
 0x94e   : > { %3501 = vmax.xlane.f32.xlu0 %v3500_v48 }
 0x9db   : > { %v3502_v49 = vpop.xlane.xlu0 %3501 }
 0x9dc   : > { %v3503_v50 = vsub.f32 %v3495_v44, %v3502_v49 }
 0x9de   : > { %v3504_v51 = vmul.f32 1.442695, %v3503_v50 }
 0x9e0   : > { %8670 = vpow2.f32 %v3504_v51 }
 0x9ea   : > { %v8671_v52 = vpop.eup %8670 }
 0x9eb   : > { %v3506_v41 = vsel %vm3090_vm5, %v8671_v52, 0.0 }
 0x9ec   : > { %3507 = vadd.xlane.f32.xlu1 %v3506_v41 }
 0xa79   : > { %v3508_v54 = vpop.xlane.xlu1 %3507 }
 0xa7a   : > { %8672 = vrcp.f32 %v3508_v54 }
 0xa84   : > { %v8673_v56 = vpop.eup %8672 }
 0xa85   : > { %v3510_v57 = vmul.f32 %v8673_v56, %v8671_v52 }
 0xa87   : > { %v3511_v59 = vpack.c.bf16 %v3510_v57, %v3510_v57  ;;  %v8578_v57 = vld [vmem:[%s10498_s9 + $0x10] sm:$0xff]  }
 0xa89   : > { %7882 = vmatmul.mubr.msk.bf16.vlgmr.msra.gmra.mrb[44].mxu1 %vm3090_vm5, %v3511_v59 }
 0xa8a   : > { %7892 = vmatpush3.bf16.msra.mxu1 %v8557_v58  ;;  %7899 = vmatprep.mubr.msk.bf16.mxu1 %vm8777_vm0, %v8776_v3 }
 0xa8b   : > { %7893 = vmatprep.subr.bf16.mxu1 %v8776_v3 }
 0xa8e   : > { %7894 = vmatpush3.bf16.msra.mxu1 %v8558_v60 }
 0xa8f   : > { %7895 = vmatprep.subr.bf16.mxu1 %v8776_v3 }
 0xa92   : > { %7896 = vmatpush3.bf16.msra.mxu1 %v8559_v61  ;;  %v8570_v61 = vld [vmem:[%s10494_s5 + $0x60] sm:$0xff]  }
 0xa93   : > { %7897 = vmatprep.subr.bf16.mxu1 %v8776_v3 }
 0xa96   : > { %7898 = vmatpush3.bf16.msra.mxu1 %v8560_v62 }
 0xa97   : > { %7915 = vmatprep.subr.bf16.mxu1 %v8776_v3 }
 0xa99   : > { %7900 = vmatmul.mubr.msk.bf16.vlgmr.msra.gmra.mrb[48].mxu1 %vm2781_vm3, %v9577_v14 }
 0xa9a   : > { %7916 = vmatpush3.bf16.msra.mxu1 %v8561_v63  ;;  %7923 = vmatprep.mubr.msk.bf16.mxu1 %vm8777_vm0, %v8776_v3  ;;  %v8571_v63 = vld [vmem:[%s10494_s5 + $0x68] sm:$0xff]  }
 0xa9b   : > { %7917 = vmatprep.subr.bf16.mxu1 %v8776_v3 }
 0xa9e   : > { %7918 = vmatpush3.bf16.msra.mxu1 %v8562_v0  ;;  %v8572_v0 = vld [vmem:[%s10494_s5 + $0x70] sm:$0xff]  }
 0xa9f   : > { %7919 = vmatprep.subr.bf16.mxu1 %v8776_v3 }
 0xaa2   : > { %7920 = vmatpush3.bf16.msra.mxu1 %v8563_v1  ;;  %v8573_v1 = vld [vmem:[%s10494_s5 + $0x78] sm:$0xff]  }
 0xaa3   : > { %7921 = vmatprep.subr.bf16.mxu1 %v8776_v3 }
 0xaa6   : > { %7922 = vmatpush3.bf16.msra.mxu1 %v8564_v2  ;;  %v8574_v2 = vld [vmem:[%s10496_s7 + $0x60] sm:$0xff]  }
 0xaa7   : > { %7939 = vmatprep.subr.bf16.mxu1 %v8776_v3 }
 0xaa9   : > { %7924 = vmatmul.mubr.msk.bf16.vlgmr.msra.gmra.mrb[52].mxu1 %vm2781_vm3, %v9577_v14 }
 0xaaa   : > { %7941 = vmatprep.mubr.msk.bf16.mxu1 %vm8777_vm0, %v8776_v3  ;;  %7940 = vmatpush3.bf16.msra.mxu1 %v8578_v57 }
 0xaab   : > { %7957 = vmatprep.subr.bf16.mxu1 %v8776_v3 }
 0xb5c   : > { %v3553_v4 = vpop.f32.mrb[44].mxu1 }
 0xb5d   : > { %v3559_v6 = vpack.c.bf16 %v3553_v4, %v3553_v4  ;;  %v7883_v7 = vpop.f32.mrb[45].mxu1  ;;  %v8575_v4 = vld [vmem:[%s10496_s7 + $0x68] sm:$0xff]  }
 0xb5e   : > { %v3556_v8 = vpop.f32.mrb[46].mxu1 }
 0xb5f   : > { %v7884_v9 = vpop.f32.mrb[47].mxu1  ;;  %7888 = vmatmul.mubr.msk.bf16.vlgmr.msra.gmra.mrb[48].mxu0 %vm3043_vm4, %v3559_v6  ;;  %v8577_v6 = vld [vmem:[%s10496_s7 + $0x78] sm:$0xff]   ;;  %v8579_v8 = vld [vmem:[%s10495_s6 + $0x60] sm:$0xff]  }
 0xb60   : > { %7904 = vmatpush3.bf16.msra.mxu0 %v8566_v5  ;;  %7911 = vmatprep.mubr.msk.bf16.mxu0 %vm8777_vm0, %v8776_v3  ;;  %v8576_v5 = vld [vmem:[%s10496_s7 + $0x70] sm:$0xff]  }
 0xb61   : > { %7905 = vmatprep.subr.bf16.mxu0 %v8776_v3 }
 0xb64   : > { %7906 = vmatpush3.bf16.msra.mxu0 %v8567_v10 }
 0xb65   : > { %7907 = vmatprep.subr.bf16.mxu0 %v8776_v3 }
 0xb68   : > { %7908 = vmatpush3.bf16.msra.mxu0 %v8568_v11 }
 0xb69   : > { %7909 = vmatprep.subr.bf16.mxu0 %v8776_v3 }
 0xb6c   : > { %v3688_v13 = vpop.f32.mrb[48].mxu1  ;;  %7910 = vmatpush3.bf16.msra.mxu0 %v8569_v12 }
 0xb6d   : > { %v7901_v15 = vpop.f32.mrb[49].mxu1  ;;  %7927 = vmatprep.subr.bf16.mxu0 %v8776_v3  ;;  %v3689_v40 = vadd.f32 %v6948_v37, %v3688_v13  ;;  %v8580_v13 = vld [vmem:[%s10495_s6 + $0x68] sm:$0xff]  }
 0xb6e   : > { %v3691_v16 = vpop.f32.mrb[50].mxu1  ;;  %v8581_v15 = vld [vmem:[%s10495_s6 + $0x70] sm:$0xff]  }
 0xb6f   : > { %v7902_v17 = vpop.f32.mrb[51].mxu1  ;;  %7912 = vmatmul.mubr.msk.bf16.vlgmr.msra.gmra.mrb[52].mxu0 %vm2781_vm3, %v9577_v14  ;;  %v3856_v44 = vpack.c.bf16 %v3689_v40, %v3689_v40  ;;  %v8582_v16 = vld [vmem:[%s10495_s6 + $0x78] sm:$0xff]  }
 0xb70   : > { %7929 = vmatprep.mubr.msk.bf16.mxu0 %vm8777_vm0, %v8776_v3 }
 0xb7c   : > { %v3850_v18 = vpop.f32.mrb[52].mxu1 }
 0xb7d   : > { %v7925_v19 = vpop.f32.mrb[53].mxu1  ;;  %v3851_v38 = vadd.f32 %v6978_v34, %v3850_v18 }
 0xb7e   : > { %v3853_v20 = vpop.f32.mrb[54].mxu1 }
 0xb7f   : > { %v7926_v21 = vpop.f32.mrb[55].mxu1  ;;  %v3916_v43 = vpack.c.bf16 %v3851_v38, %v3851_v38 }
 0xb81   : > { %v3921_v45 = vsel %vm2707_vm1, %v3916_v43, 0 }
 0xc32   : > { %v3606_v25 = vpop.f32.mrb[48].mxu0 }
 0xc33   : > { %v9793_v26 = vadd.f32 %v3606_v25, %v3208_v24  ;;  %v7889_v27 = vpop.f32.mrb[49].mxu0 }
 0xc34   : > { %v3609_v28 = vpop.f32.mrb[50].mxu0 }
 0xc35   : > { %v7890_v29 = vpop.f32.mrb[51].mxu0 }
 0xc42   : > { %v3769_v31 = vpop.f32.mrb[52].mxu0 }
 0xc43   : > { %v3770_v32 = vadd.f32 %v6963_v30, %v3769_v31  ;;  %v7913_v33 = vpop.f32.mrb[53].mxu0 }
 0xc44   : > { %v3772_v35 = vpop.f32.mrb[54].mxu0 }
 0xc45   : > { %v3857_v36 = vpack.c.bf16 %v3770_v32, %v3770_v32  ;;  %v7914_v22 = vpop.f32.mrb[55].mxu0  ;;  %v7014_v32 = vld [vmem:[%s10497_s8 + $0x7] ss:$0 sm:$0xff]  ;;  %v7029_v35 = vld [vmem:[%s10497_s8 + $0xb] ss:$0 sm:$0xff] }
 0xc47   : > { %v3862_v39 = vsel %vm3043_vm4, %v3857_v36, 0 }
 0xc48   : > { %7928 = vmatpush3.bf16.xpose.msra.mxu0 %v3862_v39 }
 0xc49   : > { %7933 = vmatprep.subr.bf16.mxu0 %v8776_v3 }
 0xc4f   : > { %7930 = vmatmul.mubr.msk.bf16.vlgmr.msra.gmra.mrb[56].mxu0 %vm3043_vm4, %v3856_v44 }
 0xc50   : > { %7934 = vmatpush3.bf16.msra.mxu0 %v3921_v45  ;;  %7935 = vmatprep.mubr.msk.bf16.mxu0 %vm8777_vm0, %v8776_v3 }
 0xc51   : > { %7945 = vmatprep.subr.bf16.mxu0 %v8776_v3 }
 0xd22   : > { %v3898_v46 = vpop.f32.mrb[56].mxu0 }
 0xd23   : > { %v3899_v47 = vadd.f32 %v3898_v46, %v9623_v42  ;;  %v7931_v48 = vpop.f32.mrb[57].mxu0 }
 0xd24   : > { %v3901_v49 = vpop.f32.mrb[58].mxu0 }
 0xd25   : > { %v7932_v50 = vpop.f32.mrb[59].mxu0  ;;  %v3904_v51 = vsel %vm3090_vm5, %v3899_v47, -inf }
 0xd26   : > { %3905 = vmax.xlane.f32.xlu0 %v3904_v51 }
 0xdb3   : > { %v3906_v52 = vpop.xlane.xlu0 %3905 }
 0xdb4   : > { %v3907_v41 = vsub.f32 %v3899_v47, %v3906_v52 }
 0xdb6   : > { %v3908_v53 = vmul.f32 1.442695, %v3907_v41 }
 0xdb8   : > { %8674 = vpow2.f32 %v3908_v53 }
 0xdc2   : > { %v8675_v54 = vpop.eup %8674 }
 0xdc3   : > { %v3910_v56 = vsel %vm3090_vm5, %v8675_v54, 0.0 }
 0xdc4   : > { %3911 = vadd.xlane.f32.xlu1 %v3910_v56 }
 0xe51   : > { %v3912_v58 = vpop.xlane.xlu1 %3911 }
 0xe52   : > { %8676 = vrcp.f32 %v3912_v58 }
 0xe5c   : > { %v8677_v59 = vpop.eup %8676 }
 0xe5d   : > { %v3914_v60 = vmul.f32 %v8677_v59, %v8675_v54 }
 0xe5f   : > { %v3915_v62 = vpack.c.bf16 %v3914_v60, %v3914_v60 }
 0xe61   : > { %7936 = vmatmul.mubr.msk.bf16.vlgmr.msra.gmra.mrb[60].mxu0 %vm3090_vm5, %v3915_v62 }
 0xe62   : > { %7946 = vmatpush3.bf16.msra.mxu0 %v8570_v61  ;;  %7953 = vmatprep.mubr.msk.bf16.mxu0 %vm8777_vm0, %v8776_v3 }
 0xe63   : > { %7947 = vmatprep.subr.bf16.mxu0 %v8776_v3 }
 0xe66   : > { %7948 = vmatpush3.bf16.msra.mxu0 %v8571_v63 }
 0xe67   : > { %7949 = vmatprep.subr.bf16.mxu0 %v8776_v3 }
 0xe6a   : > { %7950 = vmatpush3.bf16.msra.mxu0 %v8572_v0 }
 0xe6b   : > { %7951 = vmatprep.subr.bf16.mxu0 %v8776_v3 }
 0xe6e   : > { %7952 = vmatpush3.bf16.msra.mxu0 %v8573_v1 }
 0xe6f   : > { %7969 = vmatprep.subr.bf16.mxu0 %v8776_v3 }
 0xe71   : > { %7954 = vmatmul.mubr.msk.bf16.vlgmr.msra.gmra.mrb[64].mxu0 %vm2781_vm3, %v9577_v14 }
 0xe72   : > { %7970 = vmatpush3.bf16.msra.mxu0 %v8574_v2  ;;  %7977 = vmatprep.mubr.msk.bf16.mxu0 %vm8777_vm0, %v8776_v3 }
 0xe73   : > { %7971 = vmatprep.subr.bf16.mxu0 %v8776_v3 }
 0xe76   : > { %7972 = vmatpush3.bf16.msra.mxu0 %v8575_v4 }
 0xe77   : > { %7973 = vmatprep.subr.bf16.mxu0 %v8776_v3 }
 0xe7a   : > { %7974 = vmatpush3.bf16.msra.mxu0 %v8576_v5 }
 0xe7b   : > { %7975 = vmatprep.subr.bf16.mxu0 %v8776_v3 }
 0xe7e   : > { %7976 = vmatpush3.bf16.msra.mxu0 %v8577_v6 }
 0xe7f   : > { %7993 = vmatprep.subr.bf16.mxu0 %v8776_v3 }
 0xe81   : > { %7978 = vmatmul.mubr.msk.bf16.vlgmr.msra.gmra.mrb[68].mxu0 %vm2781_vm3, %v9577_v14 }
 0xe82   : > { %7995 = vmatprep.mubr.msk.bf16.mxu0 %vm8777_vm0, %v8776_v3 }
 0xf34   : > { %v3957_v7 = vpop.f32.mrb[60].mxu0 }
 0xf35   : > { %v3963_v9 = vpack.c.bf16 %v3957_v7, %v3957_v7  ;;  %v7937_v10 = vpop.f32.mrb[61].mxu0 }
 0xf36   : > { %v3960_v11 = vpop.f32.mrb[62].mxu0 }
 0xf37   : > { %v7938_v12 = vpop.f32.mrb[63].mxu0  ;;  %7942 = vmatmul.mubr.msk.bf16.vlgmr.msra.gmra.mrb[56].mxu1 %vm3043_vm4, %v3963_v9 }
 0xf38   : > { %7958 = vmatpush3.bf16.msra.mxu1 %v8579_v8  ;;  %7965 = vmatprep.mubr.msk.bf16.mxu1 %vm8777_vm0, %v8776_v3 }
 0xf39   : > { %7959 = vmatprep.subr.bf16.mxu1 %v8776_v3 }
 0xf3c   : > { %7960 = vmatpush3.bf16.msra.mxu1 %v8580_v13 }
 0xf3d   : > { %7961 = vmatprep.subr.bf16.mxu1 %v8776_v3 }
 0xf40   : > { %7962 = vmatpush3.bf16.msra.mxu1 %v8581_v15 }
 0xf41   : > { %7963 = vmatprep.subr.bf16.mxu1 %v8776_v3 }
 0xf44   : > { %v4092_v17 = vpop.f32.mrb[64].mxu0  ;;  %7964 = vmatpush3.bf16.msra.mxu1 %v8582_v16  ;;  %v8584_v16 = vld [vmem:[%s10500_s11] sm:$0xff]  }
 0xf45   : > { %v7955_v18 = vpop.f32.mrb[65].mxu0  ;;  %7981 = vmatprep.subr.bf16.mxu1 %v8776_v3 }
 0xf46   : > { %v4095_v19 = vpop.f32.mrb[66].mxu0  ;;  %v8587_v18 = vld [vmem:[%s10500_s11 + $0x18] sm:$0xff]  }
 0xf47   : > { %v7956_v20 = vpop.f32.mrb[67].mxu0  ;;  %7966 = vmatmul.mubr.msk.bf16.vlgmr.msra.gmra.mrb[60].mxu1 %vm2781_vm3, %v9577_v14  ;;  %v8588_v19 = vld [vmem:[%s10502_s13] sm:$0xff]  }
 0xf48   : > { %7983 = vmatprep.mubr.msk.bf16.mxu1 %vm8777_vm0, %v8776_v3 }
 0xf54   : > { %v4254_v21 = vpop.f32.mrb[68].mxu0 }
 0xf55   : > { %v7979_v23 = vpop.f32.mrb[69].mxu0  ;;  %v4255_v38 = vadd.f32 %v7029_v35, %v4254_v21 }
 0xf56   : > { %v4257_v24 = vpop.f32.mrb[70].mxu0 }
 0xf57   : > { %v7980_v25 = vpop.f32.mrb[71].mxu0  ;;  %v4320_v43 = vpack.c.bf16 %v4255_v38, %v4255_v38 }
 0xf59   : > { %v4325_v45 = vsel %vm2707_vm1, %v4320_v43, 0 }
0x100a   : > { %v4010_v27 = vpop.f32.mrb[56].mxu1 }
0x100b   : > { %v4016_v28 = vadd.f32 %v4010_v27, %v9793_v26  ;;  %v7943_v29 = vpop.f32.mrb[57].mxu1  ;;  %v6999_v26 = vld [vmem:[%s10497_s8 + $0x3] ss:$0 sm:$0xff] }
0x100c   : > { %v4013_v30 = vpop.f32.mrb[58].mxu1  ;;  %v4093_v40 = vadd.f32 %v6999_v26, %v4092_v17  ;;  %v8586_v17 = vld [vmem:[%s10500_s11 + $0x10] sm:$0xff]  }
0x100d   : > { %v7944_v31 = vpop.f32.mrb[59].mxu1  ;;  %v8590_v29 = vld [vmem:[%s10502_s13 + $0x10] sm:$0xff]   ;;  %v8591_v30 = vld [vmem:[%s10502_s13 + $0x18] sm:$0xff]  }
0x100e   : > { %v4260_v44 = vpack.c.bf16 %v4093_v40, %v4093_v40  ;;  %v8592_v31 = vld [vmem:[%s10502_s13 + $0x20] sm:$0xff]  }
0x101a   : > { %v4173_v33 = vpop.f32.mrb[60].mxu1 }
0x101b   : > { %v4174_v34 = vadd.f32 %v7014_v32, %v4173_v33  ;;  %v7967_v14 = vpop.f32.mrb[61].mxu1  ;;  %v8593_v32 = vld [vmem:[%s10502_s13 + $0x28] sm:$0xff]   ;;  %v8594_v33 = vld [vmem:[%s10502_s13 + $0x30] sm:$0xff]  }
0x101c   : > { %v4176_v36 = vpop.f32.mrb[62].mxu1  ;;  %v7041_v14 = vld [vmem:[%s10501_s12] ss:$0 sm:$0xff] }
0x101d   : > { %v4261_v22 = vpack.c.bf16 %v4174_v34, %v4174_v34  ;;  %v7968_v37 = vpop.f32.mrb[63].mxu1  ;;  %v8595_v34 = vld [vmem:[%s10502_s13 + $0x38] sm:$0xff]  }
0x101f   : > { %v4266_v39 = vsel %vm3043_vm4, %v4261_v22, 0 }
0x1020   : > { %7982 = vmatpush3.bf16.xpose.msra.mxu1 %v4266_v39 }
0x1021   : > { %7987 = vmatprep.subr.bf16.mxu1 %v8776_v3 }
0x1027   : > { %7984 = vmatmul.mubr.msk.bf16.vlgmr.msra.gmra.mrb[64].mxu1 %vm3043_vm4, %v4260_v44 }
0x1028   : > { %7988 = vmatpush3.bf16.msra.mxu1 %v4325_v45  ;;  %7989 = vmatprep.mubr.msk.bf16.mxu1 %vm8777_vm0, %v8776_v3 }
0x1029   : > { %7999 = vmatprep.subr.bf16.mxu1 %v8776_v3 }
0x10fa   : > { %v4302_v46 = vpop.f32.mrb[64].mxu1 }
0x10fb   : > { %v4303_v47 = vadd.f32 %v4302_v46, %v9623_v42  ;;  %v7985_v48 = vpop.f32.mrb[65].mxu1  ;;  %v8583_v42 = vld [vmem:[%s10498_s9 + $0x18] sm:$0xff]  }
0x10fc   : > { %v4305_v49 = vpop.f32.mrb[66].mxu1  ;;  %7994 = vmatpush3.bf16.msra.mxu0 %v8583_v42 }
0x10fd   : > { %v7986_v50 = vpop.f32.mrb[67].mxu1  ;;  %v4308_v51 = vsel %vm3090_vm5, %v4303_v47, -inf  ;;  %8011 = vmatprep.subr.bf16.mxu0 %v8776_v3 }
0x10fe   : > { %4309 = vmax.xlane.f32.xlu0 %v4308_v51  ;;  %v7047_v50 = vld [vmem:[%s10503_s14] ss:$0 sm:$0xff] }
0x118b   : > { %v4310_v52 = vpop.xlane.xlu0 %4309 }
0x118c   : > { %v4311_v41 = vsub.f32 %v4303_v47, %v4310_v52 }
0x118e   : > { %v4312_v53 = vmul.f32 1.442695, %v4311_v41 }
0x1190   : > { %8678 = vpow2.f32 %v4312_v53 }
0x119a   : > { %v8679_v54 = vpop.eup %8678 }
0x119b   : > { %v4314_v56 = vsel %vm3090_vm5, %v8679_v54, 0.0 }
0x119c   : > { %4315 = vadd.xlane.f32.xlu1 %v4314_v56 }
0x1229   : > { %v4316_v57 = vpop.xlane.xlu1 %4315 }
0x122a   : > { %8680 = vrcp.f32 %v4316_v57 }
0x1234   : > { %v8681_v58 = vpop.eup %8680 }
0x1235   : > { %v4318_v59 = vmul.f32 %v8681_v58, %v8679_v54 }
0x1237   : > { %v4319_v60 = vpack.c.bf16 %v4318_v59, %v4318_v59 }
0x1239   : > { %7990 = vmatmul.mubr.msk.bf16.vlgmr.msra.gmra.mrb[68].mxu1 %vm3090_vm5, %v4319_v60 }
0x123a   : > { %8007 = vmatprep.mubr.msk.bf16.mxu1 %vm8777_vm0, %v8776_v3  ;;  %8000 = vmatpush3.bf16.msra.mxu1 %v8584_v16  ;;  %v8606_v16 = vld [vmem:[%s10495_s6 + $0x90] sm:$0xff]  }
0x123b   : > { %8001 = vmatprep.subr.bf16.mxu1 %v8776_v3 }
0x130c   : > { %v4361_v61 = vpop.f32.mrb[68].mxu1 }
0x130d   : > { %v4367_v62 = vpack.c.bf16 %v4361_v61, %v4361_v61  ;;  %v7991_v63 = vpop.f32.mrb[69].mxu1 }
0x130e   : > { %v4364_v0 = vpop.f32.mrb[70].mxu1  ;;  %v8597_v63 = vld [vmem:[%s10496_s7 + $0x80] sm:$0xff]  }
0x130f   : > { %v7992_v1 = vpop.f32.mrb[71].mxu1  ;;  %7996 = vmatmul.mubr.msk.bf16.vlgmr.msra.gmra.mrb[72].mxu0 %vm3043_vm4, %v4367_v62  ;;  %v8596_v62 = vld [vmem:[%s10494_s5 + $0x80] sm:$0xff]   ;;  %v8598_v0 = vld [vmem:[%s10494_s5 + $0x88] sm:$0xff]  }
0x1310   : > { %8027 = vmatprep.mubr.msk.bf16.mxu0 %vm8777_vm0, %v8776_v3  ;;  %8012 = vmatpush3.bf16.msra.mxu0 %v8588_v19  ;;  %v8599_v1 = vld [vmem:[%s10496_s7 + $0x88] sm:$0xff]  }
0x1311   : > { %8013 = vmatprep.subr.bf16.mxu0 %v8776_v3 }
0x13e2   : > { %v4414_v2 = vpop.f32.mrb[72].mxu0 }
0x13e3   : > { %v4420_v4 = vadd.f32 %v4414_v2, %v4016_v28  ;;  %v7997_v5 = vpop.f32.mrb[73].mxu0  ;;  %v8589_v28 = vld [vmem:[%s10502_s13 + $0x8] sm:$0xff]   ;;  %v8600_v2 = vld [vmem:[%s10494_s5 + $0x90] sm:$0xff]  }
0x13e4   : > { %v4417_v6 = vpop.f32.mrb[74].mxu0  ;;  %8014 = vmatpush3.bf16.msra.mxu0 %v8589_v28  ;;  %v8602_v5 = vld [vmem:[%s10494_s5 + $0x98] sm:$0xff]  }
0x13e5   : > { %v9915_v7 = vadd.f32 %v4420_v4, %v9536_v55  ;;  %v7998_v8 = vpop.f32.mrb[75].mxu0  ;;  %v8585_v55 = vld [vmem:[%s10500_s11 + $0x8] sm:$0xff]   ;;  %8015 = vmatprep.subr.bf16.mxu0 %v8776_v3  ;;  %v8601_v4 = vld [vmem:[%s10496_s7 + $0x90] sm:$0xff]   ;;  %v8603_v6 = vld [vmem:[%s10496_s7 + $0x98] sm:$0xff]  }
0x13e6   : > { %8002 = vmatpush3.bf16.msra.mxu1 %v8585_v55  ;;  %v8607_v55 = vld [vmem:[%s10495_s6 + $0x98] sm:$0xff]  }
0x13e7   : > { %v4422_v9 = vsel %vm2781_vm3, %v9915_v7, 0.0  ;;  %8003 = vmatprep.subr.bf16.mxu1 %v8776_v3 }
0x13e8   : > { %4423 = vadd.xlane.f32.xlu0 %v4422_v9  ;;  %8016 = vmatpush3.bf16.msra.mxu0 %v8590_v29 }
0x13e9   : > { %8017 = vmatprep.subr.bf16.mxu0 %v8776_v3 }
0x13ea   : > { %8004 = vmatpush3.bf16.msra.mxu1 %v8586_v17  ;;  %v7096_v17 = vld [vmem:[%s10497_s8 + $0x14] ss:$0 sm:$0xff] }
0x13eb   : > { %8005 = vmatprep.subr.bf16.mxu1 %v8776_v3 }
0x13ec   : > { %8018 = vmatpush3.bf16.msra.mxu0 %v8591_v30 }
0x13ed   : > { %8019 = vmatprep.subr.bf16.mxu0 %v8776_v3 }
0x13ee   : > { %8006 = vmatpush3.bf16.msra.mxu1 %v8587_v18 }
0x13ef   : > { %8031 = vmatprep.subr.bf16.mxu1 %v8776_v3 }
0x13f0   : > { %8020 = vmatpush3.bf16.msra.mxu0 %v8592_v31  ;;  %v7081_v31 = vld [vmem:[%s10497_s8 + $0x10] ss:$0 sm:$0xff] }
0x13f1   : > { %8021 = vmatprep.subr.bf16.mxu0 %v8776_v3 }
0x13f4   : > { %8022 = vmatpush3.bf16.msra.mxu0 %v8593_v32 }
0x13f5   : > { %8023 = vmatprep.subr.bf16.mxu0 %v8776_v3 }
0x13f8   : > { %8024 = vmatpush3.bf16.msra.mxu0 %v8594_v33 }
0x13f9   : > { %8025 = vmatprep.subr.bf16.mxu0 %v8776_v3 }
0x13fc   : > { %8026 = vmatpush3.bf16.msra.mxu0 %v8595_v34 }
0x13fd   : > { %8055 = vmatprep.subr.bf16.mxu0 %v8776_v3 }
0x1475   : > { %v4424_v10 = vpop.xlane.xlu0 %4423 }
0x1476   : > { %v4425_v11 = vmul.f32 0.015625, %v4424_v10 }
0x1478   : > { %v4426_v12 = vsub.f32 %v9915_v7, %v4425_v11 }
0x147a   : > { %v4427_v13 = vmul.f32 %v4426_v12, %v4426_v12 }
0x147c   : > { %v4428_v15 = vsel %vm2781_vm3, %v4427_v13, 0.0 }
0x147d   : > { %4429 = vadd.xlane.f32.xlu1 %v4428_v15  ;;  %v8605_v15 = vld [vmem:[%s10495_s6 + $0x88] sm:$0xff]  }
0x150a   : > { %v4430_v20 = vpop.xlane.xlu1 %4429 }
0x150b   : > { %v4431_v21 = vmul.f32 0.015625, %v4430_v20 }
0x150d   : > { %v4432_v23 = vadd.f32 1e-06, %v4431_v21 }
0x150f   : > { %8682 = vrsqrt.f32 %v4432_v23 }
0x1519   : > { %v8683_v24 = vpop.eup %8682 }
0x151a   : > { %v4434_v25 = vmul.f32 %v8683_v24, %v4426_v12  ;;  %v8604_v12 = vld [vmem:[%s10495_s6 + $0x80] sm:$0xff]  }
0x151c   : > { %v4435_v27 = vpack.c.bf16 %v4434_v25, %v4434_v25 }
0x151e   : > { %8008 = vmatmul.mubr.msk.bf16.vlgmr.msra.gmra.mrb[72].mxu1 %vm2781_vm3, %v4435_v27 }
0x151f   : > { %8039 = vmatprep.mubr.msk.bf16.mxu1 %vm8777_vm0, %v8776_v3  ;;  %8032 = vmatpush3.bf16.msra.mxu1 %v8596_v62  ;;  %v8612_v62 = vld [vmem:[%s10496_s7 + $0xa0] sm:$0xff]  }
0x1520   : > { %8033 = vmatprep.subr.bf16.mxu1 %v8776_v3 }
0x1523   : > { %8034 = vmatpush3.bf16.msra.mxu1 %v8598_v0  ;;  %v8614_v0 = vld [vmem:[%s10496_s7 + $0xb0] sm:$0xff]  }
0x1524   : > { %8035 = vmatprep.subr.bf16.mxu1 %v8776_v3 }
0x1527   : > { %8036 = vmatpush3.bf16.msra.mxu1 %v8600_v2 }
0x1528   : > { %8037 = vmatprep.subr.bf16.mxu1 %v8776_v3 }
0x152b   : > { %8038 = vmatpush3.bf16.msra.mxu1 %v8602_v5 }
0x152c   : > { %8043 = vmatprep.subr.bf16.mxu1 %v8776_v3 }
0x15f1   : > { %v4512_v35 = vpop.f32.mrb[72].mxu1 }
0x15f2   : > { %v4513_v36 = vadd.f32 %v7041_v14, %v4512_v35  ;;  %v8009_v22 = vpop.f32.mrb[73].mxu1 }
0x15f3   : > { %v4515_v37 = vpop.f32.mrb[74].mxu1  ;;  %v7066_v22 = vld [vmem:[%s10497_s8 + $0xc] ss:$0 sm:$0xff] }
0x15f4   : > { %v4519_v26 = vmul.f32 0.044715, %v4513_v36  ;;  %v8010_v38 = vpop.f32.mrb[75].mxu1  ;;  %v4518_v46 = vmul.f32 0.5, %v4513_v36 }
0x15f6   : > { %v4520_v39 = vmul.f32 %v4519_v26, %v4513_v36 }
0x15f8   : > { %v4521_v40 = vmul.f32 %v4520_v39, %v4513_v36 }
0x15fa   : > { %v4522_v43 = vadd.f32 %v4521_v40, %v4513_v36  ;;  %v10068_v40 = vld [vmem:[%s10492_s3] sm:$0xff] }
0x15fc   : > { %v4523_v44 = vmul.f32 0.7978846, %v4522_v43 }
0x15fe   : > { %8684 = vtanh.f32 %v4523_v44 }
0x1608   : > { %v8685_v45 = vpop.eup %8684 }
0x1609   : > { %v4525_v47 = vadd.f32 1.0, %v8685_v45 }
0x160b   : > { %v4526_v48 = vmul.f32 %v4525_v47, %v4518_v46 }
0x160d   : > { %v4527_v49 = vpack.c.bf16 %v4526_v48, %v4526_v48 }
0x160f   : > { %8028 = vmatmul.mubr.bf16.vlgmr.msra.gmra.mrb[76].mxu0 %v4527_v49 }
0x1610   : > { %8063 = vmatprep.mubr.msk.bf16.mxu0 %vm8777_vm0, %v8776_v3  ;;  %8056 = vmatpush3.bf16.msra.mxu0 %v8597_v63  ;;  %v8613_v63 = vld [vmem:[%s10496_s7 + $0xa8] sm:$0xff]  }
0x1611   : > { %8057 = vmatprep.subr.bf16.mxu0 %v8776_v3 }
0x1614   : > { %8058 = vmatpush3.bf16.msra.mxu0 %v8599_v1  ;;  %v8615_v1 = vld [vmem:[%s10496_s7 + $0xb8] sm:$0xff]  }
0x1615   : > { %8059 = vmatprep.subr.bf16.mxu0 %v8776_v3 }
0x1618   : > { %8060 = vmatpush3.bf16.msra.mxu0 %v8601_v4  ;;  %v8617_v4 = vld [vmem:[%s10495_s6 + $0xa0] sm:$0xff]  }
0x1619   : > { %8061 = vmatprep.subr.bf16.mxu0 %v8776_v3 }
0x161c   : > { %8062 = vmatpush3.bf16.msra.mxu0 %v8603_v6 }
0x161d   : > { %8073 = vmatprep.subr.bf16.mxu0 %v8776_v3 }
0x16e2   : > { %v4633_v51 = vpop.f32.mrb[76].mxu0 }
0x16e3   : > { %v4634_v52 = vadd.f32 %v7047_v50, %v4633_v51  ;;  %v8029_v41 = vpop.f32.mrb[77].mxu0 }
0x16e4   : > { %v4636_v53 = vpop.f32.mrb[78].mxu0  ;;  %v8616_v41 = vld [vmem:[%s10498_s9 + $0x20] sm:$0xff]  }
0x16e5   : > { %v9981_v54 = vadd.f32 %v4634_v52, %v9915_v7  ;;  %v8030_v56 = vpop.f32.mrb[79].mxu0 }
0x16e7   : > { %v4640_v57 = vsel %vm2781_vm3, %v9981_v54, 0.0 }
0x16e8   : > { %4641 = vadd.xlane.f32.xlu0 %v4640_v57 }
0x1775   : > { %v4642_v58 = vpop.xlane.xlu0 %4641 }
0x1776   : > { %v4643_v59 = vmul.f32 0.015625, %v4642_v58  ;;  %v8608_v58 = vld [vmem:[%s10494_s5 + $0xa0] sm:$0xff]  }
0x1778   : > { %v4644_v60 = vsub.f32 %v9981_v54, %v4643_v59 }
0x177a   : > { %v4645_v42 = vmul.f32 %v4644_v60, %v4644_v60 }
0x177c   : > { %v4646_v61 = vsel %vm2781_vm3, %v4645_v42, 0.0  ;;  %v8610_v42 = vld [vmem:[%s10494_s5 + $0xb0] sm:$0xff]  }
0x177d   : > { %4647 = vadd.xlane.f32.xlu1 %v4646_v61  ;;  %v8611_v61 = vld [vmem:[%s10494_s5 + $0xb8] sm:$0xff]  }
0x180a   : > { %v4648_v7 = vpop.xlane.xlu1 %4647 }
0x180b   : > { %v4649_v8 = vmul.f32 0.015625, %v4648_v7 }
0x180d   : > { %v4650_v9 = vadd.f32 1e-06, %v4649_v8 }
0x180f   : > { %8686 = vrsqrt.f32 %v4650_v9  ;;  %v8618_v9 = vld [vmem:[%s10495_s6 + $0xa8] sm:$0xff]  }
0x1819   : > { %v8687_v10 = vpop.eup %8686 }
0x181a   : > { %v4652_v11 = vmul.f32 %v8687_v10, %v4644_v60  ;;  %v8609_v60 = vld [vmem:[%s10494_s5 + $0xa8] sm:$0xff]   ;;  %v8619_v10 = vld [vmem:[%s10495_s6 + $0xb0] sm:$0xff]  }
0x181c   : > { %v10022_v13 = vpack.c.bf16 %v4652_v11, %v4652_v11  ;;  %v8620_v11 = vld [vmem:[%s10495_s6 + $0xb8] sm:$0xff]  }
0x181e   : > { %8040 = vmatmul.mubr.msk.bf16.vlgmr.msra.gmra.mrb[76].mxu1 %vm2781_vm3, %v10022_v13  ;;  %8064 = vmatmul.mubr.msk.bf16.vlgmr.msra.gmra.mrb[80].mxu0 %vm2781_vm3, %v10022_v13 }
0x181f   : > { %8044 = vmatpush3.bf16.msra.mxu1 %v8604_v12  ;;  %8051 = vmatprep.mubr.msk.bf16.mxu1 %vm8777_vm0, %v8776_v3 }
0x1820   : > { %8045 = vmatprep.subr.bf16.mxu1 %v8776_v3  ;;  %8075 = vmatprep.mubr.msk.bf16.mxu0 %vm8777_vm0, %v8776_v3 }
0x1823   : > { %8046 = vmatpush3.bf16.msra.mxu1 %v8605_v15 }
0x1824   : > { %8047 = vmatprep.subr.bf16.mxu1 %v8776_v3 }
0x1827   : > { %8048 = vmatpush3.bf16.msra.mxu1 %v8606_v16 }
0x1828   : > { %8049 = vmatprep.subr.bf16.mxu1 %v8776_v3 }
0x182b   : > { %8050 = vmatpush3.bf16.msra.mxu1 %v8607_v55 }
0x182c   : > { %8067 = vmatprep.subr.bf16.mxu1 %v8776_v3 }
0x182e   : > { %8052 = vmatmul.mubr.msk.bf16.vlgmr.msra.gmra.mrb[80].mxu1 %vm2781_vm3, %v10022_v13 }
0x182f   : > { %8069 = vmatprep.mubr.msk.bf16.mxu1 %vm8777_vm0, %v8776_v3 }
0x18f1   : > { %v4734_v18 = vpop.f32.mrb[76].mxu1  ;;  %v4896_v19 = vpop.f32.mrb[80].mxu0 }
0x18f2   : > { %v4897_v20 = vadd.f32 %v7096_v17, %v4896_v19  ;;  %v8041_v21 = vpop.f32.mrb[77].mxu1  ;;  %v8065_v23 = vpop.f32.mrb[81].mxu0  ;;  %v4735_v26 = vadd.f32 %v7066_v22, %v4734_v18 }
0x18f3   : > { %v4737_v24 = vpop.f32.mrb[78].mxu1  ;;  %v4899_v25 = vpop.f32.mrb[82].mxu0 }
0x18f4   : > { %v4962_v27 = vpack.c.bf16 %v4897_v20, %v4897_v20  ;;  %v8042_v28 = vpop.f32.mrb[79].mxu1  ;;  %v8066_v29 = vpop.f32.mrb[83].mxu0  ;;  %v4902_v38 = vpack.c.bf16 %v4735_v26, %v4735_v26 }
0x18f6   : > { %v4967_v30 = vsel %vm2707_vm1, %v4962_v27, 0  ;;  %v7133_v27 = vld [vmem:[%s10497_s8 + $0x11] ss:$0 sm:$0xff] }
0x18f7   : > { %8074 = vmatpush3.bf16.msra.mxu0 %v4967_v30 }
0x18f8   : > { %8085 = vmatprep.subr.bf16.mxu0 %v8776_v3 }
0x1901   : > { %v4815_v32 = vpop.f32.mrb[80].mxu1 }
0x1902   : > { %v4816_v33 = vadd.f32 %v7081_v31, %v4815_v32  ;;  %v8053_v34 = vpop.f32.mrb[81].mxu1  ;;  %v7148_v31 = vld [vmem:[%s10497_s8 + $0x15] ss:$0 sm:$0xff] }
0x1903   : > { %v4818_v14 = vpop.f32.mrb[82].mxu1 }
0x1904   : > { %v4903_v35 = vpack.c.bf16 %v4816_v33, %v4816_v33  ;;  %v8054_v36 = vpop.f32.mrb[83].mxu1  ;;  %v7118_v14 = vld [vmem:[%s10497_s8 + $0xd] ss:$0 sm:$0xff] }
0x1906   : > { %v4908_v37 = vsel %vm3043_vm4, %v4903_v35, 0 }
0x1907   : > { %8068 = vmatpush3.bf16.xpose.msra.mxu1 %v4908_v37 }
0x1908   : > { %8079 = vmatprep.subr.bf16.mxu1 %v8776_v3 }
0x190e   : > { %8070 = vmatmul.mubr.msk.bf16.vlgmr.msra.gmra.mrb[84].mxu1 %vm3043_vm4, %v4902_v38 }
0x190f   : > { %8081 = vmatprep.mubr.msk.bf16.mxu1 %vm8777_vm0, %v8776_v3  ;;  %8080 = vmatpush3.bf16.msra.mxu1 %v8616_v41  ;;  %v8629_v41 = vld [vmem:[%s10498_s9 + $0x28] sm:$0xff]  }
0x1910   : > { %8097 = vmatprep.subr.bf16.mxu1 %v8776_v3 }
0x19e1   : > { %v4944_v39 = vpop.f32.mrb[84].mxu1 }
0x19e2   : > { %v4945_v43 = vadd.f32 %v10068_v40, %v4944_v39  ;;  %v8071_v44 = vpop.f32.mrb[85].mxu1 }
0x19e3   : > { %v4947_v45 = vpop.f32.mrb[86].mxu1 }
0x19e4   : > { %v8072_v46 = vpop.f32.mrb[87].mxu1  ;;  %v4950_v47 = vsel %vm3090_vm5, %v4945_v43, -inf }
0x19e5   : > { %4951 = vmax.xlane.f32.xlu0 %v4950_v47 }
0x1a72   : > { %v4952_v48 = vpop.xlane.xlu0 %4951 }
0x1a73   : > { %v4953_v49 = vsub.f32 %v4945_v43, %v4952_v48 }
0x1a75   : > { %v4954_v50 = vmul.f32 1.442695, %v4953_v49 }
0x1a77   : > { %8688 = vpow2.f32 %v4954_v50 }
0x1a81   : > { %v8689_v51 = vpop.eup %8688 }
0x1a82   : > { %v4956_v52 = vsel %vm3090_vm5, %v8689_v51, 0.0 }
0x1a83   : > { %4957 = vadd.xlane.f32.xlu1 %v4956_v52 }
0x1b10   : > { %v4958_v53 = vpop.xlane.xlu1 %4957 }
0x1b11   : > { %8690 = vrcp.f32 %v4958_v53 }
0x1b1b   : > { %v8691_v56 = vpop.eup %8690 }
0x1b1c   : > { %v4960_v57 = vmul.f32 %v8691_v56, %v8689_v51 }
0x1b1e   : > { %v4961_v59 = vpack.c.bf16 %v4960_v57, %v4960_v57 }
0x1b20   : > { %8076 = vmatmul.mubr.msk.bf16.vlgmr.msra.gmra.mrb[84].mxu0 %vm3090_vm5, %v4961_v59 }
0x1b21   : > { %8086 = vmatpush3.bf16.msra.mxu0 %v8608_v58  ;;  %8093 = vmatprep.mubr.msk.bf16.mxu0 %vm8777_vm0, %v8776_v3  ;;  %v8621_v58 = vld [vmem:[%s10494_s5 + $0xc0] sm:$0xff]  }
0x1b22   : > { %8087 = vmatprep.subr.bf16.mxu0 %v8776_v3 }
0x1b25   : > { %8088 = vmatpush3.bf16.msra.mxu0 %v8609_v60  ;;  %v8622_v60 = vld [vmem:[%s10494_s5 + $0xc8] sm:$0xff]  }
0x1b26   : > { %8089 = vmatprep.subr.bf16.mxu0 %v8776_v3 }
0x1b29   : > { %8090 = vmatpush3.bf16.msra.mxu0 %v8610_v42  ;;  %v8623_v42 = vld [vmem:[%s10494_s5 + $0xd0] sm:$0xff]  }
0x1b2a   : > { %8091 = vmatprep.subr.bf16.mxu0 %v8776_v3 }
0x1b2d   : > { %8092 = vmatpush3.bf16.msra.mxu0 %v8611_v61  ;;  %v8624_v61 = vld [vmem:[%s10494_s5 + $0xd8] sm:$0xff]  }
0x1b2e   : > { %8109 = vmatprep.subr.bf16.mxu0 %v8776_v3 }
0x1b30   : > { %8094 = vmatmul.mubr.msk.bf16.vlgmr.msra.gmra.mrb[88].mxu0 %vm2781_vm3, %v10022_v13 }
0x1b31   : > { %8110 = vmatpush3.bf16.msra.mxu0 %v8612_v62  ;;  %8117 = vmatprep.mubr.msk.bf16.mxu0 %vm8777_vm0, %v8776_v3  ;;  %v8625_v62 = vld [vmem:[%s10496_s7 + $0xc0] sm:$0xff]  }
0x1b32   : > { %8111 = vmatprep.subr.bf16.mxu0 %v8776_v3 }
0x1b35   : > { %8112 = vmatpush3.bf16.msra.mxu0 %v8613_v63  ;;  %v8626_v63 = vld [vmem:[%s10496_s7 + $0xc8] sm:$0xff]  }
0x1b36   : > { %8113 = vmatprep.subr.bf16.mxu0 %v8776_v3 }
0x1b39   : > { %8114 = vmatpush3.bf16.msra.mxu0 %v8614_v0  ;;  %v8627_v0 = vld [vmem:[%s10496_s7 + $0xd0] sm:$0xff]  }
0x1b3a   : > { %8115 = vmatprep.subr.bf16.mxu0 %v8776_v3 }
0x1b3d   : > { %8116 = vmatpush3.bf16.msra.mxu0 %v8615_v1  ;;  %v8628_v1 = vld [vmem:[%s10496_s7 + $0xd8] sm:$0xff]  }
0x1b3e   : > { %8133 = vmatprep.subr.bf16.mxu0 %v8776_v3 }
0x1b40   : > { %8118 = vmatmul.mubr.msk.bf16.vlgmr.msra.gmra.mrb[92].mxu0 %vm2781_vm3, %v10022_v13 }
0x1b41   : > { %8135 = vmatprep.mubr.msk.bf16.mxu0 %vm8777_vm0, %v8776_v3  ;;  %8134 = vmatpush3.bf16.msra.mxu0 %v8629_v41 }
0x1b42   : > { %8151 = vmatprep.subr.bf16.mxu0 %v8776_v3 }
0x1bf3   : > { %v5003_v2 = vpop.f32.mrb[84].mxu0 }
0x1bf4   : > { %v5009_v5 = vpack.c.bf16 %v5003_v2, %v5003_v2  ;;  %v8077_v6 = vpop.f32.mrb[85].mxu0 }
0x1bf5   : > { %v5006_v7 = vpop.f32.mrb[86].mxu0 }
0x1bf6   : > { %v8078_v8 = vpop.f32.mrb[87].mxu0  ;;  %8082 = vmatmul.mubr.msk.bf16.vlgmr.msra.gmra.mrb[88].mxu1 %vm3043_vm4, %v5009_v5 }
0x1bf7   : > { %8098 = vmatpush3.bf16.msra.mxu1 %v8617_v4  ;;  %8105 = vmatprep.mubr.msk.bf16.mxu1 %vm8777_vm0, %v8776_v3  ;;  %v8630_v4 = vld [vmem:[%s10495_s6 + $0xc0] sm:$0xff]  }
0x1bf8   : > { %8099 = vmatprep.subr.bf16.mxu1 %v8776_v3 }
0x1bfb   : > { %8100 = vmatpush3.bf16.msra.mxu1 %v8618_v9  ;;  %v8631_v9 = vld [vmem:[%s10495_s6 + $0xc8] sm:$0xff]  }
0x1bfc   : > { %8101 = vmatprep.subr.bf16.mxu1 %v8776_v3 }
0x1bff   : > { %8102 = vmatpush3.bf16.msra.mxu1 %v8619_v10  ;;  %v8632_v10 = vld [vmem:[%s10495_s6 + $0xd0] sm:$0xff]  }
0x1c00   : > { %8103 = vmatprep.subr.bf16.mxu1 %v8776_v3 }
0x1c03   : > { %v5144_v12 = vpop.f32.mrb[88].mxu0  ;;  %8104 = vmatpush3.bf16.msra.mxu1 %v8620_v11  ;;  %v8633_v11 = vld [vmem:[%s10495_s6 + $0xd8] sm:$0xff]  }
0x1c04   : > { %v8095_v15 = vpop.f32.mrb[89].mxu0  ;;  %8121 = vmatprep.subr.bf16.mxu1 %v8776_v3  ;;  %v5145_v22 = vadd.f32 %v7118_v14, %v5144_v12  ;;  %v7199_v14 = vld [vmem:[%s10497_s8 + $0x16] ss:$0 sm:$0xff] }
0x1c05   : > { %v5147_v16 = vpop.f32.mrb[90].mxu0 }
0x1c06   : > { %v8096_v55 = vpop.f32.mrb[91].mxu0  ;;  %8106 = vmatmul.mubr.msk.bf16.vlgmr.msra.gmra.mrb[92].mxu1 %vm2781_vm3, %v10022_v13  ;;  %v5312_v26 = vpack.c.bf16 %v5145_v22, %v5145_v22  ;;  %v7169_v22 = vld [vmem:[%s10497_s8 + $0xe] ss:$0 sm:$0xff] }
0x1c07   : > { %8123 = vmatprep.mubr.msk.bf16.mxu1 %vm8777_vm0, %v8776_v3 }
0x1c13   : > { %v5306_v17 = vpop.f32.mrb[92].mxu0 }
0x1c14   : > { %v8119_v18 = vpop.f32.mrb[93].mxu0  ;;  %v5307_v35 = vadd.f32 %v7148_v31, %v5306_v17  ;;  %v7184_v31 = vld [vmem:[%s10497_s8 + $0x12] ss:$0 sm:$0xff] }
0x1c15   : > { %v5309_v19 = vpop.f32.mrb[94].mxu0 }
0x1c16   : > { %v8120_v20 = vpop.f32.mrb[95].mxu0  ;;  %v5372_v37 = vpack.c.bf16 %v5307_v35, %v5307_v35 }
0x1c18   : > { %v5377_v38 = vsel %vm2707_vm1, %v5372_v37, 0 }
0x1cc9   : > { %v10143_v21 = vpop.f32.mrb[88].mxu1 }
0x1cca   : > { %v8083_v23 = vpop.f32.mrb[89].mxu1 }
0x1ccb   : > { %v5059_v24 = vpop.f32.mrb[90].mxu1  ;;  %v7108_v23 = vld [vmem:[%s10499_s10 + $0x1] ss:$0 sm:$0xff] }
0x1ccc   : > { %v8084_v25 = vpop.f32.mrb[91].mxu1  ;;  %v5068_v24 = vadd.f32 %v7108_v23, %v10143_v21 }
0x1cd9   : > { %v5225_v28 = vpop.f32.mrb[92].mxu1 }
0x1cda   : > { %v5226_v29 = vadd.f32 %v7133_v27, %v5225_v28  ;;  %v8107_v30 = vpop.f32.mrb[93].mxu1 }
0x1cdb   : > { %v5228_v32 = vpop.f32.mrb[94].mxu1 }
0x1cdc   : > { %v5313_v33 = vpack.c.bf16 %v5226_v29, %v5226_v29  ;;  %v8108_v34 = vpop.f32.mrb[95].mxu1 }
0x1cde   : > { %v5318_v36 = vsel %vm3043_vm4, %v5313_v33, 0 }
0x1cdf   : > { %8122 = vmatpush3.bf16.xpose.msra.mxu1 %v5318_v36 }
0x1ce0   : > { %8127 = vmatprep.subr.bf16.mxu1 %v8776_v3 }
0x1ce6   : > { %8124 = vmatmul.mubr.msk.bf16.vlgmr.msra.gmra.mrb[96].mxu1 %vm3043_vm4, %v5312_v26 }
0x1ce7   : > { %8128 = vmatpush3.bf16.msra.mxu1 %v5377_v38  ;;  %8129 = vmatprep.mubr.msk.bf16.mxu1 %vm8777_vm0, %v8776_v3 }
0x1ce8   : > { %8139 = vmatprep.subr.bf16.mxu1 %v8776_v3 }
0x1db9   : > { %v5354_v39 = vpop.f32.mrb[96].mxu1 }
0x1dba   : > { %v5355_v43 = vadd.f32 %v10068_v40, %v5354_v39  ;;  %v8125_v44 = vpop.f32.mrb[97].mxu1 }
0x1dbb   : > { %v5357_v45 = vpop.f32.mrb[98].mxu1 }
0x1dbc   : > { %v8126_v46 = vpop.f32.mrb[99].mxu1  ;;  %v5360_v47 = vsel %vm3090_vm5, %v5355_v43, -inf }
0x1dbd   : > { %5361 = vmax.xlane.f32.xlu0 %v5360_v47 }
0x1e4a   : > { %v5362_v48 = vpop.xlane.xlu0 %5361 }
0x1e4b   : > { %v5363_v49 = vsub.f32 %v5355_v43, %v5362_v48 }
0x1e4d   : > { %v5364_v50 = vmul.f32 1.442695, %v5363_v49 }
0x1e4f   : > { %8692 = vpow2.f32 %v5364_v50 }
0x1e59   : > { %v8693_v51 = vpop.eup %8692 }
0x1e5a   : > { %v5366_v52 = vsel %vm3090_vm5, %v8693_v51, 0.0 }
0x1e5b   : > { %5367 = vadd.xlane.f32.xlu1 %v5366_v52 }
0x1ee8   : > { %v5368_v53 = vpop.xlane.xlu1 %5367 }
0x1ee9   : > { %8694 = vrcp.f32 %v5368_v53 }
0x1ef3   : > { %v8695_v56 = vpop.eup %8694 }
0x1ef4   : > { %v5370_v57 = vmul.f32 %v8695_v56, %v8693_v51 }
0x1ef6   : > { %v5371_v59 = vpack.c.bf16 %v5370_v57, %v5370_v57  ;;  %v8642_v57 = vld [vmem:[%s10498_s9 + $0x30] sm:$0xff]  }
0x1ef8   : > { %8130 = vmatmul.mubr.msk.bf16.vlgmr.msra.gmra.mrb[100].mxu1 %vm3090_vm5, %v5371_v59 }
0x1ef9   : > { %8140 = vmatpush3.bf16.msra.mxu1 %v8621_v58  ;;  %8147 = vmatprep.mubr.msk.bf16.mxu1 %vm8777_vm0, %v8776_v3 }
0x1efa   : > { %8141 = vmatprep.subr.bf16.mxu1 %v8776_v3 }
0x1efd   : > { %8142 = vmatpush3.bf16.msra.mxu1 %v8622_v60 }
0x1efe   : > { %8143 = vmatprep.subr.bf16.mxu1 %v8776_v3 }
0x1f01   : > { %8144 = vmatpush3.bf16.msra.mxu1 %v8623_v42  ;;  %v8634_v42 = vld [vmem:[%s10494_s5 + $0xe0] sm:$0xff]  }
0x1f02   : > { %8145 = vmatprep.subr.bf16.mxu1 %v8776_v3 }
0x1f05   : > { %8146 = vmatpush3.bf16.msra.mxu1 %v8624_v61 }
0x1f06   : > { %8163 = vmatprep.subr.bf16.mxu1 %v8776_v3 }
0x1f08   : > { %8148 = vmatmul.mubr.msk.bf16.vlgmr.msra.gmra.mrb[104].mxu1 %vm2781_vm3, %v10022_v13 }
0x1f09   : > { %8164 = vmatpush3.bf16.msra.mxu1 %v8625_v62  ;;  %8171 = vmatprep.mubr.msk.bf16.mxu1 %vm8777_vm0, %v8776_v3  ;;  %v8635_v62 = vld [vmem:[%s10494_s5 + $0xe8] sm:$0xff]  }
0x1f0a   : > { %8165 = vmatprep.subr.bf16.mxu1 %v8776_v3 }
0x1f0d   : > { %8166 = vmatpush3.bf16.msra.mxu1 %v8626_v63  ;;  %v8636_v63 = vld [vmem:[%s10494_s5 + $0xf0] sm:$0xff]  }
0x1f0e   : > { %8167 = vmatprep.subr.bf16.mxu1 %v8776_v3 }
0x1f11   : > { %8168 = vmatpush3.bf16.msra.mxu1 %v8627_v0  ;;  %v8637_v0 = vld [vmem:[%s10494_s5 + $0xf8] sm:$0xff]  }
0x1f12   : > { %8169 = vmatprep.subr.bf16.mxu1 %v8776_v3 }
0x1f15   : > { %8170 = vmatpush3.bf16.msra.mxu1 %v8628_v1  ;;  %v8638_v1 = vld [vmem:[%s10496_s7 + $0xe0] sm:$0xff]  }
0x1f16   : > { %8187 = vmatprep.subr.bf16.mxu1 %v8776_v3 }
0x1f18   : > { %8172 = vmatmul.mubr.msk.bf16.vlgmr.msra.gmra.mrb[108].mxu1 %vm2781_vm3, %v10022_v13 }
0x1f19   : > { %8189 = vmatprep.mubr.msk.bf16.mxu1 %vm8777_vm0, %v8776_v3  ;;  %8188 = vmatpush3.bf16.msra.mxu1 %v8642_v57 }
0x1f1a   : > { %8205 = vmatprep.subr.bf16.mxu1 %v8776_v3 }
0x1fcb   : > { %v5413_v2 = vpop.f32.mrb[100].mxu1 }
0x1fcc   : > { %v5419_v5 = vpack.c.bf16 %v5413_v2, %v5413_v2  ;;  %v8131_v6 = vpop.f32.mrb[101].mxu1  ;;  %v8639_v2 = vld [vmem:[%s10496_s7 + $0xe8] sm:$0xff]  }
0x1fcd   : > { %v5416_v7 = vpop.f32.mrb[102].mxu1 }
0x1fce   : > { %v8132_v8 = vpop.f32.mrb[103].mxu1  ;;  %8136 = vmatmul.mubr.msk.bf16.vlgmr.msra.gmra.mrb[96].mxu0 %vm3043_vm4, %v5419_v5  ;;  %v8641_v5 = vld [vmem:[%s10496_s7 + $0xf8] sm:$0xff]   ;;  %v8643_v7 = vld [vmem:[%s10495_s6 + $0xe0] sm:$0xff]  }
0x1fcf   : > { %8152 = vmatpush3.bf16.msra.mxu0 %v8630_v4  ;;  %8159 = vmatprep.mubr.msk.bf16.mxu0 %vm8777_vm0, %v8776_v3  ;;  %v8640_v4 = vld [vmem:[%s10496_s7 + $0xf0] sm:$0xff]  }
0x1fd0   : > { %8153 = vmatprep.subr.bf16.mxu0 %v8776_v3 }
0x1fd3   : > { %8154 = vmatpush3.bf16.msra.mxu0 %v8631_v9 }
0x1fd4   : > { %8155 = vmatprep.subr.bf16.mxu0 %v8776_v3 }
0x1fd7   : > { %8156 = vmatpush3.bf16.msra.mxu0 %v8632_v10 }
0x1fd8   : > { %8157 = vmatprep.subr.bf16.mxu0 %v8776_v3 }
0x1fdb   : > { %v5548_v12 = vpop.f32.mrb[104].mxu1  ;;  %8158 = vmatpush3.bf16.msra.mxu0 %v8633_v11 }
0x1fdc   : > { %v8149_v15 = vpop.f32.mrb[105].mxu1  ;;  %8175 = vmatprep.subr.bf16.mxu0 %v8776_v3  ;;  %v5549_v38 = vadd.f32 %v7169_v22, %v5548_v12  ;;  %v8644_v12 = vld [vmem:[%s10495_s6 + $0xe8] sm:$0xff]  }
0x1fdd   : > { %v5551_v16 = vpop.f32.mrb[106].mxu1  ;;  %v8645_v15 = vld [vmem:[%s10495_s6 + $0xf0] sm:$0xff]  }
0x1fde   : > { %v8150_v55 = vpop.f32.mrb[107].mxu1  ;;  %8160 = vmatmul.mubr.msk.bf16.vlgmr.msra.gmra.mrb[100].mxu0 %vm2781_vm3, %v10022_v13  ;;  %v5716_v43 = vpack.c.bf16 %v5549_v38, %v5549_v38  ;;  %v8646_v16 = vld [vmem:[%s10495_s6 + $0xf8] sm:$0xff]  }
0x1fdf   : > { %8177 = vmatprep.mubr.msk.bf16.mxu0 %vm8777_vm0, %v8776_v3 }
0x1feb   : > { %v5710_v17 = vpop.f32.mrb[108].mxu1 }
0x1fec   : > { %v8173_v18 = vpop.f32.mrb[109].mxu1  ;;  %v5711_v37 = vadd.f32 %v7199_v14, %v5710_v17 }
0x1fed   : > { %v5713_v19 = vpop.f32.mrb[110].mxu1 }
0x1fee   : > { %v8174_v20 = vpop.f32.mrb[111].mxu1  ;;  %v5776_v39 = vpack.c.bf16 %v5711_v37, %v5711_v37 }
0x1ff0   : > { %v5781_v44 = vsel %vm2707_vm1, %v5776_v39, 0 }
0x20a1   : > { %v5466_v25 = vpop.f32.mrb[96].mxu0 }
0x20a2   : > { %v10238_v27 = vadd.f32 %v5466_v25, %v5068_v24  ;;  %v8137_v28 = vpop.f32.mrb[97].mxu0 }
0x20a3   : > { %v5469_v29 = vpop.f32.mrb[98].mxu0 }
0x20a4   : > { %v8138_v30 = vpop.f32.mrb[99].mxu0 }
0x20b1   : > { %v5629_v32 = vpop.f32.mrb[100].mxu0 }
0x20b2   : > { %v5630_v33 = vadd.f32 %v7184_v31, %v5629_v32  ;;  %v8161_v34 = vpop.f32.mrb[101].mxu0 }
0x20b3   : > { %v5632_v35 = vpop.f32.mrb[102].mxu0 }
0x20b4   : > { %v5717_v36 = vpack.c.bf16 %v5630_v33, %v5630_v33  ;;  %v8162_v21 = vpop.f32.mrb[103].mxu0  ;;  %v7235_v33 = vld [vmem:[%s10497_s8 + $0x13] ss:$0 sm:$0xff]  ;;  %v7250_v35 = vld [vmem:[%s10497_s8 + $0x17] ss:$0 sm:$0xff] }
0x20b6   : > { %v5722_v26 = vsel %vm3043_vm4, %v5717_v36, 0 }
0x20b7   : > { %8176 = vmatpush3.bf16.xpose.msra.mxu0 %v5722_v26 }
0x20b8   : > { %8181 = vmatprep.subr.bf16.mxu0 %v8776_v3 }
0x20be   : > { %8178 = vmatmul.mubr.msk.bf16.vlgmr.msra.gmra.mrb[104].mxu0 %vm3043_vm4, %v5716_v43 }
0x20bf   : > { %8182 = vmatpush3.bf16.msra.mxu0 %v5781_v44  ;;  %8183 = vmatprep.mubr.msk.bf16.mxu0 %vm8777_vm0, %v8776_v3 }
0x20c0   : > { %8193 = vmatprep.subr.bf16.mxu0 %v8776_v3 }
0x2191   : > { %v5758_v45 = vpop.f32.mrb[104].mxu0 }
0x2192   : > { %v5759_v46 = vadd.f32 %v10068_v40, %v5758_v45  ;;  %v8179_v47 = vpop.f32.mrb[105].mxu0 }
0x2193   : > { %v5761_v48 = vpop.f32.mrb[106].mxu0 }
0x2194   : > { %v8180_v49 = vpop.f32.mrb[107].mxu0  ;;  %v5764_v50 = vsel %vm3090_vm5, %v5759_v46, -inf }
0x2195   : > { %5765 = vmax.xlane.f32.xlu0 %v5764_v50 }
0x2222   : > { %v5766_v51 = vpop.xlane.xlu0 %5765 }
0x2223   : > { %v5767_v52 = vsub.f32 %v5759_v46, %v5766_v51 }
0x2225   : > { %v5768_v41 = vmul.f32 1.442695, %v5767_v52 }
0x2227   : > { %8696 = vpow2.f32 %v5768_v41 }
0x2231   : > { %v8697_v53 = vpop.eup %8696 }
0x2232   : > { %v5770_v56 = vsel %vm3090_vm5, %v8697_v53, 0.0 }
0x2233   : > { %5771 = vadd.xlane.f32.xlu1 %v5770_v56 }
0x22c0   : > { %v5772_v58 = vpop.xlane.xlu1 %5771 }
0x22c1   : > { %8698 = vrcp.f32 %v5772_v58 }
0x22cb   : > { %v8699_v59 = vpop.eup %8698 }
0x22cc   : > { %v5774_v60 = vmul.f32 %v8699_v59, %v8697_v53 }
0x22ce   : > { %v5775_v61 = vpack.c.bf16 %v5774_v60, %v5774_v60 }
0x22d0   : > { %8184 = vmatmul.mubr.msk.bf16.vlgmr.msra.gmra.mrb[108].mxu0 %vm3090_vm5, %v5775_v61 }
0x22d1   : > { %8194 = vmatpush3.bf16.msra.mxu0 %v8634_v42  ;;  %8201 = vmatprep.mubr.msk.bf16.mxu0 %vm8777_vm0, %v8776_v3 }
0x22d2   : > { %8195 = vmatprep.subr.bf16.mxu0 %v8776_v3 }
0x22d5   : > { %8196 = vmatpush3.bf16.msra.mxu0 %v8635_v62 }
0x22d6   : > { %8197 = vmatprep.subr.bf16.mxu0 %v8776_v3 }
0x22d9   : > { %8198 = vmatpush3.bf16.msra.mxu0 %v8636_v63 }
0x22da   : > { %8199 = vmatprep.subr.bf16.mxu0 %v8776_v3 }
0x22dd   : > { %8200 = vmatpush3.bf16.msra.mxu0 %v8637_v0 }
0x22de   : > { %8217 = vmatprep.subr.bf16.mxu0 %v8776_v3 }
0x22e0   : > { %8202 = vmatmul.mubr.msk.bf16.vlgmr.msra.gmra.mrb[112].mxu0 %vm2781_vm3, %v10022_v13 }
0x22e1   : > { %8218 = vmatpush3.bf16.msra.mxu0 %v8638_v1  ;;  %8225 = vmatprep.mubr.msk.bf16.mxu0 %vm8777_vm0, %v8776_v3 }
0x22e2   : > { %8219 = vmatprep.subr.bf16.mxu0 %v8776_v3 }
0x22e5   : > { %8220 = vmatpush3.bf16.msra.mxu0 %v8639_v2 }
0x22e6   : > { %8221 = vmatprep.subr.bf16.mxu0 %v8776_v3 }
0x22e9   : > { %8222 = vmatpush3.bf16.msra.mxu0 %v8640_v4 }
0x22ea   : > { %8223 = vmatprep.subr.bf16.mxu0 %v8776_v3 }
0x22ed   : > { %8224 = vmatpush3.bf16.msra.mxu0 %v8641_v5 }
0x22ee   : > { %8241 = vmatprep.subr.bf16.mxu0 %v8776_v3 }
0x22f0   : > { %8226 = vmatmul.mubr.msk.bf16.vlgmr.msra.gmra.mrb[116].mxu0 %vm2781_vm3, %v10022_v13 }
0x22f1   : > { %8243 = vmatprep.mubr.msk.bf16.mxu0 %vm8777_vm0, %v8776_v3 }
0x23a3   : > { %v5817_v6 = vpop.f32.mrb[108].mxu0 }
0x23a4   : > { %v5823_v8 = vpack.c.bf16 %v5817_v6, %v5817_v6  ;;  %v8185_v9 = vpop.f32.mrb[109].mxu0 }
0x23a5   : > { %v5820_v10 = vpop.f32.mrb[110].mxu0 }
0x23a6   : > { %v8186_v11 = vpop.f32.mrb[111].mxu0  ;;  %8190 = vmatmul.mubr.msk.bf16.vlgmr.msra.gmra.mrb[112].mxu1 %vm3043_vm4, %v5823_v8 }
0x23a7   : > { %8206 = vmatpush3.bf16.msra.mxu1 %v8643_v7  ;;  %8213 = vmatprep.mubr.msk.bf16.mxu1 %vm8777_vm0, %v8776_v3 }
0x23a8   : > { %8207 = vmatprep.subr.bf16.mxu1 %v8776_v3 }
0x23ab   : > { %8208 = vmatpush3.bf16.msra.mxu1 %v8644_v12 }
0x23ac   : > { %8209 = vmatprep.subr.bf16.mxu1 %v8776_v3 }
0x23af   : > { %8210 = vmatpush3.bf16.msra.mxu1 %v8645_v15 }
0x23b0   : > { %8211 = vmatprep.subr.bf16.mxu1 %v8776_v3 }
0x23b3   : > { %v5952_v55 = vpop.f32.mrb[112].mxu0  ;;  %8212 = vmatpush3.bf16.msra.mxu1 %v8646_v16  ;;  %v8648_v16 = vld [vmem:[%s10500_s11 + $0x20] sm:$0xff]  }
0x23b4   : > { %v8203_v17 = vpop.f32.mrb[113].mxu0  ;;  %8229 = vmatprep.subr.bf16.mxu1 %v8776_v3 }
0x23b5   : > { %v5955_v18 = vpop.f32.mrb[114].mxu0  ;;  %v8651_v17 = vld [vmem:[%s10500_s11 + $0x38] sm:$0xff]  }
0x23b6   : > { %v8204_v19 = vpop.f32.mrb[115].mxu0  ;;  %8214 = vmatmul.mubr.msk.bf16.vlgmr.msra.gmra.mrb[116].mxu1 %vm2781_vm3, %v10022_v13  ;;  %v8652_v18 = vld [vmem:[%s10502_s13 + $0x40] sm:$0xff]  }
0x23b7   : > { %8231 = vmatprep.mubr.msk.bf16.mxu1 %vm8777_vm0, %v8776_v3 }
0x23c3   : > { %v6114_v20 = vpop.f32.mrb[116].mxu0 }
0x23c4   : > { %v8227_v23 = vpop.f32.mrb[117].mxu0  ;;  %v6115_v37 = vadd.f32 %v7250_v35, %v6114_v20 }
0x23c5   : > { %v6117_v24 = vpop.f32.mrb[118].mxu0 }
0x23c6   : > { %v8228_v25 = vpop.f32.mrb[119].mxu0  ;;  %v6180_v39 = vpack.c.bf16 %v6115_v37, %v6115_v37 }
0x23c8   : > { %v6185_v44 = vsel %vm2707_vm1, %v6180_v39, 0 }
0x2479   : > { %v5870_v28 = vpop.f32.mrb[112].mxu1 }
0x247a   : > { %v5876_v29 = vadd.f32 %v5870_v28, %v10238_v27  ;;  %v8191_v30 = vpop.f32.mrb[113].mxu1  ;;  %v7220_v27 = vld [vmem:[%s10497_s8 + $0xf] ss:$0 sm:$0xff] }
0x247b   : > { %v5873_v31 = vpop.f32.mrb[114].mxu1  ;;  %v5953_v38 = vadd.f32 %v7220_v27, %v5952_v55  ;;  %v8650_v55 = vld [vmem:[%s10500_s11 + $0x30] sm:$0xff]  }
0x247c   : > { %v8192_v32 = vpop.f32.mrb[115].mxu1  ;;  %v8654_v30 = vld [vmem:[%s10502_s13 + $0x50] sm:$0xff]   ;;  %v8655_v31 = vld [vmem:[%s10502_s13 + $0x58] sm:$0xff]  }
0x247d   : > { %v6120_v43 = vpack.c.bf16 %v5953_v38, %v5953_v38  ;;  %v8656_v32 = vld [vmem:[%s10502_s13 + $0x60] sm:$0xff]  }
0x2489   : > { %v6033_v34 = vpop.f32.mrb[116].mxu1 }
0x248a   : > { %v6034_v14 = vadd.f32 %v7235_v33, %v6033_v34  ;;  %v8215_v13 = vpop.f32.mrb[117].mxu1  ;;  %v8657_v33 = vld [vmem:[%s10502_s13 + $0x68] sm:$0xff]   ;;  %v8658_v34 = vld [vmem:[%s10502_s13 + $0x70] sm:$0xff]  }
0x248b   : > { %v6036_v36 = vpop.f32.mrb[118].mxu1  ;;  %v7271_v13 = vld [vmem:[%s10501_s12 + $0x1] ss:$0 sm:$0xff] }
0x248c   : > { %v6121_v21 = vpack.c.bf16 %v6034_v14, %v6034_v14  ;;  %v8216_v22 = vpop.f32.mrb[119].mxu1  ;;  %v8659_v14 = vld [vmem:[%s10502_s13 + $0x78] sm:$0xff]  }
0x248e   : > { %v6126_v26 = vsel %vm3043_vm4, %v6121_v21, 0 }
0x248f   : > { %8230 = vmatpush3.bf16.xpose.msra.mxu1 %v6126_v26 }
0x2490   : > { %8235 = vmatprep.subr.bf16.mxu1 %v8776_v3 }
0x2496   : > { %8232 = vmatmul.mubr.msk.bf16.vlgmr.msra.gmra.mrb[120].mxu1 %vm3043_vm4, %v6120_v43 }
0x2497   : > { %8236 = vmatpush3.bf16.msra.mxu1 %v6185_v44  ;;  %8237 = vmatprep.mubr.msk.bf16.mxu1 %vm8777_vm0, %v8776_v3 }
0x2498   : > { %8247 = vmatprep.subr.bf16.mxu1 %v8776_v3 }
0x2569   : > { %v6162_v45 = vpop.f32.mrb[120].mxu1 }
0x256a   : > { %v6163_v46 = vadd.f32 %v10068_v40, %v6162_v45  ;;  %v8233_v47 = vpop.f32.mrb[121].mxu1  ;;  %v8647_v40 = vld [vmem:[%s10498_s9 + $0x38] sm:$0xff]  }
0x256b   : > { %v6165_v48 = vpop.f32.mrb[122].mxu1  ;;  %8242 = vmatpush3.bf16.msra.mxu0 %v8647_v40 }
0x256c   : > { %v8234_v49 = vpop.f32.mrb[123].mxu1  ;;  %v6168_v50 = vsel %vm3090_vm5, %v6163_v46, -inf  ;;  %8259 = vmatprep.subr.bf16.mxu0 %v8776_v3 }
0x256d   : > { %6169 = vmax.xlane.f32.xlu0 %v6168_v50  ;;  %v7294_v49 = vld [vmem:[%s10503_s14 + $0x1] ss:$0 sm:$0xff] }
0x25fa   : > { %v6170_v51 = vpop.xlane.xlu0 %6169 }
0x25fb   : > { %v6171_v52 = vsub.f32 %v6163_v46, %v6170_v51 }
0x25fd   : > { %v6172_v41 = vmul.f32 1.442695, %v6171_v52 }
0x25ff   : > { %8700 = vpow2.f32 %v6172_v41 }
0x2609   : > { %v8701_v53 = vpop.eup %8700 }
0x260a   : > { %v6174_v56 = vsel %vm3090_vm5, %v8701_v53, 0.0 }
0x260b   : > { %6175 = vadd.xlane.f32.xlu1 %v6174_v56 }
0x2698   : > { %v6176_v57 = vpop.xlane.xlu1 %6175 }
0x2699   : > { %8702 = vrcp.f32 %v6176_v57 }
0x26a3   : > { %v8703_v58 = vpop.eup %8702 }
0x26a4   : > { %v6178_v59 = vmul.f32 %v8703_v58, %v8701_v53 }
0x26a6   : > { %v6179_v60 = vpack.c.bf16 %v6178_v59, %v6178_v59 }
0x26a8   : > { %8238 = vmatmul.mubr.msk.bf16.vlgmr.msra.gmra.mrb[124].mxu1 %vm3090_vm5, %v6179_v60 }
0x26a9   : > { %8255 = vmatprep.mubr.msk.bf16.mxu1 %vm8777_vm0, %v8776_v3  ;;  %8248 = vmatpush3.bf16.msra.mxu1 %v8648_v16 }
0x26aa   : > { %8249 = vmatprep.subr.bf16.mxu1 %v8776_v3 }
0x277b   : > { %v6221_v42 = vpop.f32.mrb[124].mxu1 }
0x277c   : > { %v6227_v61 = vpack.c.bf16 %v6221_v42, %v6221_v42  ;;  %v8239_v62 = vpop.f32.mrb[125].mxu1 }
0x277d   : > { %v6224_v63 = vpop.f32.mrb[126].mxu1  ;;  %v8661_v62 = vld [vmem:[%s10504_s15 + $0x8] sm:$0xff]  }
0x277e   : > { %v8240_v0 = vpop.f32.mrb[127].mxu1  ;;  %8244 = vmatmul.mubr.msk.bf16.vlgmr.msra.gmra.mrb[120].mxu0 %vm3043_vm4, %v6227_v61  ;;  %v8660_v61 = vld [vmem:[%s10504_s15] sm:$0xff]   ;;  %v8662_v63 = vld [vmem:[%s10504_s15 + $0x10] sm:$0xff]  }
0x277f   : > { %8275 = vmatprep.mubr.msk.bf16.mxu0 %vm8777_vm0, %v8776_v3  ;;  %8260 = vmatpush3.bf16.msra.mxu0 %v8652_v18  ;;  %v8663_v0 = vld [vmem:[%s10504_s15 + $0x18] sm:$0xff]  }
0x2780   : > { %8261 = vmatprep.subr.bf16.mxu0 %v8776_v3 }
0x2851   : > { %v6274_v1 = vpop.f32.mrb[120].mxu0 }
0x2852   : > { %v6280_v2 = vadd.f32 %v6274_v1, %v5876_v29  ;;  %v8245_v4 = vpop.f32.mrb[121].mxu0  ;;  %v8653_v29 = vld [vmem:[%s10502_s13 + $0x48] sm:$0xff]  }
0x2853   : > { %v6277_v5 = vpop.f32.mrb[122].mxu0  ;;  %8262 = vmatpush3.bf16.msra.mxu0 %v8653_v29 }
0x2854   : > { %v10360_v6 = vadd.f32 %v6280_v2, %v9981_v54  ;;  %v8246_v7 = vpop.f32.mrb[123].mxu0  ;;  %v8649_v54 = vld [vmem:[%s10500_s11 + $0x28] sm:$0xff]   ;;  %8263 = vmatprep.subr.bf16.mxu0 %v8776_v3 }
0x2855   : > { %8250 = vmatpush3.bf16.msra.mxu1 %v8649_v54 }
0x2856   : > { %v6282_v8 = vsel %vm2781_vm3, %v10360_v6, 0.0  ;;  %8251 = vmatprep.subr.bf16.mxu1 %v8776_v3 }
0x2857   : > { %6283 = vadd.xlane.f32.xlu0 %v6282_v8  ;;  %8264 = vmatpush3.bf16.msra.mxu0 %v8654_v30 }
0x2858   : > { %8265 = vmatprep.subr.bf16.mxu0 %v8776_v3 }
0x2859   : > { %8252 = vmatpush3.bf16.msra.mxu1 %v8650_v55 }
0x285a   : > { %8253 = vmatprep.subr.bf16.mxu1 %v8776_v3 }
0x285b   : > { %8266 = vmatpush3.bf16.msra.mxu0 %v8655_v31 }
0x285c   : > { %8267 = vmatprep.subr.bf16.mxu0 %v8776_v3 }
0x285d   : > { %8254 = vmatpush3.bf16.msra.mxu1 %v8651_v17 }
0x285e   : > { %8279 = vmatprep.subr.bf16.mxu1 %v8776_v3 }
0x285f   : > { %8268 = vmatpush3.bf16.msra.mxu0 %v8656_v32 }
0x2860   : > { %8269 = vmatprep.subr.bf16.mxu0 %v8776_v3 }
0x2863   : > { %8270 = vmatpush3.bf16.msra.mxu0 %v8657_v33 }
0x2864   : > { %8271 = vmatprep.subr.bf16.mxu0 %v8776_v3 }
0x2867   : > { %8272 = vmatpush3.bf16.msra.mxu0 %v8658_v34 }
0x2868   : > { %8273 = vmatprep.subr.bf16.mxu0 %v8776_v3 }
0x286b   : > { %8274 = vmatpush3.bf16.msra.mxu0 %v8659_v14 }
0x28e4   : > { %v6284_v9 = vpop.xlane.xlu0 %6283 }
0x28e5   : > { %v6285_v10 = vmul.f32 0.015625, %v6284_v9 }
0x28e7   : > { %v6286_v11 = vsub.f32 %v10360_v6, %v6285_v10 }
0x28e9   : > { %v6287_v12 = vmul.f32 %v6286_v11, %v6286_v11 }
0x28eb   : > { %v6288_v15 = vsel %vm2781_vm3, %v6287_v12, 0.0 }
0x28ec   : > { %6289 = vadd.xlane.f32.xlu1 %v6288_v15 }
0x2979   : > { %v6290_v19 = vpop.xlane.xlu1 %6289 }
0x297a   : > { %v6291_v20 = vmul.f32 0.015625, %v6290_v19 }
0x297c   : > { %v6292_v23 = vadd.f32 1e-06, %v6291_v20 }
0x297e   : > { %8704 = vrsqrt.f32 %v6292_v23 }
0x2988   : > { %v8705_v24 = vpop.eup %8704 }
0x2989   : > { %v6294_v25 = vmul.f32 %v8705_v24, %v6286_v11 }
0x298b   : > { %v6295_v28 = vpack.c.bf16 %v6294_v25, %v6294_v25 }
0x298d   : > { %8256 = vmatmul.mubr.msk.bf16.vlgmr.msra.gmra.mrb[128].mxu1 %vm2781_vm3, %v6295_v28 }
0x298e   : > { %8287 = vmatprep.mubr.msk.bf16.mxu1 %vm8777_vm0, %v8776_v3  ;;  %8280 = vmatpush3.bf16.msra.mxu1 %v8660_v61 }
0x298f   : > { %8281 = vmatprep.subr.bf16.mxu1 %v8776_v3 }
0x2992   : > { %8282 = vmatpush3.bf16.msra.mxu1 %v8661_v62 }
0x2993   : > { %8283 = vmatprep.subr.bf16.mxu1 %v8776_v3 }
0x2996   : > { %8284 = vmatpush3.bf16.msra.mxu1 %v8662_v63 }
0x2997   : > { %8285 = vmatprep.subr.bf16.mxu1 %v8776_v3  ;;  %v6527_v3 = vld [vmem:[%s10505_s16] sm:$0x1] }
0x299a   : > { %8286 = vmatpush3.bf16.msra.mxu1 %v8663_v0 }
0x2a60   : > { %v6374_v35 = vpop.f32.mrb[128].mxu1 }
0x2a61   : > { %v6375_v36 = vadd.f32 %v7271_v13, %v6374_v35  ;;  %v8257_v21 = vpop.f32.mrb[129].mxu1 }
0x2a62   : > { %v6377_v22 = vpop.f32.mrb[130].mxu1 }
0x2a63   : > { %v6381_v27 = vmul.f32 0.044715, %v6375_v36  ;;  %v8258_v37 = vpop.f32.mrb[131].mxu1  ;;  %v6380_v45 = vmul.f32 0.5, %v6375_v36 }
0x2a65   : > { %v6382_v26 = vmul.f32 %v6381_v27, %v6375_v36 }
0x2a67   : > { %v6383_v38 = vmul.f32 %v6382_v26, %v6375_v36 }
0x2a69   : > { %v6384_v39 = vadd.f32 %v6383_v38, %v6375_v36 }
0x2a6b   : > { %v6385_v43 = vmul.f32 0.7978846, %v6384_v39 }
0x2a6d   : > { %8706 = vtanh.f32 %v6385_v43 }
0x2a77   : > { %v8707_v44 = vpop.eup %8706 }
0x2a78   : > { %v6387_v46 = vadd.f32 1.0, %v8707_v44 }
0x2a7a   : > { %v6388_v47 = vmul.f32 %v6387_v46, %v6380_v45 }
0x2a7c   : > { %v6389_v48 = vpack.c.bf16 %v6388_v47, %v6388_v47 }
0x2a7e   : > { %8276 = vmatmul.mubr.bf16.vlgmr.msra.gmra.mrb[124].mxu0 %v6389_v48 }
0x2b51   : > { %v6497_v50 = vpop.f32.mrb[124].mxu0 }
0x2b52   : > { %v6498_v51 = vadd.f32 %v7294_v49, %v6497_v50  ;;  %v8277_v52 = vpop.f32.mrb[125].mxu0 }
0x2b53   : > { %v6500_v41 = vpop.f32.mrb[126].mxu0 }
0x2b54   : > { %v8278_v53 = vpop.f32.mrb[127].mxu0  ;;  %v6503_v56 = vadd.f32 %v6498_v51, %v10360_v6 }
0x2b56   : > { %v6505_v57 = vsel %vm6504_vm6, %v6503_v56, 0.0 }
0x2b57   : > { %6506 = vadd.xlane.f32.xlu0 %v6505_v57 }
0x2be4   : > { %v6507_v58 = vpop.xlane.xlu0 %6506 }
0x2be5   : > { %v6508_v59 = vmul.f32 0.015625, %v6507_v58 }
0x2be7   : > { %v6509_v60 = vsub.f32 %v6503_v56, %v6508_v59 }
0x2be9   : > { %v6510_v40 = vmul.f32 %v6509_v60, %v6509_v60 }
0x2beb   : > { %v6511_v42 = vsel %vm6504_vm6, %v6510_v40, 0.0 }
0x2bec   : > { %6512 = vadd.xlane.f32.xlu1 %v6511_v42 }
0x2c79   : > { %v6513_v1 = vpop.xlane.xlu1 %6512 }
0x2c7a   : > { %v6514_v2 = vmul.f32 0.015625, %v6513_v1 }
0x2c7c   : > { %v6515_v4 = vadd.f32 1e-06, %v6514_v2 }
0x2c7e   : > { %8708 = vrsqrt.f32 %v6515_v4 }
0x2c88   : > { %v8709_v5 = vpop.eup %8708 }
0x2c89   : > { %v6517_v6 = vmul.f32 %v8709_v5, %v6509_v60 }
0x2c8b   : > { %v6518_v7 = vpack.c.bf16 %v6517_v6, %v6517_v6 }
0x2c8d   : > { %8288 = vmatmul.mubr.msk.bf16.vlgmr.msra.gmra.mrb[132].mxu1 %vm2781_vm3, %v6518_v7 }
0x2d60   : > { %v6589_v8 = vpop.f32.mrb[132].mxu1 }
0x2d61   : > { %v6590_v9 = vadd.f32 %v6589_v8, %v6527_v3  ;;  %v8289_v10 = vpop.f32.mrb[133].mxu1 }
0x2d62   : > { %v6592_v11 = vpop.f32.mrb[134].mxu1 }
0x2d63   : > { %6595 = vst [vmem:[%s540_s21] sm:$0x1] %v6590_v9  ;;  %v8290_v12 = vpop.f32.mrb[135].mxu1 }
0x2d64   : > { %8724 = shalt.err (!%p8721_p3)
}
0x2d65   : > { %s8725_s19 = scalar_lea.hbm %s10447_s30, 16  ;;  %s8729_s21 = scalar_lea.hbm %s10506_s17, 32 }
0x2d66   : > { %p8726_p4 = scmp.ne.s32.totalorder %s10447_s30, %s8725_s19  ;;  %p8730_p9 = scmp.lt.u32.totalorder %s10447_s30, %s10506_s17 }
0x2d67   : > { %p8731_p10 = scmp.lt.u32.totalorder %s8729_s21, %s8725_s19  ;;  %p8733_p12 = scmp.lt.u32.totalorder %s8725_s19, %s10447_s30 }
0x2d68   : > { %p8727_p7 = pnand %p8726_p4, %p8907_p5 }
0x2d69   : > { %p8732_p11 = por %p8731_p10, %p8730_p9 }
0x2d6a   : > { %p8728_p8 = pneg %p8727_p7 }
0x2d6b   : > { %p8734_p13 = por %p8733_p12, %p8732_p11 }
0x2d6d   : > { %p8735_p0 = pnand %p8734_p13, %p8728_p8 }
0x2d6f   : > { %8738 = shalt.err (!%p8735_p0)
}
0x2d70   : > { %8292 = dma.vmem_to_hbm [thread:$0]  (%p8907_p5), %s10449_s29, 16, %s10447_s30, %s6597_s23  }
0x2d71 PF: > { %s10525_s28 = sld [smem:[#allocation7_spill]]  ;;  %s10526_s24 = sld [smem:[#allocation5_spill]] }
0x2d77   : > { %p8298_p1 = scmp.ge.s32.totalorder %s10525_s28, 2  ;;  %s6621_s0 = sand.u32 1, %s10526_s24  }
0x2d78   : > { %s6622_s20 = scalar_lea.sflag [#allocation3], %s6621_s0 }
0x2d79   : > { %p8295_p2 = pnand %p8298_p1, %p8911_p6 }
0x2d7b   : > { %8756 = dma.done.wait (!%p8295_p2), %s6622_s20, 16  }
0x2d7c   : > { %8758 = vsyncadd (!%p8295_p2), %s6622_s20, 4294967280  ;;  %s10528_s27 = sld [smem:[#allocation8_spill]]  ;;  %s10529_s19 = sld [smem:[#allocation6_spill]] }
0x2d7d   : > { %s10530_s26 = sld [smem:[#allocation9_spill]]  ;;  %s10531_s24 = smov %s8765_s25 }
0x2d82   : > { %p27_p3 = scmp.ge.s32.totalorder %s10528_s27, 4   ;;  %s10532_s25 = smov %s10529_s19 }
0x2d84   :  { %29 = sbr.rel (!%p27_p3) target bundleno = 6 (0x6), region = 179 }
0x2d8b   :  { %6626 = vsyncpa [#allocation3], 1 }
0x2d8c   :  { %6628 = vsyncpa [#allocation3 + $0x1], 1 }

</bundles_post_ra>
